<compile_context>
chip_gen: v7x
topology: tpu7x:2x2x1
jax: 0.10.0
libtpu: 0.0.40
codegen_flags: <defaults>
</compile_context>

<pallas_src>
import functools

import jax
import jax.numpy as jnp
from jax.experimental import pallas as pl
from jax.experimental.pallas import tpu as pltpu

IN_FEATURES = 380 * 240   # 91200
OUT_FEATURES = 6
N_PACK = 8                # 6 output rows padded to 8 (full-dim blocks are legal)
DEFAULT_TK = 22912        # 179 * 128 -> 4 K tiles total for K = 91200


def _linear_partial_kernel(x_ref, w_ref, b_ref, o_ref, *, k_valid, tk):
    """One K-tile of a partial y_c = x[:, K_half_c] @ W[:, K_half_c].T.

    Grid = (2, n_half): axis 0 ("parallel") selects which half of the K
    reduction this partial covers (split across TensorCores on v7x); axis 1
    ("arbitrary") walks the K tiles of that half.  The output block (one
    partial per axis-0 slot) is resident across axis 1 and is used directly
    as the f32 accumulator.  Bias is folded into the c==0 partial's init.
    """
    c = pl.program_id(0)          # core-split half
    k = pl.program_id(1)          # K-tile within this half
    n_half = pl.num_programs(1)

    # Initialise the resident accumulator: broadcast bias on half 0, zeros on
    # half 1, so the wrapper only sums partials and slices (no extra bias op).
    @pl.when((k == 0) & (c == 0))
    def _():
        o_ref[...] = jnp.broadcast_to(b_ref[...], o_ref.shape)

    @pl.when((k == 0) & (c != 0))
    def _():
        o_ref[...] = jnp.zeros_like(o_ref)

    t = c * n_half + k            # global K-tile index
    tile_start = t * tk

    def accumulate(x_tile):
        # (B, tk) . (N_PACK, tk) contracting the LAST dims of both ("NT"
        # matmul, same form the TPU flash-attention kernels use).  Both
        # operands bf16 -> native MXU rate; accumulate in f32.
        o_ref[...] += jax.lax.dot_general(
            x_tile.astype(jnp.bfloat16),
            w_ref[...],
            dimension_numbers=(((1,), (1,)), ((), ())),
            preferred_element_type=jnp.float32,
        )

    # Fast path: tile lies entirely inside the valid K range.
    @pl.when(tile_start + tk <= k_valid)
    def _():
        accumulate(x_ref[...])

    # Ragged tail tile: x columns past K come from an out-of-bounds block and
    # are undefined (possibly NaN/Inf) -> explicitly zero them before the dot.
    @pl.when(tile_start + tk > k_valid)
    def _():
        col = tile_start + jax.lax.broadcasted_iota(jnp.int32, x_ref.shape, 1)
        accumulate(jnp.where(col < k_valid, x_ref[...], 0.0))


def pack_params(weight, bias, *, tk=DEFAULT_TK):
    """One-time weight/bias packing (call at init, NOT per forward call).

    weight: (6, K) nn.Linear.weight -> (8, K_pad) bf16, lane-major (N, K)
            orientation, rows 6->8 and columns K->K_pad zero-padded.
    bias:   (6,)                    -> (1, 8) f32, zero-padded.
    """
    n_out, k_in = weight.shape
    assert tk % 128 == 0, "tk must be a multiple of 128 (lane tiling)"
    n_half = -(-k_in // (2 * tk))          # ceil: K tiles per core-split half
    k_pad = 2 * n_half * tk
    w_packed = (
        jnp.zeros((N_PACK, k_pad), jnp.bfloat16)
        .at[:n_out, :k_in]
        .set(weight.astype(jnp.bfloat16))
    )
    b_packed = (
        jnp.zeros((1, N_PACK), jnp.float32)
        .at[0, :n_out]
        .set(bias.astype(jnp.float32))
    )
    return w_packed, b_packed


@functools.partial(jax.jit, static_argnames=("tk",))
def cafenet_forward(x, w_packed, b_packed, *, tk=DEFAULT_TK):
    """Pallas implementation of CAFENet.forward.

    Args:
      x:        (B, 91200) float32 input (not padded, not copied per call).
      w_packed: (8, K_pad) bfloat16 pre-packed weight from pack_params().
      b_packed: (1, 8)     float32 pre-packed bias from pack_params().
      tk:       K-tile size (multiple of 128); must match pack_params().

    Returns:
      (B, 6) float32 logits (no activation, matching the PyTorch module).
    """
    B, K = x.shape
    n_pack, K_pad = w_packed.shape
    assert n_pack == N_PACK and b_packed.shape == (1, N_PACK)
    assert K_pad % (2 * tk) == 0 and K_pad >= K
    assert K_pad - K < tk, "only the last K tile may be ragged"
    n_half = K_pad // (2 * tk)   # K tiles per core-split half

    kernel = functools.partial(_linear_partial_kernel, k_valid=K, tk=tk)

    partials = pl.pallas_call(
        kernel,
        out_shape=jax.ShapeDtypeStruct((2, B, N_PACK), jnp.float32),
        grid_spec=pltpu.PrefetchScalarGridSpec(
            num_scalar_prefetch=0,
            grid=(2, n_half),
            in_specs=[
                # x tile: (B, tk); B equals the full first array dim.  The
                # last tile extends past K; the kernel masks it explicitly.
                pl.BlockSpec((B, tk), lambda c, k: (0, c * n_half + k)),
                # lane-major packed weight tile: (8, tk), 8 contiguous rows.
                pl.BlockSpec((N_PACK, tk), lambda c, k: (0, c * n_half + k)),
                # bias: tiny constant-index block, fetched once.
                pl.BlockSpec((1, N_PACK), lambda c, k: (0, 0)),
            ],
            # One resident (B, 8) f32 partial/accumulator per core-split slot.
            out_specs=pl.BlockSpec((None, B, N_PACK), lambda c, k: (c, 0, 0)),
        ),
        compiler_params=pltpu.CompilerParams(
            dimension_semantics=("parallel", "arbitrary"),
        ),
    )(x, w_packed, b_packed)

    # Combine the two core-split partials (bias already folded into partial 0)
    # and drop the 6->8 padding.
    return partials.sum(axis=0)[:, :OUT_FEATURES]


def init_params(key):
    """Deterministic nn.Linear-style init: U(-1/sqrt(fan_in), 1/sqrt(fan_in))."""
    k_w, k_b = jax.random.split(key)
    bound = 1.0 / jnp.sqrt(jnp.float32(IN_FEATURES))
    weight = jax.random.uniform(
        k_w, (OUT_FEATURES, IN_FEATURES), jnp.float32, -bound, bound
    )
    bias = jax.random.uniform(
        k_b, (OUT_FEATURES,), jnp.float32, -bound, bound
    )
    return weight, bias


if __name__ == "__main__":
    key = jax.random.PRNGKey(0)
    k_x, k_p = jax.random.split(key)

    B = 2  # small batch; feature dim (91200) is fixed by the module definition
    x = jax.random.normal(k_x, (B, IN_FEATURES), jnp.float32)
    weight, bias = init_params(k_p)

    # One-time packing (outside the per-call forward path).
    w_packed, b_packed = pack_params(weight, bias)

    y = cafenet_forward(x, w_packed, b_packed)
    y = jax.block_until_ready(y)

    # Reference check against plain JAX (f32).  bf16 operands over a 91200-
    # element reduction (f32 accumulation) warrant a slightly looser tolerance.
    y_ref = x @ weight.T + bias
    assert y.shape == (B, OUT_FEATURES)
    assert jnp.allclose(y, y_ref, atol=2e-2, rtol=2e-2), "mismatch vs reference"

    print("KERNEL_OK")
</pallas_src>

<mosaic_0001>
module attributes {stable_mosaic.version = 11 : i64} {
  func.func @_linear_partial_kernel(%arg0: i32, %arg1: i32, %arg2: memref<2x22912xf32, #tpu.memory_space<vmem>>, %arg3: memref<8x22912xbf16, #tpu.memory_space<vmem>>, %arg4: memref<1x8xf32, #tpu.memory_space<vmem>>, %arg5: memref<1x2x8xf32, #tpu.memory_space<vmem>>) attributes {dimension_semantics = [#tpu.dimension_semantics<parallel>, #tpu.dimension_semantics<arbitrary>], iteration_bounds = array<i64: 2, 2>, scalar_prefetch = 0 : i64, scratch_operands = 0 : i64, tpu.core_type = #tpu.core_type<tc>, window_params = [{transform_indices = @transform_0, window_bounds = array<i64: 2, 22912>}, {transform_indices = @transform_1, window_bounds = array<i64: 8, 22912>}, {pipeline_mode = #tpu.pipeline_mode<synchronous>, transform_indices = @transform_2, window_bounds = array<i64: 1, 8>}, {transform_indices = @transform_3, window_bounds = array<i64: 1, 2, 8>}]} {
    %c0_i32 = arith.constant 0 : i32
    %0 = arith.cmpi eq, %arg1, %c0_i32 : i32
    %c0_i32_0 = arith.constant 0 : i32
    %1 = arith.cmpi eq, %arg0, %c0_i32_0 : i32
    %2 = arith.andi %0, %1 : i1
    %3 = arith.extui %2 : i1 to i32
    %c0_i32_1 = arith.constant 0 : i32
    %4 = arith.cmpi ne, %3, %c0_i32_1 : i32
    scf.if %4 {
      %c0 = arith.constant 0 : index
      %c0_10 = arith.constant 0 : index
      %21 = vector.load %arg4[%c0, %c0_10] : memref<1x8xf32, #tpu.memory_space<vmem>>, vector<1x8xf32>
      %22 = vector.shape_cast %21 : vector<1x8xf32> to vector<1x8xf32>
      %23 = vector.broadcast %22 : vector<1x8xf32> to vector<2x8xf32>
      %c0_11 = arith.constant 0 : index
      %c0_12 = arith.constant 0 : index
      %c0_13 = arith.constant 0 : index
      %24 = vector.load %arg5[%c0_11, %c0_12, %c0_13] : memref<1x2x8xf32, #tpu.memory_space<vmem>>, vector<1x2x8xf32>
      %25 = vector.shape_cast %24 : vector<1x2x8xf32> to vector<2x8xf32>
      %26 = vector.shape_cast %23 : vector<2x8xf32> to vector<1x2x8xf32>
      tpu.vector_store %arg5[%c0_11, %c0_12, %c0_13], %26 {strides = array<i32>} : memref<1x2x8xf32, #tpu.memory_space<vmem>>, vector<1x2x8xf32>,
    } else {
    }
    %c0_i32_2 = arith.constant 0 : i32
    %5 = arith.cmpi eq, %arg1, %c0_i32_2 : i32
    %c0_i32_3 = arith.constant 0 : i32
    %6 = arith.cmpi ne, %arg0, %c0_i32_3 : i32
    %7 = arith.andi %5, %6 : i1
    %8 = arith.extui %7 : i1 to i32
    %c0_i32_4 = arith.constant 0 : i32
    %9 = arith.cmpi ne, %8, %c0_i32_4 : i32
    scf.if %9 {
      %cst = arith.constant 0.000000e+00 : f32
      %21 = vector.broadcast %cst : f32 to vector<2x8xf32>
      %c0 = arith.constant 0 : index
      %c0_10 = arith.constant 0 : index
      %c0_11 = arith.constant 0 : index
      %22 = vector.load %arg5[%c0, %c0_10, %c0_11] : memref<1x2x8xf32, #tpu.memory_space<vmem>>, vector<1x2x8xf32>
      %23 = vector.shape_cast %22 : vector<1x2x8xf32> to vector<2x8xf32>
      %24 = vector.shape_cast %21 : vector<2x8xf32> to vector<1x2x8xf32>
      tpu.vector_store %arg5[%c0, %c0_10, %c0_11], %24 {strides = array<i32>} : memref<1x2x8xf32, #tpu.memory_space<vmem>>, vector<1x2x8xf32>,
    } else {
    }
    %c2_i32 = arith.constant 2 : i32
    %10 = arith.muli %arg0, %c2_i32 : i32
    %11 = arith.addi %10, %arg1 : i32
    %c22912_i32 = arith.constant 22912 : i32
    %12 = arith.muli %11, %c22912_i32 : i32
    %c22912_i32_5 = arith.constant 22912 : i32
    %13 = arith.addi %12, %c22912_i32_5 : i32
    %c91200_i32 = arith.constant 91200 : i32
    %14 = arith.cmpi sle, %13, %c91200_i32 : i32
    %15 = arith.extui %14 : i1 to i32
    %c0_i32_6 = arith.constant 0 : i32
    %16 = arith.cmpi ne, %15, %c0_i32_6 : i32
    scf.if %16 {
      %c0 = arith.constant 0 : index
      %c0_10 = arith.constant 0 : index
      %21 = vector.load %arg2[%c0, %c0_10] : memref<2x22912xf32, #tpu.memory_space<vmem>>, vector<2x22912xf32>
      %c0_11 = arith.constant 0 : index
      %c0_12 = arith.constant 0 : index
      %c0_13 = arith.constant 0 : index
      %22 = vector.load %arg5[%c0_11, %c0_12, %c0_13] : memref<1x2x8xf32, #tpu.memory_space<vmem>>, vector<1x2x8xf32>
      %23 = vector.shape_cast %22 : vector<1x2x8xf32> to vector<2x8xf32>
      %24 = arith.truncf %21 : vector<2x22912xf32> to vector<2x22912xbf16>
      %c0_14 = arith.constant 0 : index
      %c0_15 = arith.constant 0 : index
      %25 = vector.load %arg3[%c0_14, %c0_15] : memref<8x22912xbf16, #tpu.memory_space<vmem>>, vector<8x22912xbf16>
      %cst = arith.constant dense<0.000000e+00> : vector<2x8xf32>
      %26 = tpu.matmul %24, %25, %cst {dimension_numbers = #tpu.dot_dimension_numbers<[1], [1], [0], [0], [0, 0, 1, 0], [], []>} : vector<2x22912xbf16>, vector<8x22912xbf16>, vector<2x8xf32> -> vector<2x8xf32>
      %27 = arith.addf %23, %26 : vector<2x8xf32>
      %c0_16 = arith.constant 0 : index
      %c0_17 = arith.constant 0 : index
      %c0_18 = arith.constant 0 : index
      %28 = vector.load %arg5[%c0_16, %c0_17, %c0_18] : memref<1x2x8xf32, #tpu.memory_space<vmem>>, vector<1x2x8xf32>
      %29 = vector.shape_cast %28 : vector<1x2x8xf32> to vector<2x8xf32>
      %30 = vector.shape_cast %27 : vector<2x8xf32> to vector<1x2x8xf32>
      tpu.vector_store %arg5[%c0_16, %c0_17, %c0_18], %30 {strides = array<i32>} : memref<1x2x8xf32, #tpu.memory_space<vmem>>, vector<1x2x8xf32>,
    } else {
    }
    %c22912_i32_7 = arith.constant 22912 : i32
    %17 = arith.addi %12, %c22912_i32_7 : i32
    %c91200_i32_8 = arith.constant 91200 : i32
    %18 = arith.cmpi sgt, %17, %c91200_i32_8 : i32
    %19 = arith.extui %18 : i1 to i32
    %c0_i32_9 = arith.constant 0 : i32
    %20 = arith.cmpi ne, %19, %c0_i32_9 : i32
    scf.if %20 {
      %21 = tpu.iota {dimensions = array<i32: 1>} : vector<2x22912xi32>
      %22 = vector.broadcast %12 : i32 to vector<2x22912xi32>
      %23 = arith.addi %22, %21 : vector<2x22912xi32>
      %c91200_i32_10 = arith.constant 91200 : i32
      %24 = vector.broadcast %c91200_i32_10 : i32 to vector<2x22912xi32>
      %25 = arith.cmpi slt, %23, %24 : vector<2x22912xi32>
      %c0 = arith.constant 0 : index
      %c0_11 = arith.constant 0 : index
      %26 = vector.load %arg2[%c0, %c0_11] : memref<2x22912xf32, #tpu.memory_space<vmem>>, vector<2x22912xf32>
      %cst = arith.constant 0.000000e+00 : f32
      %27 = vector.broadcast %cst : f32 to vector<2x22912xf32>
      %28 = arith.select %25, %26, %27 : vector<2x22912xi1>, vector<2x22912xf32>
      %c0_12 = arith.constant 0 : index
      %c0_13 = arith.constant 0 : index
      %c0_14 = arith.constant 0 : index
      %29 = vector.load %arg5[%c0_12, %c0_13, %c0_14] : memref<1x2x8xf32, #tpu.memory_space<vmem>>, vector<1x2x8xf32>
      %30 = vector.shape_cast %29 : vector<1x2x8xf32> to vector<2x8xf32>
      %31 = arith.truncf %28 : vector<2x22912xf32> to vector<2x22912xbf16>
      %c0_15 = arith.constant 0 : index
      %c0_16 = arith.constant 0 : index
      %32 = vector.load %arg3[%c0_15, %c0_16] : memref<8x22912xbf16, #tpu.memory_space<vmem>>, vector<8x22912xbf16>
      %cst_17 = arith.constant dense<0.000000e+00> : vector<2x8xf32>
      %33 = tpu.matmul %31, %32, %cst_17 {dimension_numbers = #tpu.dot_dimension_numbers<[1], [1], [0], [0], [0, 0, 1, 0], [], []>} : vector<2x22912xbf16>, vector<8x22912xbf16>, vector<2x8xf32> -> vector<2x8xf32>
      %34 = arith.addf %30, %33 : vector<2x8xf32>
      %c0_18 = arith.constant 0 : index
      %c0_19 = arith.constant 0 : index
      %c0_20 = arith.constant 0 : index
      %35 = vector.load %arg5[%c0_18, %c0_19, %c0_20] : memref<1x2x8xf32, #tpu.memory_space<vmem>>, vector<1x2x8xf32>
      %36 = vector.shape_cast %35 : vector<1x2x8xf32> to vector<2x8xf32>
      %37 = vector.shape_cast %34 : vector<2x8xf32> to vector<1x2x8xf32>
      tpu.vector_store %arg5[%c0_18, %c0_19, %c0_20], %37 {strides = array<i32>} : memref<1x2x8xf32, #tpu.memory_space<vmem>>, vector<1x2x8xf32>,
    } else {
    }
    return
  }
  func.func @transform_0(%arg0: i32, %arg1: i32) -> (i32, i32) {
    %c2_i32 = arith.constant 2 : i32
    %0 = arith.muli %arg0, %c2_i32 : i32
    %1 = arith.addi %0, %arg1 : i32
    %c0_i32 = arith.constant 0 : i32
    %c0_i32_0 = arith.constant 0 : i32
    return %c0_i32, %1 : i32, i32
  }
  func.func @transform_1(%arg0: i32, %arg1: i32) -> (i32, i32) {
    %c2_i32 = arith.constant 2 : i32
    %0 = arith.muli %arg0, %c2_i32 : i32
    %1 = arith.addi %0, %arg1 : i32
    %c0_i32 = arith.constant 0 : i32
    %c0_i32_0 = arith.constant 0 : i32
    return %c0_i32, %1 : i32, i32
  }
  func.func @transform_2(%arg0: i32, %arg1: i32) -> (i32, i32) {
    %c0_i32 = arith.constant 0 : i32
    %c0_i32_0 = arith.constant 0 : i32
    %c0_i32_1 = arith.constant 0 : i32
    return %c0_i32, %c0_i32_0 : i32, i32
  }
  func.func @transform_3(%arg0: i32, %arg1: i32) -> (i32, i32, i32) {
    %c0_i32 = arith.constant 0 : i32
    %c0_i32_0 = arith.constant 0 : i32
    %c0_i32_1 = arith.constant 0 : i32
    return %arg0, %c0_i32, %c0_i32_0 : i32, i32, i32
  }
}

</mosaic_0001>

<bundles_post_ra>
// kernel: cafenet_forward.1
= control target key start
LH: loop header
LB: loop body
LE: loop exit
PB: predicated region body
PF: predicated region fallthrough
CT: control target
= control target key end

     0   :  { %s16702_s0 = inlined_call_operand.hbm [shape: f32[2,91200], index: 0, kind: input, shape index: {}]   ;;  %s16703_s1 = inlined_call_operand.hbm [shape: bf16[8,91648], index: 1, kind: input, shape index: {}]   ;;  %s16704_s2 = inlined_call_operand.hbm [shape: f32[1,8], index: 2, kind: input, shape index: {}]   ;;  %s16705_s3 = inlined_call_operand.vmem [shape: f32[2,2,8], index: 3, kind: output, shape index: {}]  }
   0x1   :  { %16712 = sst [smem:[#allocation10_spill]] %s16704_s2 }
   0x2   :  { %8 = vsyncpa [#allocation3], 0 }
   0x3   :  { %10 = vsyncpa [#allocation3 + $0x1], 0 }
   0x4   :  { %11 = vsyncpa [#allocation5], 0 }
   0x5   :  { %13 = vsyncpa [#allocation5 + $0x1], 0  ;;  %s13874_s12 = smov 0   ;;  %s13876_s13 = smov 0  }
   0x6   :  { %s13878_s14 = smov 0   ;;  %s13880_s15 = smov 0  }
   0x7   :  { %s13882_s16 = smov 0   ;;  %s13884_s17 = smov 0  }
   0x8   :  { %s13886_s18 = smov 0   ;;  %s13888_s19 = smov 0  }
   0x9 LB: > { %s16711_s20 = sadd.s32 4294967295, %s13842_s19   ;;  %s28_s21 = sadd.s32 1, %s13834_s17  ;;  %s13842_s19 = sphi %s13888_s19, %s19_s19   ;;  %s13838_s18 = sphi %s13886_s18, %s16945_s18   ;;  %s13834_s17 = sphi %s13884_s17, %s16944_s17   ;;  %s13830_s16 = sphi %s13882_s16, %s16943_s16   ;;  %s13826_s15 = sphi %s13880_s15, %s16942_s15   ;;  %s13822_s14 = sphi %s13878_s14, %s16941_s14   ;;  %s13818_s13 = sphi %s13876_s13, %s16940_s13   ;;  %s13814_s12 = sphi %s13874_s12, %s16939_s12  }
   0xa   : > { %p29_p0 = scmp.ge.s32.totalorder %s28_s21, 2  ;;  %s31_s22 = sadd.s32 1, %s13838_s18 }
   0xb   : > { %s12210_s23 = sshll.u32 %s13838_s18, 1  ;;  %s42_s24 = sadd.s32 1, %s13822_s14 }
   0xc   : > { %s16947_s21 = smov (%p29_p0, %s28_s21), 0  ;;  %s16949_s22 = smov (!%p29_p0, %s31_s22), %s13838_s18 }
   0xd   : > { %s13921_s25 = sadd.s32 %s13834_s17, %s12210_s23  ;;  %p49_p1 = scmp.ne.s32.totalorder %s13822_s14, %s13818_s13 }
   0xe   : > { %p33_p2 = scmp.ge.s32.totalorder %s16949_s22, 2  ;;  %p50_p3 = scmp.eq.s32.totalorder %s13842_s19, 0 }
   0xf   : > { %p55_p4 = scmp.ne.s32.totalorder %s13818_s13, %s13814_s12  ;;  %p13929_p5 = scmp.eq.s32.totalorder %s16711_s20, 0 }
  0x10   : > { %s16951_s22 = smov (%p33_p2, %s16949_s22), 0  ;;  %p13935_p6 = por %p50_p3, %p49_p1 }
  0x11   : > { %s16713_s26 = scalar_select %p13929_p5, 1, 0 }
  0x12   : > { %s16714_s27 = scalar_select %p13935_p6, 1, 0 }
  0x13   : > { %p13941_p7 = por %p13929_p5, %p55_p4  ;;  %s12211_s29 = sshll.u32 %s16951_s22, 1 }
  0x14   : > { %p12214_p8 = scmp.ge.s32.totalorder %s13842_s19, 1  ;;  %s38_s30 = sadd.s32 %s12211_s29, %s16947_s21 }
  0x15   : > { %s16715_s28 = scalar_select %p13941_p7, 1, 0 }
  0x16   : > { %p143_p9 = scmp.lt.s32.totalorder %s13842_s19, 5  ;;  %s39_s4 = ssub.s32 %s13921_s25, %s38_s30 }
  0x17   : > { %p40_p10 = scmp.eq.s32.totalorder %s39_s4, 0  ;;  %s13844_s7 = smov [#allocation6]  }
  0x18   : > { %p13950_p11 = pnand %p12214_p8, %p143_p9  ;;  %s156_s8 = sshll.u32 %s13844_s7, 4  ;;  %s157_s8 = int_to_ptr.vmem [resolvable:$true] %s156_s8 }
  0x19   : > { %s13955_s6 = scalar_select %p40_p10, %s13822_s14, %s42_s24  }
  0x1a   : > { %s16716_s5 = scalar_select %p13950_p11, 1, 0 }
  0x1b   : > { %p13158_p12 = pneg %p13950_p11  ;;  %s16718_s2 = sld [smem:[#allocation10_spill]] }
  0x1d   : > { %p13961_p13 = pnand %p13158_p12, %p13929_p5 }
  0x1f   : > { %p13686_p1 = pneg %p13961_p13 }
  0x21   : > { %s13684_s12 = scalar_lea.hbm %s16718_s2, 16 }
  0x22   : > { %p13685_p0 = scmp.ne.s32.totalorder %s16718_s2, %s13684_s12  ;;  %p13691_p4 = scmp.lt.u32.totalorder %s13684_s12, %s16718_s2 }
  0x24   : > { %p13687_p2 = pnand %p13686_p1, %p13685_p0 }
  0x26   : > { %p13688_p3 = pneg %p13687_p2 }
  0x28   : > { %p13693_p8 = pnand %p13691_p4, %p13688_p3 }
  0x2a   : > { %13696 = shalt.err (!%p13693_p8)
}
  0x2b   : > { %s13697_s4 = scalar_lea.vmem %s157_s8, 16  ;;  %s13704_s7 = scalar_lea.vmem %s157_s8, 32 }
  0x2c   : > { %p13698_p9 = scmp.ne.s32.totalorder %s157_s8, %s13697_s4  ;;  %p13705_p5 = scmp.lt.s32.totalorder %s157_s8, %s157_s8 }
  0x2d   : > { %p13706_p7 = scmp.lt.s32.totalorder %s13704_s7, %s13697_s4 }
  0x2e   : > { %p13700_p10 = pnand %p13698_p9, %p13686_p1 }
  0x2f   : > { %p13707_p11 = por %p13706_p7, %p13705_p5 }
  0x30   : > { %p13701_p12 = pneg %p13700_p10 }
  0x32   : > { %p13708_p6 = pnand %p13707_p11, %p13701_p12 }
  0x34   : > { %13711 = shalt.err (!%p13708_p6)
}
  0x35   : > { %13161 = dma.hbm_to_vmem [thread:$0]  (!%p13961_p13), %s16718_s2, 16, %s157_s8, [#allocation5]  }
  0x36   : > { %p12216_p0 = scmp.ge.s32.totalorder %s13842_s19, 4 }
  0x37   : > { %p16719_p2 = scmp.ne.s32.totalorder (!%p12216_p0), %s16714_s27, 0 }
  0x38   : > { %163 = sbr.rel (%p12216_p0) target bundleno = 123 (0x7b), region = 20 }
  0x3f   : > { %166 = sbr.rel (!%p16719_p2) target bundleno = 97 (0x61), region = 24  ;;  %s167_s12 = sand.u32 (%p16719_p2), 1, %s13822_s14  }
  0x40   : > { %s174_s23 = smul.u32 (%p16719_p2), 179, %s13921_s25  ;;  %s13989_s4 = scalar_lea.sflag (%p16719_p2), [#allocation3], %s167_s12 }
  0x41   : > { %s13147_s29 = smul.u32 (%p16719_p2), 358, %s167_s12 }
  0x42   : > { %s175_s24 = ssub.s32 (%p16719_p2), 713, %s174_s23 }
  0x43   : > { %p176_p5 = scmp.lt.s32.totalorder (%p16719_p2), %s175_s24, 179  ;;  %s171_s8 = scalar_lea.vmem (%p16719_p2), [#allocation2], %s13147_s29 }
  0x46   : > { %s16953_s24 = smov (!%p176_p5, %s175_s24), 179 }
  0x47   : > { %s13986_s30 = sshll.u32 %s16953_s24, 5 }
  0x48   : > { %s180_s9 = ssub.s32 5728, %s13986_s30 }
  0x49   : > { %181 = vsyncadd %s13989_s4, %s180_s9  ;;  %p12219_p6 = scmp.ne.s32.totalorder %s13986_s30, 0  ;;  %s13129_s7 = smul.u32 5728, %s13921_s25 }
  0x4a   : > { %s187_s10 = sshll.u32 %s171_s8, 4  ;;  %s13716_s9 = scalar_lea.hbm %s16702_s0, 22816  ;;  %s188_s10 = int_to_ptr.vmem [resolvable:$true] %s187_s10 }
  0x4b   : > { %s13997_s20 = scalar_lea.hbm %s16702_s0, %s13129_s7 }
  0x4c   : > { %s13712_s12 = scalar_lea.hbm %s13997_s20, %s13986_s30  ;;  %p13717_p1 = scmp.lt.u32.totalorder %s13997_s20, %s16702_s0 }
  0x4d   : > { %p13713_p7 = scmp.ne.s32.totalorder %s13997_s20, %s13712_s12  ;;  %p13718_p3 = scmp.lt.u32.totalorder %s13716_s9, %s13712_s12 }
  0x4e   : > { %p13720_p8 = scmp.lt.u32.totalorder %s13712_s12, %s13997_s20 }
  0x4f   : > { %p13714_p11 = pnand %p13713_p7, %p12219_p6  ;;  %p13719_p4 = por %p13718_p3, %p13717_p1 }
  0x51   : > { %p13715_p13 = pneg %p13714_p11  ;;  %p13721_p9 = por %p13720_p8, %p13719_p4 }
  0x53   : > { %p13722_p10 = pnand %p13721_p9, %p13715_p13 }
  0x55   : > { %13725 = shalt.err (!%p13722_p10)
}
  0x56   : > { %s13726_s7 = scalar_lea.vmem %s188_s10, %s13986_s30  ;;  %s13845_s11 = smov [#allocation2]  }
  0x57   : > { %p13727_p12 = scmp.ne.s32.totalorder %s188_s10, %s13726_s7  ;;  %s13730_s23 = sshll.u32 %s13845_s11, 4  ;;  %s13731_s23 = int_to_ptr.vmem [resolvable:$false] %s13730_s23 }
  0x58   : > { %s13732_s29 = scalar_lea.vmem %s13731_s23, 11456  ;;  %p13733_p5 = scmp.lt.s32.totalorder %s188_s10, %s13731_s23 }
  0x59   : > { %p13728_p0 = pnand %p13727_p12, %p12219_p6  ;;  %p13734_p7 = scmp.lt.s32.totalorder %s13732_s29, %s13726_s7 }
  0x5b   : > { %p13729_p2 = pneg %p13728_p0  ;;  %p13735_p11 = por %p13734_p7, %p13733_p5 }
  0x5d   : > { %p13736_p1 = pnand %p13735_p11, %p13729_p2 }
  0x5f   : > { %13739 = shalt.err (!%p13736_p1)
}
  0x60   : > { %190 = dma.hbm_to_vmem [thread:$0]  (%p12219_p6), %s13997_s20, %s13986_s30, %s188_s10, %s13989_s4  }
  0x61 PF: > { %s194_s2 = sand.u32 1, %s13842_s19   ;;  %s196_s12 = sand.u32 1, %s13822_s14  }
  0x62   : > { %s13148_s24 = smul.u32 716, %s196_s12  ;;  %s195_s30 = scalar_lea.sflag [#allocation5], %s194_s2 }
  0x63   : > { %s13130_s9 = smul.u32 11456, %s13921_s25  ;;  %p16720_p13 = scmp.ne.s32.totalorder %s16714_s27, 0 }
  0x64   : > { %s198_s23 = scalar_lea.vmem [#allocation4], %s13148_s24  ;;  %s13744_s29 = scalar_lea.hbm %s16703_s1, 45824 }
  0x65   : > { %s14026_s11 = scalar_lea.hbm %s16703_s1, %s13130_s9  ;;  %s208_s20 = sshll.u32 %s198_s23, 4  ;;  %s209_s20 = int_to_ptr.vmem [resolvable:$true] %s208_s20 }
  0x66   : > { %s13740_s4 = scalar_lea.hbm %s14026_s11, 11456  ;;  %p13745_p8 = scmp.lt.u32.totalorder %s14026_s11, %s16703_s1 }
  0x67   : > { %p13741_p6 = scmp.ne.s32.totalorder %s14026_s11, %s13740_s4  ;;  %p13746_p9 = scmp.lt.u32.totalorder %s13744_s29, %s13740_s4 }
  0x68   : > { %p13748_p12 = scmp.lt.u32.totalorder %s13740_s4, %s14026_s11 }
  0x69   : > { %p13742_p3 = pnand %p13741_p6, %p16720_p13  ;;  %p13747_p10 = por %p13746_p9, %p13745_p8 }
  0x6b   : > { %p13743_p4 = pneg %p13742_p3  ;;  %p13749_p0 = por %p13748_p12, %p13747_p10 }
  0x6d   : > { %p13750_p2 = pnand %p13749_p0, %p13743_p4 }
  0x6f   : > { %13753 = shalt.err (!%p13750_p2)
}
  0x70   : > { %s13754_s2 = scalar_lea.vmem %s209_s20, 11456  ;;  %s13846_s24 = smov [#allocation4]  }
  0x71   : > { %p13755_p5 = scmp.ne.s32.totalorder %s209_s20, %s13754_s2  ;;  %s13758_s8 = sshll.u32 %s13846_s24, 4  ;;  %s13759_s8 = int_to_ptr.vmem [resolvable:$false] %s13758_s8 }
  0x72   : > { %s13760_s7 = scalar_lea.vmem %s13759_s8, 22912  ;;  %p13761_p1 = scmp.lt.s32.totalorder %s209_s20, %s13759_s8 }
  0x73   : > { %p13756_p7 = pnand %p13755_p5, %p16720_p13  ;;  %p13762_p6 = scmp.lt.s32.totalorder %s13760_s7, %s13754_s2 }
  0x75   : > { %p13757_p11 = pneg %p13756_p7  ;;  %p13763_p3 = por %p13762_p6, %p13761_p1 }
  0x77   : > { %p13764_p8 = pnand %p13763_p3, %p13757_p11 }
  0x79   : > { %13767 = shalt.err (!%p13764_p8)
}
  0x7a   : > { %13153 = dma.hbm_to_vmem [thread:$0]  (%p16720_p13), %s14026_s11, 11456, %s209_s20, %s195_s30  }
  0x7b PF: > { %p16721_p4 = scmp.ne.s32.totalorder %s16716_s5, 0 }
  0x7c   : > { %s219_s23 = sand.u32 (!%p16721_p4), 1, %s13818_s13   ;;  %p16722_p9 = scmp.ne.s32.totalorder (!%p16721_p4), %s16715_s28, 0 }
  0x7d   : > { %217 = sbr.rel (%p16721_p4) target bundleno = 1342 (0x53e), region = 32  ;;  %s220_s10 = scalar_lea.sflag (!%p16721_p4), [#allocation3], %s219_s23 }
  0x7e   : > { %s13149_s4 = smul.u32 (!%p16721_p4), 358, %s219_s23 }
  0x80   : > { %s14048_s25 = scalar_lea.vmem (!%p16721_p4), [#allocation2], %s13149_s4 }
  0x84   : > { %13801 = dma.done.wait (%p16722_p9), %s220_s10, 5728  }
  0x85   : > { %13803 = vsyncadd (%p16722_p9), %s220_s10, 4294961568  ;;  %s16723_s27 = sadd.s32 4294967295, %s13842_s19   ;;  %s13150_s20 = smul.u32 716, %s219_s23 }
  0x86   : > { %s228_s11 = sand.u32 1, %s16723_s27  }
  0x87   : > { %s229_s30 = scalar_lea.sflag [#allocation5], %s228_s11  ;;  %s14056_s5 = scalar_lea.vmem [#allocation4], %s13150_s20 }
  0x88   : > { %13805 = dma.done.wait (%p16722_p9), %s229_s30, 11456  }
  0x89   : > { %13807 = vsyncadd (%p16722_p9), %s229_s30, 4294955840  ;;  %p16724_p13 = scmp.ne.s32.totalorder %s16713_s26, 0 }
  0x8b   : > { %13809 = dma.done.wait (%p16724_p13), [#allocation5], 16  }
  0x8c   : > { %13811 = vsyncadd (%p16724_p13), [#allocation5], 4294967280  ;;  %p273_p10 = scmp.lt.s32.totalorder %s13830_s16, 1  ;;  %p278_p12 = scmp.eq.s32.totalorder %s13826_s15, 0 }
  0x8d   : > { %p279_p0 = scmp.eq.s32.totalorder %s13830_s16, 0 }
  0x8e   : > { %s274_s29 = scalar_select %p273_p10, %s13830_s16, 1 }
  0x8f   : > { %p280_p2 = pnand %p279_p0, %p278_p12 }
  0x90   : > { %s12227_s12 = sshll.u32 %s274_s29, 1  ;;  %v12228_v0 = vld [vmem:[#allocation6] ss:$0 sm:$0xff] (!%p280_p2)  ;;  %vm291_vm0 = vcmask (!%p280_p2), 58368  }
  0x91   : > { %s14073_s28 = scalar_lea.vmem %s16705_s3, %s12227_s12  ;;  %283 = sbr.rel (%p280_p2) target bundleno = 152 (0x98), region = 48 }
  0x92   : > { %292 = vst.msk [vmem:[%s14073_s28] sm:$0x3] (!%p280_p2), %vm291_vm0, %v12228_v0 }
  0x98 PF: > { %p293_p5 = scmp.ne.s32.totalorder %s13830_s16, 0 }
  0x9a   : > { %p294_p7 = pnand %p293_p5, %p278_p12 }
  0x9b   : > { %vm298_vm1 = vcmask (!%p294_p7), 58368   ;;  %v13847_v1 = vmov (!%p294_p7), 0.0  }
  0x9c   : > { %297 = sbr.rel (%p294_p7) target bundleno = 163 (0xa3), region = 52  ;;  %299 = vst.msk [vmem:[%s14073_s28] sm:$0x3] (!%p294_p7), %vm298_vm1, %v13847_v1 }
  0xa3 PF: > { %s12229_s26 = sshll.u32 %s13830_s16, 1 }
  0xa4   : > { %s14080_s24 = sadd.s32 %s13826_s15, %s12229_s26 }
  0xa5   : > { %s302_s8 = smul.u32 22912, %s14080_s24 }
  0xa7   : > { %s14085_s7 = sadd.s32 22912, %s302_s8 }
  0xa8   : > { %p12230_p11 = scmp.gt.s32.totalorder %s14085_s7, 91200 }
  0xa9   : > { %v1521_v2 = vld [vmem:[%s14056_s5] sm:$0xff] (!%p12230_p11)  ;;  %v1522_v3 = vld [vmem:[%s14056_s5 + $0x8] sm:$0xff] (!%p12230_p11)  ;;  %v403_v5 = vlaneseq (!%p12230_p11)  ;;  %v1523_v10 = vld [vmem:[%s14056_s5 + $0x10] sm:$0xff] (!%p12230_p11)  ;;  %v13848_v13 = vmov (!%p12230_p11), 1983009808   ;;  %vm13850_vm2 = vmmov (!%p12230_p11), 0  }
  0xaa   : > { %307 = sbr.rel (%p12230_p11) target bundleno = 755 (0x2f3), region = 56  ;;  %v308_v4 = vld [vmem:[%s14048_s25] sm:$0xff] (!%p12230_p11)  ;;  %v12232_v6 = vcombine.high (!%p12230_p11), %v1521_v2, %v1521_v2  ;;  %v12231_v7 = vcombine.low (!%p12230_p11), %v1521_v2, %v1521_v2  ;;  %v12234_v8 = vcombine.high (!%p12230_p11), %v1522_v3, %v1522_v3  ;;  %v12233_v9 = vcombine.low (!%p12230_p11), %v1522_v3, %v1522_v3  ;;  %v309_v12 = vld [vmem:[%s14048_s25 + $0x8] sm:$0xff] (!%p12230_p11)  ;;  %v310_v22 = vld [vmem:[%s14048_s25 + $0x10] sm:$0xff] (!%p12230_p11) }
  0xab   : > { %v1524_v11 = vld [vmem:[%s14056_s5 + $0x18] sm:$0xff] (!%p12230_p11)  ;;  %v401_v14 = vunpack.c.l.s4 (!%p12230_p11), %v13848_v13  ;;  %v404_v15 = vshrl.u32 (!%p12230_p11), %v403_v5, 7  ;;  %v12236_v16 = vcombine.high (!%p12230_p11), %v1523_v10, %v1523_v10  ;;  %v399_v19 = vcombine.high (!%p12230_p11), %v308_v4, %v308_v4  ;;  %v1525_v34 = vld [vmem:[%s14056_s5 + $0x20] sm:$0xff] (!%p12230_p11)  ;;  %v1526_v35 = vld [vmem:[%s14056_s5 + $0x28] sm:$0xff] (!%p12230_p11) }
  0xac   : > { %2238 = vmatprep.subr.bf16.mxu0 (!%p12230_p11), %v12232_v6  ;;  %2278 = vmatprep.subr.bf16.mxu1 (!%p12230_p11), %v12234_v8  ;;  %v12238_v17 = vcombine.high (!%p12230_p11), %v1524_v11, %v1524_v11  ;;  %v416_v20 = vcombine.high (!%p12230_p11), %v309_v12, %v309_v12  ;;  %v433_v27 = vcombine.high (!%p12230_p11), %v310_v22, %v310_v22  ;;  %v311_v46 = vld [vmem:[%s14048_s25 + $0x18] sm:$0xff] (!%p12230_p11)  ;;  %v1528_v53 = vld [vmem:[%s14056_s5 + $0x38] sm:$0xff] (!%p12230_p11)  ;;  %vm5839_vm3 = vcmask (!%p12230_p11), 58368  }
  0xad   : > { %2239 = vmatpush1.bf16.xpose.msra.mxu0 (!%p12230_p11), %v12231_v7  ;;  %2279 = vmatpush1.bf16.xpose.msra.mxu1 (!%p12230_p11), %v12233_v9  ;;  %v402_v18 = vunpack.c.0.s8 (!%p12230_p11), %v401_v14  ;;  %v12235_v38 = vcombine.low (!%p12230_p11), %v1523_v10, %v1523_v10  ;;  %v12237_v39 = vcombine.low (!%p12230_p11), %v1524_v11, %v1524_v11  ;;  %v12240_v44 = vcombine.high (!%p12230_p11), %v1525_v34, %v1525_v34  ;;  %v1527_v52 = vld [vmem:[%s14056_s5 + $0x30] sm:$0xff] (!%p12230_p11)  ;;  %v1530_v5 = vld [vmem:[%s14056_s5 + $0x48] sm:$0xff] (!%p12230_p11) }
  0xae   : > { %2318 = vmatprep.subr.bf16.mxu0 (!%p12230_p11), %v12236_v16  ;;  %2358 = vmatprep.subr.bf16.mxu1 (!%p12230_p11), %v12238_v17  ;;  %v12242_v45 = vcombine.high (!%p12230_p11), %v1526_v35, %v1526_v35  ;;  %v450_v49 = vcombine.high (!%p12230_p11), %v311_v46, %v311_v46  ;;  %v12239_v54 = vcombine.low (!%p12230_p11), %v1525_v34, %v1525_v34  ;;  %v312_v62 = vld [vmem:[%s14048_s25 + $0x20] sm:$0xff] (!%p12230_p11)  ;;  %v313_v14 = vld [vmem:[%s14048_s25 + $0x28] sm:$0xff] (!%p12230_p11) }
  0xaf   : > { %v14094_v21 = vsub.s32 (!%p12230_p11), %v402_v18, %v404_v15  ;;  %v12241_v55 = vcombine.low (!%p12230_p11), %v1526_v35, %v1526_v35  ;;  %v12244_v60 = vcombine.high (!%p12230_p11), %v1527_v52, %v1527_v52  ;;  %v12246_v61 = vcombine.high (!%p12230_p11), %v1528_v53, %v1528_v53 }
  0xb0   : > { %v467_v1 = vcombine.high (!%p12230_p11), %v312_v62, %v312_v62  ;;  %v12243_v6 = vcombine.low (!%p12230_p11), %v1527_v52, %v1527_v52  ;;  %v12245_v7 = vcombine.low (!%p12230_p11), %v1528_v53, %v1528_v53  ;;  %v12250_v13 = vcombine.high (!%p12230_p11), %v1530_v5, %v1530_v5  ;;  %v1535_v53 = vld [vmem:[%s14056_s5 + $0x70] sm:$0xff] (!%p12230_p11) }
  0xb1   : > { %v406_v23 = vrot.slane %v308_v4, %v14094_v21  ;;  %v413_v24 = vrot.slane %v399_v19, %v14094_v21  ;;  %v423_v25 = vrot.slane %v309_v12, %v14094_v21  ;;  %v430_v26 = vrot.slane %v416_v20, %v14094_v21  ;;  %v1529_v4 = vld [vmem:[%s14056_s5 + $0x40] sm:$0xff]  ;;  %v1531_v20 = vld [vmem:[%s14056_s5 + $0x50] sm:$0xff] }
  0xb2   : > { %v440_v42 = vrot.slane %v310_v22, %v14094_v21  ;;  %v447_v43 = vrot.slane %v433_v27, %v14094_v21  ;;  %v457_v58 = vrot.slane %v311_v46, %v14094_v21  ;;  %v464_v59 = vrot.slane %v450_v49, %v14094_v21  ;;  %v1532_v22 = vld [vmem:[%s14056_s5 + $0x58] sm:$0xff] }
  0xb3   : > { %v414_v28 = vcombine.high %v406_v23, %v406_v23  ;;  %v415_v29 = vcombine.high %v413_v24, %v413_v24  ;;  %v1342_v30 = vpack.c.bf16 %v406_v23, %v406_v23  ;;  %v1344_v31 = vpack.c.bf16 %v413_v24, %v413_v24 }
  0xb4   : > { %v431_v32 = vcombine.high %v423_v25, %v423_v25  ;;  %v432_v33 = vcombine.high %v430_v26, %v430_v26  ;;  %v448_v47 = vcombine.high %v440_v42, %v440_v42  ;;  %v449_v48 = vcombine.high %v447_v43, %v447_v43 }
  0xb5   : > { %v1343_v36 = vpack.c.bf16 %v414_v28, %v414_v28  ;;  %v1345_v37 = vpack.c.bf16 %v415_v29, %v415_v29  ;;  %v1346_v50 = vpack.c.bf16 %v423_v25, %v423_v25  ;;  %v1348_v51 = vpack.c.bf16 %v430_v26, %v430_v26 }
  0xb6   : > { %v1347_v40 = vpack.c.bf16 %v431_v32, %v431_v32  ;;  %v1349_v41 = vpack.c.bf16 %v432_v33, %v432_v33  ;;  %v1351_v56 = vpack.c.bf16 %v448_v47, %v448_v47  ;;  %v1353_v57 = vpack.c.bf16 %v449_v48, %v449_v48  ;;  %v315_v47 = vld [vmem:[%s14048_s25 + $0x38] sm:$0xff] }
  0xb7   : > { %2270 = vmatprep.mubr.bf16.mxu0 %v1343_v36  ;;  %2310 = vmatprep.mubr.bf16.mxu1 %v1345_v37  ;;  %v465_v63 = vcombine.high %v457_v58, %v457_v58  ;;  %v466_v0 = vcombine.high %v464_v59, %v464_v59  ;;  %v1350_v2 = vpack.c.bf16 %v440_v42, %v440_v42  ;;  %v1533_v37 = vld [vmem:[%s14056_s5 + $0x60] sm:$0xff] }
  0xb8   : > { %2271 = vmatmul.mubr.bf16.vlgmr.msra.gmra.mrb[0].mxu0 %v1342_v30  ;;  %2311 = vmatmul.mubr.bf16.vlgmr.msra.gmra.mrb[0].mxu1 %v1344_v31  ;;  %v1352_v3 = vpack.c.bf16 %v447_v43, %v447_v43  ;;  %v474_v10 = vrot.slane %v312_v62, %v14094_v21  ;;  %v481_v11 = vrot.slane %v467_v1, %v14094_v21  ;;  %v314_v31 = vld [vmem:[%s14048_s25 + $0x30] sm:$0xff] }
  0xb9   : > { %2319 = vmatpush1.bf16.xpose.msra.mxu0 %v12235_v38  ;;  %2359 = vmatpush1.bf16.xpose.msra.mxu1 %v12237_v39  ;;  %v1355_v8 = vpack.c.bf16 %v465_v63, %v465_v63  ;;  %v1357_v9 = vpack.c.bf16 %v466_v0, %v466_v0  ;;  %v12248_v12 = vcombine.high %v1529_v4, %v1529_v4  ;;  %v1534_v38 = vld [vmem:[%s14056_s5 + $0x68] sm:$0xff] }
  0xba   : > { %2350 = vmatprep.mubr.bf16.mxu0 %v1347_v40  ;;  %2390 = vmatprep.mubr.bf16.mxu1 %v1349_v41  ;;  %v482_v15 = vcombine.high %v474_v10, %v474_v10  ;;  %v483_v16 = vcombine.high %v481_v11, %v481_v11  ;;  %v484_v17 = vcombine.high %v313_v14, %v313_v14  ;;  %v316_v63 = vld [vmem:[%s14048_s25 + $0x40] sm:$0xff] }
  0xbb   : > { %2398 = vmatprep.subr.bf16.mxu0 %v12240_v44  ;;  %2438 = vmatprep.subr.bf16.mxu1 %v12242_v45  ;;  %v1354_v18 = vpack.c.bf16 %v457_v58, %v457_v58  ;;  %v1356_v19 = vpack.c.bf16 %v464_v59, %v464_v59  ;;  %v12247_v23 = vcombine.low %v1529_v4, %v1529_v4 }
  0xbc   : > { %v12249_v24 = vcombine.low %v1530_v5, %v1530_v5  ;;  %v1359_v25 = vpack.c.bf16 %v482_v15, %v482_v15  ;;  %v1361_v26 = vpack.c.bf16 %v483_v16, %v483_v16  ;;  %v491_v27 = vrot.slane %v313_v14, %v14094_v21  ;;  %v1537_v5 = vld [vmem:[%s14056_s5 + $0x80] sm:$0xff] }
  0xbd   : > { %v498_v28 = vrot.slane %v484_v17, %v14094_v21  ;;  %v12252_v29 = vcombine.high %v1531_v20, %v1531_v20  ;;  %v12254_v30 = vcombine.high %v1532_v22, %v1532_v22  ;;  %v501_v34 = vcombine.high %v314_v31, %v314_v31  ;;  %v317_v15 = vld [vmem:[%s14048_s25 + $0x48] sm:$0xff] }
  0xbe   : > { %v499_v32 = vcombine.high %v491_v27, %v491_v27  ;;  %v1358_v35 = vpack.c.bf16 %v474_v10, %v474_v10  ;;  %v1360_v36 = vpack.c.bf16 %v481_v11, %v481_v11  ;;  %v12251_v39 = vcombine.low %v1531_v20, %v1531_v20 }
  0xbf   : > { %v500_v33 = vcombine.high %v498_v28, %v498_v28  ;;  %v12253_v40 = vcombine.low %v1532_v22, %v1532_v22  ;;  %v508_v43 = vrot.slane %v314_v31, %v14094_v21  ;;  %v515_v44 = vrot.slane %v501_v34, %v14094_v21  ;;  %v1539_v22 = vld [vmem:[%s14056_s5 + $0x90] sm:$0xff] }
  0xc0   : > { %2351 = vmatmul.mubr.bf16.vlgmr.msra.gmra.mrb[4].mxu0 %v1346_v50  ;;  %2391 = vmatmul.mubr.bf16.vlgmr.msra.gmra.mrb[4].mxu1 %v1348_v51  ;;  %v1363_v41 = vpack.c.bf16 %v499_v32, %v499_v32  ;;  %v12256_v45 = vcombine.high %v1533_v37, %v1533_v37  ;;  %v12258_v46 = vcombine.high %v1534_v38, %v1534_v38  ;;  %v318_v32 = vld [vmem:[%s14048_s25 + $0x50] sm:$0xff] }
  0xc1   : > { %2399 = vmatpush1.bf16.xpose.msra.mxu0 %v12239_v54  ;;  %2439 = vmatpush1.bf16.xpose.msra.mxu1 %v12241_v55  ;;  %v1365_v42 = vpack.c.bf16 %v500_v33, %v500_v33  ;;  %v516_v48 = vcombine.high %v508_v43, %v508_v43  ;;  %v517_v49 = vcombine.high %v515_v44, %v515_v44  ;;  %v1536_v54 = vld [vmem:[%s14056_s5 + $0x78] sm:$0xff] }
  0xc2   : > { %2430 = vmatprep.mubr.bf16.mxu0 %v1351_v56  ;;  %2470 = vmatprep.mubr.bf16.mxu1 %v1353_v57  ;;  %v518_v50 = vcombine.high %v315_v47, %v315_v47  ;;  %v1362_v51 = vpack.c.bf16 %v491_v27, %v491_v27  ;;  %v1364_v52 = vpack.c.bf16 %v498_v28, %v498_v28 }
  0xc3   : > { %2478 = vmatprep.subr.bf16.mxu0 %v12244_v60  ;;  %2518 = vmatprep.subr.bf16.mxu1 %v12246_v61  ;;  %v12255_v55 = vcombine.low %v1533_v37, %v1533_v37  ;;  %v12257_v56 = vcombine.low %v1534_v38, %v1534_v38  ;;  %v1367_v57 = vpack.c.bf16 %v516_v48, %v516_v48  ;;  %v1541_v38 = vld [vmem:[%s14056_s5 + $0xa0] sm:$0xff] }
  0xc4   : > { %v1369_v58 = vpack.c.bf16 %v517_v49, %v517_v49  ;;  %v525_v59 = vrot.slane %v315_v47, %v14094_v21  ;;  %v532_v60 = vrot.slane %v518_v50, %v14094_v21  ;;  %v12260_v61 = vcombine.high %v1535_v53, %v1535_v53  ;;  %v319_v48 = vld [vmem:[%s14048_s25 + $0x58] sm:$0xff] }
  0xc5   : > { %v12262_v62 = vcombine.high %v1536_v54, %v1536_v54  ;;  %v1368_v4 = vpack.c.bf16 %v515_v44, %v515_v44  ;;  %v542_v11 = vrot.slane %v316_v63, %v14094_v21  ;;  %v559_v28 = vrot.slane %v317_v15, %v14094_v21 }
  0xc6   : > { %v533_v0 = vcombine.high %v525_v59, %v525_v59  ;;  %v534_v1 = vcombine.high %v532_v60, %v532_v60  ;;  %v1372_v20 = vpack.c.bf16 %v532_v60, %v532_v60  ;;  %v576_v44 = vrot.slane %v318_v32, %v14094_v21 }
  0xc7   : > { %v550_v16 = vcombine.high %v542_v11, %v542_v11  ;;  %v567_v33 = vcombine.high %v559_v28, %v559_v28  ;;  %v593_v60 = vrot.slane %v319_v48, %v14094_v21 }
  0xc8   : > { %2431 = vmatmul.mubr.bf16.vlgmr.msra.gmra.mrb[8].mxu0 %v1350_v2  ;;  %2471 = vmatmul.mubr.bf16.vlgmr.msra.gmra.mrb[8].mxu1 %v1352_v3  ;;  %v535_v2 = vcombine.high %v316_v63, %v316_v63  ;;  %v1366_v3 = vpack.c.bf16 %v508_v43, %v508_v43  ;;  %v1373_v10 = vpack.c.bf16 %v534_v1, %v534_v1 }
  0xc9   : > { %2479 = vmatpush1.bf16.xpose.msra.mxu0 %v12243_v6  ;;  %2519 = vmatpush1.bf16.xpose.msra.mxu1 %v12245_v7  ;;  %v1538_v6 = vld [vmem:[%s14056_s5 + $0x88] sm:$0xff]  ;;  %v12259_v7 = vcombine.low %v1535_v53, %v1535_v53  ;;  %v584_v49 = vcombine.high %v576_v44, %v576_v44  ;;  %v601_v1 = vcombine.high %v593_v60, %v593_v60 }
  0xca   : > { %2510 = vmatprep.mubr.bf16.mxu0 %v1355_v8  ;;  %2550 = vmatprep.mubr.bf16.mxu1 %v1357_v9  ;;  %v12261_v8 = vcombine.low %v1536_v54, %v1536_v54  ;;  %v1371_v9 = vpack.c.bf16 %v533_v0, %v533_v0  ;;  %v12266_v14 = vcombine.high %v1538_v6, %v1538_v6  ;;  %v1543_v54 = vld [vmem:[%s14056_s5 + $0xb0] sm:$0xff] }
  0xcb   : > { %2558 = vmatprep.subr.bf16.mxu0 %v12248_v12  ;;  %2598 = vmatprep.subr.bf16.mxu1 %v12250_v13  ;;  %v549_v12 = vrot.slane %v535_v2, %v14094_v21  ;;  %v12264_v13 = vcombine.high %v1537_v5, %v1537_v5  ;;  %v320_v0 = vld [vmem:[%s14048_s25 + $0x60] sm:$0xff] }
  0xcd   : > { %v551_v17 = vcombine.high %v549_v12, %v549_v12  ;;  %v1376_v37 = vpack.c.bf16 %v549_v12, %v549_v12  ;;  %v610_v12 = vrot.slane %v320_v0, %v14094_v21 }
  0xcf   : > { %v1377_v27 = vpack.c.bf16 %v551_v17, %v551_v17  ;;  %v618_v17 = vcombine.high %v610_v12, %v610_v12 }
  0xd0   : > { %2511 = vmatmul.mubr.bf16.vlgmr.msra.gmra.mrb[12].mxu0 %v1354_v18  ;;  %2551 = vmatmul.mubr.bf16.vlgmr.msra.gmra.mrb[12].mxu1 %v1356_v19  ;;  %v552_v18 = vcombine.high %v317_v15, %v317_v15  ;;  %v1370_v19 = vpack.c.bf16 %v525_v59, %v525_v59 }
  0xd1   : > { %2559 = vmatpush1.bf16.xpose.msra.mxu0 %v12247_v23  ;;  %2599 = vmatpush1.bf16.xpose.msra.mxu1 %v12249_v24  ;;  %v1540_v23 = vld [vmem:[%s14056_s5 + $0x98] sm:$0xff]  ;;  %v12263_v24 = vcombine.low %v1537_v5, %v1537_v5 }
  0xd2   : > { %2590 = vmatprep.mubr.bf16.mxu0 %v1359_v25  ;;  %2630 = vmatprep.mubr.bf16.mxu1 %v1361_v26  ;;  %v12265_v25 = vcombine.low %v1538_v6, %v1538_v6  ;;  %v1375_v26 = vpack.c.bf16 %v550_v16, %v550_v16  ;;  %v12270_v31 = vcombine.high %v1540_v23, %v1540_v23  ;;  %v1545_v6 = vld [vmem:[%s14056_s5 + $0xc0] sm:$0xff] }
  0xd3   : > { %2638 = vmatprep.subr.bf16.mxu0 %v12252_v29  ;;  %2678 = vmatprep.subr.bf16.mxu1 %v12254_v30  ;;  %v566_v29 = vrot.slane %v552_v18, %v14094_v21  ;;  %v12268_v30 = vcombine.high %v1539_v22, %v1539_v22  ;;  %v321_v16 = vld [vmem:[%s14048_s25 + $0x68] sm:$0xff] }
  0xd5   : > { %v568_v34 = vcombine.high %v566_v29, %v566_v29  ;;  %v1380_v53 = vpack.c.bf16 %v566_v29, %v566_v29  ;;  %v627_v29 = vrot.slane %v321_v16, %v14094_v21 }
  0xd7   : > { %v1381_v43 = vpack.c.bf16 %v568_v34, %v568_v34  ;;  %v635_v34 = vcombine.high %v627_v29, %v627_v29 }
  0xd8   : > { %2591 = vmatmul.mubr.bf16.vlgmr.msra.gmra.mrb[16].mxu0 %v1358_v35  ;;  %2631 = vmatmul.mubr.bf16.vlgmr.msra.gmra.mrb[16].mxu1 %v1360_v36  ;;  %v569_v35 = vcombine.high %v318_v32, %v318_v32  ;;  %v1374_v36 = vpack.c.bf16 %v542_v11, %v542_v11 }
  0xd9   : > { %2639 = vmatpush1.bf16.xpose.msra.mxu0 %v12251_v39  ;;  %2679 = vmatpush1.bf16.xpose.msra.mxu1 %v12253_v40  ;;  %v1542_v39 = vld [vmem:[%s14056_s5 + $0xa8] sm:$0xff]  ;;  %v12267_v40 = vcombine.low %v1539_v22, %v1539_v22 }
  0xda   : > { %2670 = vmatprep.mubr.bf16.mxu0 %v1363_v41  ;;  %2710 = vmatprep.mubr.bf16.mxu1 %v1365_v42  ;;  %v12269_v41 = vcombine.low %v1540_v23, %v1540_v23  ;;  %v1379_v42 = vpack.c.bf16 %v567_v33, %v567_v33  ;;  %v12274_v47 = vcombine.high %v1542_v39, %v1542_v39  ;;  %v1547_v23 = vld [vmem:[%s14056_s5 + $0xd0] sm:$0xff]  ;;  %v322_v33 = vld [vmem:[%s14048_s25 + $0x70] sm:$0xff] }
  0xdb   : > { %2718 = vmatprep.subr.bf16.mxu0 %v12256_v45  ;;  %2758 = vmatprep.subr.bf16.mxu1 %v12258_v46  ;;  %v583_v45 = vrot.slane %v569_v35, %v14094_v21  ;;  %v12272_v46 = vcombine.high %v1541_v38, %v1541_v38 }
  0xdd   : > { %v585_v50 = vcombine.high %v583_v45, %v583_v45  ;;  %v1384_v5 = vpack.c.bf16 %v583_v45, %v583_v45  ;;  %v644_v45 = vrot.slane %v322_v33, %v14094_v21 }
  0xdf   : > { %v1385_v59 = vpack.c.bf16 %v585_v50, %v585_v50  ;;  %v652_v50 = vcombine.high %v644_v45, %v644_v45 }
  0xe0   : > { %2671 = vmatmul.mubr.bf16.vlgmr.msra.gmra.mrb[20].mxu0 %v1362_v51  ;;  %2711 = vmatmul.mubr.bf16.vlgmr.msra.gmra.mrb[20].mxu1 %v1364_v52  ;;  %v586_v51 = vcombine.high %v319_v48, %v319_v48  ;;  %v1378_v52 = vpack.c.bf16 %v559_v28, %v559_v28 }
  0xe1   : > { %2719 = vmatpush1.bf16.xpose.msra.mxu0 %v12255_v55  ;;  %2759 = vmatpush1.bf16.xpose.msra.mxu1 %v12257_v56  ;;  %v1544_v55 = vld [vmem:[%s14056_s5 + $0xb8] sm:$0xff]  ;;  %v12271_v56 = vcombine.low %v1541_v38, %v1541_v38 }
  0xe2   : > { %2750 = vmatprep.mubr.bf16.mxu0 %v1367_v57  ;;  %2790 = vmatprep.mubr.bf16.mxu1 %v1369_v58  ;;  %v12273_v57 = vcombine.low %v1542_v39, %v1542_v39  ;;  %v1383_v58 = vpack.c.bf16 %v584_v49, %v584_v49  ;;  %v12278_v63 = vcombine.high %v1544_v55, %v1544_v55  ;;  %v1549_v39 = vld [vmem:[%s14056_s5 + $0xe0] sm:$0xff] }
  0xe3   : > { %2798 = vmatprep.subr.bf16.mxu0 %v12260_v61  ;;  %2838 = vmatprep.subr.bf16.mxu1 %v12262_v62  ;;  %v600_v61 = vrot.slane %v586_v51, %v14094_v21  ;;  %v12276_v62 = vcombine.high %v1543_v54, %v1543_v54  ;;  %v323_v49 = vld [vmem:[%s14048_s25 + $0x78] sm:$0xff] }
  0xe5   : > { %v602_v2 = vcombine.high %v600_v61, %v600_v61  ;;  %v1388_v22 = vpack.c.bf16 %v600_v61, %v600_v61  ;;  %v661_v61 = vrot.slane %v323_v49, %v14094_v21 }
  0xe7   : > { %v1389_v11 = vpack.c.bf16 %v602_v2, %v602_v2  ;;  %v669_v2 = vcombine.high %v661_v61, %v661_v61 }
  0xe8   : > { %2751 = vmatmul.mubr.bf16.vlgmr.msra.gmra.mrb[24].mxu0 %v1366_v3  ;;  %2791 = vmatmul.mubr.bf16.vlgmr.msra.gmra.mrb[24].mxu1 %v1368_v4  ;;  %v603_v3 = vcombine.high %v320_v0, %v320_v0  ;;  %v1382_v4 = vpack.c.bf16 %v576_v44, %v576_v44 }
  0xe9   : > { %2799 = vmatpush1.bf16.xpose.msra.mxu0 %v12259_v7  ;;  %2839 = vmatpush1.bf16.xpose.msra.mxu1 %v12261_v8  ;;  %v1546_v7 = vld [vmem:[%s14056_s5 + $0xc8] sm:$0xff]  ;;  %v12275_v8 = vcombine.low %v1543_v54, %v1543_v54 }
  0xea   : > { %2830 = vmatprep.mubr.bf16.mxu0 %v1371_v9  ;;  %2870 = vmatprep.mubr.bf16.mxu1 %v1373_v10  ;;  %v12277_v9 = vcombine.low %v1544_v55, %v1544_v55  ;;  %v1387_v10 = vpack.c.bf16 %v601_v1, %v601_v1  ;;  %v12282_v15 = vcombine.high %v1546_v7, %v1546_v7  ;;  %v1551_v55 = vld [vmem:[%s14056_s5 + $0xf0] sm:$0xff] }
  0xeb   : > { %2878 = vmatprep.subr.bf16.mxu0 %v12264_v13  ;;  %2918 = vmatprep.subr.bf16.mxu1 %v12266_v14  ;;  %v617_v13 = vrot.slane %v603_v3, %v14094_v21  ;;  %v12280_v14 = vcombine.high %v1545_v6, %v1545_v6  ;;  %v324_v1 = vld [vmem:[%s14048_s25 + $0x80] sm:$0xff] }
  0xed   : > { %v619_v18 = vcombine.high %v617_v13, %v617_v13  ;;  %v1392_v38 = vpack.c.bf16 %v617_v13, %v617_v13  ;;  %v678_v13 = vrot.slane %v324_v1, %v14094_v21 }
  0xef   : > { %v1393_v28 = vpack.c.bf16 %v619_v18, %v619_v18  ;;  %v686_v18 = vcombine.high %v678_v13, %v678_v13 }
  0xf0   : > { %2831 = vmatmul.mubr.bf16.vlgmr.msra.gmra.mrb[28].mxu0 %v1370_v19  ;;  %2871 = vmatmul.mubr.bf16.vlgmr.msra.gmra.mrb[28].mxu1 %v1372_v20  ;;  %v620_v19 = vcombine.high %v321_v16, %v321_v16  ;;  %v1386_v20 = vpack.c.bf16 %v593_v60, %v593_v60 }
  0xf1   : > { %2879 = vmatpush1.bf16.xpose.msra.mxu0 %v12263_v24  ;;  %2919 = vmatpush1.bf16.xpose.msra.mxu1 %v12265_v25  ;;  %v1548_v24 = vld [vmem:[%s14056_s5 + $0xd8] sm:$0xff]  ;;  %v12279_v25 = vcombine.low %v1545_v6, %v1545_v6 }
  0xf2   : > { %2910 = vmatprep.mubr.bf16.mxu0 %v1375_v26  ;;  %2950 = vmatprep.mubr.bf16.mxu1 %v1377_v27  ;;  %v12281_v26 = vcombine.low %v1546_v7, %v1546_v7  ;;  %v1391_v27 = vpack.c.bf16 %v618_v17, %v618_v17  ;;  %v12286_v32 = vcombine.high %v1548_v24, %v1548_v24  ;;  %v1553_v7 = vld [vmem:[%s14056_s5 + $0x100] sm:$0xff] }
  0xf3   : > { %2958 = vmatprep.subr.bf16.mxu0 %v12268_v30  ;;  %2998 = vmatprep.subr.bf16.mxu1 %v12270_v31  ;;  %v634_v30 = vrot.slane %v620_v19, %v14094_v21  ;;  %v12284_v31 = vcombine.high %v1547_v23, %v1547_v23  ;;  %v325_v17 = vld [vmem:[%s14048_s25 + $0x88] sm:$0xff] }
  0xf5   : > { %v636_v35 = vcombine.high %v634_v30, %v634_v30  ;;  %v1396_v54 = vpack.c.bf16 %v634_v30, %v634_v30  ;;  %v695_v30 = vrot.slane %v325_v17, %v14094_v21 }
  0xf7   : > { %v1397_v44 = vpack.c.bf16 %v636_v35, %v636_v35  ;;  %v703_v35 = vcombine.high %v695_v30, %v695_v30 }
  0xf8   : > { %2911 = vmatmul.mubr.bf16.vlgmr.msra.gmra.mrb[32].mxu0 %v1374_v36  ;;  %2951 = vmatmul.mubr.bf16.vlgmr.msra.gmra.mrb[32].mxu1 %v1376_v37  ;;  %v637_v36 = vcombine.high %v322_v33, %v322_v33  ;;  %v1390_v37 = vpack.c.bf16 %v610_v12, %v610_v12 }
  0xf9   : > { %2959 = vmatpush1.bf16.xpose.msra.mxu0 %v12267_v40  ;;  %2999 = vmatpush1.bf16.xpose.msra.mxu1 %v12269_v41  ;;  %v1550_v40 = vld [vmem:[%s14056_s5 + $0xe8] sm:$0xff]  ;;  %v12283_v41 = vcombine.low %v1547_v23, %v1547_v23 }
  0xfa   : > { %2990 = vmatprep.mubr.bf16.mxu0 %v1379_v42  ;;  %3030 = vmatprep.mubr.bf16.mxu1 %v1381_v43  ;;  %v12285_v42 = vcombine.low %v1548_v24, %v1548_v24  ;;  %v1395_v43 = vpack.c.bf16 %v635_v34, %v635_v34  ;;  %v12290_v48 = vcombine.high %v1550_v40, %v1550_v40  ;;  %v1555_v24 = vld [vmem:[%s14056_s5 + $0x110] sm:$0xff]  ;;  %v326_v34 = vld [vmem:[%s14048_s25 + $0x90] sm:$0xff] }
  0xfb   : > { %3038 = vmatprep.subr.bf16.mxu0 %v12272_v46  ;;  %3078 = vmatprep.subr.bf16.mxu1 %v12274_v47  ;;  %v651_v46 = vrot.slane %v637_v36, %v14094_v21  ;;  %v12288_v47 = vcombine.high %v1549_v39, %v1549_v39 }
  0xfd   : > { %v653_v51 = vcombine.high %v651_v46, %v651_v46  ;;  %v1400_v6 = vpack.c.bf16 %v651_v46, %v651_v46  ;;  %v712_v46 = vrot.slane %v326_v34, %v14094_v21 }
  0xff   : > { %v1401_v60 = vpack.c.bf16 %v653_v51, %v653_v51  ;;  %v720_v51 = vcombine.high %v712_v46, %v712_v46 }
 0x100   : > { %2991 = vmatmul.mubr.bf16.vlgmr.msra.gmra.mrb[36].mxu0 %v1378_v52  ;;  %3031 = vmatmul.mubr.bf16.vlgmr.msra.gmra.mrb[36].mxu1 %v1380_v53  ;;  %v654_v52 = vcombine.high %v323_v49, %v323_v49  ;;  %v1394_v53 = vpack.c.bf16 %v627_v29, %v627_v29 }
 0x101   : > { %3039 = vmatpush1.bf16.xpose.msra.mxu0 %v12271_v56  ;;  %3079 = vmatpush1.bf16.xpose.msra.mxu1 %v12273_v57  ;;  %v1552_v56 = vld [vmem:[%s14056_s5 + $0xf8] sm:$0xff]  ;;  %v12287_v57 = vcombine.low %v1549_v39, %v1549_v39 }
 0x102   : > { %3070 = vmatprep.mubr.bf16.mxu0 %v1383_v58  ;;  %3110 = vmatprep.mubr.bf16.mxu1 %v1385_v59  ;;  %v12289_v58 = vcombine.low %v1550_v40, %v1550_v40  ;;  %v1399_v59 = vpack.c.bf16 %v652_v50, %v652_v50  ;;  %v12294_v0 = vcombine.high %v1552_v56, %v1552_v56  ;;  %v1557_v40 = vld [vmem:[%s14056_s5 + $0x120] sm:$0xff] }
 0x103   : > { %3118 = vmatprep.subr.bf16.mxu0 %v12276_v62  ;;  %3158 = vmatprep.subr.bf16.mxu1 %v12278_v63  ;;  %v668_v62 = vrot.slane %v654_v52, %v14094_v21  ;;  %v12292_v63 = vcombine.high %v1551_v55, %v1551_v55  ;;  %v327_v50 = vld [vmem:[%s14048_s25 + $0x98] sm:$0xff] }
 0x105   : > { %v670_v3 = vcombine.high %v668_v62, %v668_v62  ;;  %v1404_v23 = vpack.c.bf16 %v668_v62, %v668_v62  ;;  %v729_v62 = vrot.slane %v327_v50, %v14094_v21 }
 0x107   : > { %v1405_v12 = vpack.c.bf16 %v670_v3, %v670_v3  ;;  %v737_v3 = vcombine.high %v729_v62, %v729_v62 }
 0x108   : > { %3071 = vmatmul.mubr.bf16.vlgmr.msra.gmra.mrb[40].mxu0 %v1382_v4  ;;  %3111 = vmatmul.mubr.bf16.vlgmr.msra.gmra.mrb[40].mxu1 %v1384_v5  ;;  %v671_v4 = vcombine.high %v324_v1, %v324_v1  ;;  %v1398_v5 = vpack.c.bf16 %v644_v45, %v644_v45 }
 0x109   : > { %3119 = vmatpush1.bf16.xpose.msra.mxu0 %v12275_v8  ;;  %3159 = vmatpush1.bf16.xpose.msra.mxu1 %v12277_v9  ;;  %v1554_v8 = vld [vmem:[%s14056_s5 + $0x108] sm:$0xff]  ;;  %v12291_v9 = vcombine.low %v1551_v55, %v1551_v55 }
 0x10a   : > { %3150 = vmatprep.mubr.bf16.mxu0 %v1387_v10  ;;  %3190 = vmatprep.mubr.bf16.mxu1 %v1389_v11  ;;  %v12293_v10 = vcombine.low %v1552_v56, %v1552_v56  ;;  %v1403_v11 = vpack.c.bf16 %v669_v2, %v669_v2  ;;  %v12298_v16 = vcombine.high %v1554_v8, %v1554_v8  ;;  %v1559_v56 = vld [vmem:[%s14056_s5 + $0x130] sm:$0xff] }
 0x10b   : > { %3198 = vmatprep.subr.bf16.mxu0 %v12280_v14  ;;  %3238 = vmatprep.subr.bf16.mxu1 %v12282_v15  ;;  %v685_v14 = vrot.slane %v671_v4, %v14094_v21  ;;  %v12296_v15 = vcombine.high %v1553_v7, %v1553_v7  ;;  %v328_v2 = vld [vmem:[%s14048_s25 + $0xa0] sm:$0xff] }
 0x10d   : > { %v687_v19 = vcombine.high %v685_v14, %v685_v14  ;;  %v1408_v39 = vpack.c.bf16 %v685_v14, %v685_v14  ;;  %v746_v14 = vrot.slane %v328_v2, %v14094_v21 }
 0x10f   : > { %v1409_v29 = vpack.c.bf16 %v687_v19, %v687_v19  ;;  %v754_v19 = vcombine.high %v746_v14, %v746_v14 }
 0x110   : > { %3151 = vmatmul.mubr.bf16.vlgmr.msra.gmra.mrb[44].mxu0 %v1386_v20  ;;  %3191 = vmatmul.mubr.bf16.vlgmr.msra.gmra.mrb[44].mxu1 %v1388_v22  ;;  %v688_v20 = vcombine.high %v325_v17, %v325_v17  ;;  %v1402_v22 = vpack.c.bf16 %v661_v61, %v661_v61 }
 0x111   : > { %3199 = vmatpush1.bf16.xpose.msra.mxu0 %v12279_v25  ;;  %3239 = vmatpush1.bf16.xpose.msra.mxu1 %v12281_v26  ;;  %v1556_v25 = vld [vmem:[%s14056_s5 + $0x118] sm:$0xff]  ;;  %v12295_v26 = vcombine.low %v1553_v7, %v1553_v7 }
 0x112   : > { %3230 = vmatprep.mubr.bf16.mxu0 %v1391_v27  ;;  %3270 = vmatprep.mubr.bf16.mxu1 %v1393_v28  ;;  %v12297_v27 = vcombine.low %v1554_v8, %v1554_v8  ;;  %v1407_v28 = vpack.c.bf16 %v686_v18, %v686_v18  ;;  %v12302_v33 = vcombine.high %v1556_v25, %v1556_v25  ;;  %v1561_v8 = vld [vmem:[%s14056_s5 + $0x140] sm:$0xff] }
 0x113   : > { %3278 = vmatprep.subr.bf16.mxu0 %v12284_v31  ;;  %3318 = vmatprep.subr.bf16.mxu1 %v12286_v32  ;;  %v702_v31 = vrot.slane %v688_v20, %v14094_v21  ;;  %v12300_v32 = vcombine.high %v1555_v24, %v1555_v24  ;;  %v329_v18 = vld [vmem:[%s14048_s25 + $0xa8] sm:$0xff] }
 0x115   : > { %v704_v36 = vcombine.high %v702_v31, %v702_v31  ;;  %v1412_v55 = vpack.c.bf16 %v702_v31, %v702_v31  ;;  %v763_v31 = vrot.slane %v329_v18, %v14094_v21 }
 0x117   : > { %v1413_v45 = vpack.c.bf16 %v704_v36, %v704_v36  ;;  %v771_v36 = vcombine.high %v763_v31, %v763_v31 }
 0x118   : > { %3231 = vmatmul.mubr.bf16.vlgmr.msra.gmra.mrb[48].mxu0 %v1390_v37  ;;  %3271 = vmatmul.mubr.bf16.vlgmr.msra.gmra.mrb[48].mxu1 %v1392_v38  ;;  %v705_v37 = vcombine.high %v326_v34, %v326_v34  ;;  %v1406_v38 = vpack.c.bf16 %v678_v13, %v678_v13 }
 0x119   : > { %3279 = vmatpush1.bf16.xpose.msra.mxu0 %v12283_v41  ;;  %3319 = vmatpush1.bf16.xpose.msra.mxu1 %v12285_v42  ;;  %v1558_v41 = vld [vmem:[%s14056_s5 + $0x128] sm:$0xff]  ;;  %v12299_v42 = vcombine.low %v1555_v24, %v1555_v24 }
 0x11a   : > { %3310 = vmatprep.mubr.bf16.mxu0 %v1395_v43  ;;  %3350 = vmatprep.mubr.bf16.mxu1 %v1397_v44  ;;  %v12301_v43 = vcombine.low %v1556_v25, %v1556_v25  ;;  %v1411_v44 = vpack.c.bf16 %v703_v35, %v703_v35  ;;  %v12306_v49 = vcombine.high %v1558_v41, %v1558_v41  ;;  %v1563_v25 = vld [vmem:[%s14056_s5 + $0x150] sm:$0xff]  ;;  %v330_v35 = vld [vmem:[%s14048_s25 + $0xb0] sm:$0xff] }
 0x11b   : > { %3358 = vmatprep.subr.bf16.mxu0 %v12288_v47  ;;  %3398 = vmatprep.subr.bf16.mxu1 %v12290_v48  ;;  %v719_v47 = vrot.slane %v705_v37, %v14094_v21  ;;  %v12304_v48 = vcombine.high %v1557_v40, %v1557_v40 }
 0x11d   : > { %v721_v52 = vcombine.high %v719_v47, %v719_v47  ;;  %v1416_v7 = vpack.c.bf16 %v719_v47, %v719_v47  ;;  %v780_v47 = vrot.slane %v330_v35, %v14094_v21 }
 0x11f   : > { %v1417_v61 = vpack.c.bf16 %v721_v52, %v721_v52  ;;  %v788_v52 = vcombine.high %v780_v47, %v780_v47 }
 0x120   : > { %3311 = vmatmul.mubr.bf16.vlgmr.msra.gmra.mrb[52].mxu0 %v1394_v53  ;;  %3351 = vmatmul.mubr.bf16.vlgmr.msra.gmra.mrb[52].mxu1 %v1396_v54  ;;  %v722_v53 = vcombine.high %v327_v50, %v327_v50  ;;  %v1410_v54 = vpack.c.bf16 %v695_v30, %v695_v30 }
 0x121   : > { %3359 = vmatpush1.bf16.xpose.msra.mxu0 %v12287_v57  ;;  %3399 = vmatpush1.bf16.xpose.msra.mxu1 %v12289_v58  ;;  %v1560_v57 = vld [vmem:[%s14056_s5 + $0x138] sm:$0xff]  ;;  %v12303_v58 = vcombine.low %v1557_v40, %v1557_v40 }
 0x122   : > { %3390 = vmatprep.mubr.bf16.mxu0 %v1399_v59  ;;  %3430 = vmatprep.mubr.bf16.mxu1 %v1401_v60  ;;  %v12305_v59 = vcombine.low %v1558_v41, %v1558_v41  ;;  %v1415_v60 = vpack.c.bf16 %v720_v51, %v720_v51  ;;  %v12310_v1 = vcombine.high %v1560_v57, %v1560_v57  ;;  %v1565_v41 = vld [vmem:[%s14056_s5 + $0x160] sm:$0xff] }
 0x123   : > { %3438 = vmatprep.subr.bf16.mxu0 %v12292_v63  ;;  %3478 = vmatprep.subr.bf16.mxu1 %v12294_v0  ;;  %v736_v63 = vrot.slane %v722_v53, %v14094_v21  ;;  %v12308_v0 = vcombine.high %v1559_v56, %v1559_v56  ;;  %v331_v51 = vld [vmem:[%s14048_s25 + $0xb8] sm:$0xff] }
 0x125   : > { %v738_v4 = vcombine.high %v736_v63, %v736_v63  ;;  %v1420_v24 = vpack.c.bf16 %v736_v63, %v736_v63  ;;  %v797_v63 = vrot.slane %v331_v51, %v14094_v21 }
 0x127   : > { %v1421_v13 = vpack.c.bf16 %v738_v4, %v738_v4  ;;  %v805_v4 = vcombine.high %v797_v63, %v797_v63 }
 0x128   : > { %3391 = vmatmul.mubr.bf16.vlgmr.msra.gmra.mrb[56].mxu0 %v1398_v5  ;;  %3431 = vmatmul.mubr.bf16.vlgmr.msra.gmra.mrb[56].mxu1 %v1400_v6  ;;  %v739_v5 = vcombine.high %v328_v2, %v328_v2  ;;  %v1414_v6 = vpack.c.bf16 %v712_v46, %v712_v46 }
 0x129   : > { %3439 = vmatpush1.bf16.xpose.msra.mxu0 %v12291_v9  ;;  %3479 = vmatpush1.bf16.xpose.msra.mxu1 %v12293_v10  ;;  %v1562_v9 = vld [vmem:[%s14056_s5 + $0x148] sm:$0xff]  ;;  %v12307_v10 = vcombine.low %v1559_v56, %v1559_v56 }
 0x12a   : > { %3470 = vmatprep.mubr.bf16.mxu0 %v1403_v11  ;;  %3510 = vmatprep.mubr.bf16.mxu1 %v1405_v12  ;;  %v12309_v11 = vcombine.low %v1560_v57, %v1560_v57  ;;  %v1419_v12 = vpack.c.bf16 %v737_v3, %v737_v3  ;;  %v12314_v17 = vcombine.high %v1562_v9, %v1562_v9  ;;  %v1567_v57 = vld [vmem:[%s14056_s5 + $0x170] sm:$0xff] }
 0x12b   : > { %3518 = vmatprep.subr.bf16.mxu0 %v12296_v15  ;;  %3558 = vmatprep.subr.bf16.mxu1 %v12298_v16  ;;  %v753_v15 = vrot.slane %v739_v5, %v14094_v21  ;;  %v12312_v16 = vcombine.high %v1561_v8, %v1561_v8  ;;  %v332_v3 = vld [vmem:[%s14048_s25 + $0xc0] sm:$0xff] }
 0x12d   : > { %v755_v20 = vcombine.high %v753_v15, %v753_v15  ;;  %v1424_v40 = vpack.c.bf16 %v753_v15, %v753_v15  ;;  %v814_v15 = vrot.slane %v332_v3, %v14094_v21 }
 0x12f   : > { %v1425_v30 = vpack.c.bf16 %v755_v20, %v755_v20  ;;  %v822_v20 = vcombine.high %v814_v15, %v814_v15 }
 0x130   : > { %3471 = vmatmul.mubr.bf16.vlgmr.msra.gmra.mrb[60].mxu0 %v1402_v22  ;;  %3511 = vmatmul.mubr.bf16.vlgmr.msra.gmra.mrb[60].mxu1 %v1404_v23  ;;  %v756_v22 = vcombine.high %v329_v18, %v329_v18  ;;  %v1418_v23 = vpack.c.bf16 %v729_v62, %v729_v62 }
 0x131   : > { %3519 = vmatpush1.bf16.xpose.msra.mxu0 %v12295_v26  ;;  %3559 = vmatpush1.bf16.xpose.msra.mxu1 %v12297_v27  ;;  %v1564_v26 = vld [vmem:[%s14056_s5 + $0x158] sm:$0xff]  ;;  %v12311_v27 = vcombine.low %v1561_v8, %v1561_v8 }
 0x132   : > { %3550 = vmatprep.mubr.bf16.mxu0 %v1407_v28  ;;  %3590 = vmatprep.mubr.bf16.mxu1 %v1409_v29  ;;  %v12313_v28 = vcombine.low %v1562_v9, %v1562_v9  ;;  %v1423_v29 = vpack.c.bf16 %v754_v19, %v754_v19  ;;  %v12318_v34 = vcombine.high %v1564_v26, %v1564_v26  ;;  %v1569_v9 = vld [vmem:[%s14056_s5 + $0x180] sm:$0xff] }
 0x133   : > { %3598 = vmatprep.subr.bf16.mxu0 %v12300_v32  ;;  %3638 = vmatprep.subr.bf16.mxu1 %v12302_v33  ;;  %v770_v32 = vrot.slane %v756_v22, %v14094_v21  ;;  %v12316_v33 = vcombine.high %v1563_v25, %v1563_v25  ;;  %v333_v19 = vld [vmem:[%s14048_s25 + $0xc8] sm:$0xff] }
 0x135   : > { %v772_v37 = vcombine.high %v770_v32, %v770_v32  ;;  %v1428_v56 = vpack.c.bf16 %v770_v32, %v770_v32  ;;  %v831_v32 = vrot.slane %v333_v19, %v14094_v21 }
 0x137   : > { %v1429_v46 = vpack.c.bf16 %v772_v37, %v772_v37  ;;  %v839_v37 = vcombine.high %v831_v32, %v831_v32 }
 0x138   : > { %3551 = vmatmul.mubr.bf16.vlgmr.msra.gmra.mrb[64].mxu0 %v1406_v38  ;;  %3591 = vmatmul.mubr.bf16.vlgmr.msra.gmra.mrb[64].mxu1 %v1408_v39  ;;  %v773_v38 = vcombine.high %v330_v35, %v330_v35  ;;  %v1422_v39 = vpack.c.bf16 %v746_v14, %v746_v14 }
 0x139   : > { %3599 = vmatpush1.bf16.xpose.msra.mxu0 %v12299_v42  ;;  %3639 = vmatpush1.bf16.xpose.msra.mxu1 %v12301_v43  ;;  %v1566_v42 = vld [vmem:[%s14056_s5 + $0x168] sm:$0xff]  ;;  %v12315_v43 = vcombine.low %v1563_v25, %v1563_v25 }
 0x13a   : > { %3630 = vmatprep.mubr.bf16.mxu0 %v1411_v44  ;;  %3670 = vmatprep.mubr.bf16.mxu1 %v1413_v45  ;;  %v12317_v44 = vcombine.low %v1564_v26, %v1564_v26  ;;  %v1427_v45 = vpack.c.bf16 %v771_v36, %v771_v36  ;;  %v12322_v50 = vcombine.high %v1566_v42, %v1566_v42  ;;  %v1571_v26 = vld [vmem:[%s14056_s5 + $0x190] sm:$0xff]  ;;  %v334_v36 = vld [vmem:[%s14048_s25 + $0xd0] sm:$0xff] }
 0x13b   : > { %3678 = vmatprep.subr.bf16.mxu0 %v12304_v48  ;;  %3718 = vmatprep.subr.bf16.mxu1 %v12306_v49  ;;  %v787_v48 = vrot.slane %v773_v38, %v14094_v21  ;;  %v12320_v49 = vcombine.high %v1565_v41, %v1565_v41 }
 0x13d   : > { %v789_v53 = vcombine.high %v787_v48, %v787_v48  ;;  %v1432_v8 = vpack.c.bf16 %v787_v48, %v787_v48  ;;  %v848_v48 = vrot.slane %v334_v36, %v14094_v21 }
 0x13f   : > { %v1433_v62 = vpack.c.bf16 %v789_v53, %v789_v53  ;;  %v856_v53 = vcombine.high %v848_v48, %v848_v48 }
 0x140   : > { %3631 = vmatmul.mubr.bf16.vlgmr.msra.gmra.mrb[68].mxu0 %v1410_v54  ;;  %3671 = vmatmul.mubr.bf16.vlgmr.msra.gmra.mrb[68].mxu1 %v1412_v55  ;;  %v790_v54 = vcombine.high %v331_v51, %v331_v51  ;;  %v1426_v55 = vpack.c.bf16 %v763_v31, %v763_v31 }
 0x141   : > { %3679 = vmatpush1.bf16.xpose.msra.mxu0 %v12303_v58  ;;  %3719 = vmatpush1.bf16.xpose.msra.mxu1 %v12305_v59  ;;  %v1568_v58 = vld [vmem:[%s14056_s5 + $0x178] sm:$0xff]  ;;  %v12319_v59 = vcombine.low %v1565_v41, %v1565_v41 }
 0x142   : > { %3710 = vmatprep.mubr.bf16.mxu0 %v1415_v60  ;;  %3750 = vmatprep.mubr.bf16.mxu1 %v1417_v61  ;;  %v12321_v60 = vcombine.low %v1566_v42, %v1566_v42  ;;  %v1431_v61 = vpack.c.bf16 %v788_v52, %v788_v52  ;;  %v12326_v2 = vcombine.high %v1568_v58, %v1568_v58  ;;  %v1573_v42 = vld [vmem:[%s14056_s5 + $0x1a0] sm:$0xff] }
 0x143   : > { %3758 = vmatprep.subr.bf16.mxu0 %v12308_v0  ;;  %3798 = vmatprep.subr.bf16.mxu1 %v12310_v1  ;;  %v804_v0 = vrot.slane %v790_v54, %v14094_v21  ;;  %v12324_v1 = vcombine.high %v1567_v57, %v1567_v57  ;;  %v335_v52 = vld [vmem:[%s14048_s25 + $0xd8] sm:$0xff] }
 0x145   : > { %v806_v5 = vcombine.high %v804_v0, %v804_v0  ;;  %v1436_v25 = vpack.c.bf16 %v804_v0, %v804_v0  ;;  %v865_v0 = vrot.slane %v335_v52, %v14094_v21 }
 0x147   : > { %v1437_v14 = vpack.c.bf16 %v806_v5, %v806_v5  ;;  %v873_v5 = vcombine.high %v865_v0, %v865_v0 }
 0x148   : > { %3711 = vmatmul.mubr.bf16.vlgmr.msra.gmra.mrb[72].mxu0 %v1414_v6  ;;  %3751 = vmatmul.mubr.bf16.vlgmr.msra.gmra.mrb[72].mxu1 %v1416_v7  ;;  %v807_v6 = vcombine.high %v332_v3, %v332_v3  ;;  %v1430_v7 = vpack.c.bf16 %v780_v47, %v780_v47 }
 0x149   : > { %3759 = vmatpush1.bf16.xpose.msra.mxu0 %v12307_v10  ;;  %3799 = vmatpush1.bf16.xpose.msra.mxu1 %v12309_v11  ;;  %v1570_v10 = vld [vmem:[%s14056_s5 + $0x188] sm:$0xff]  ;;  %v12323_v11 = vcombine.low %v1567_v57, %v1567_v57 }
 0x14a   : > { %3790 = vmatprep.mubr.bf16.mxu0 %v1419_v12  ;;  %3830 = vmatprep.mubr.bf16.mxu1 %v1421_v13  ;;  %v12325_v12 = vcombine.low %v1568_v58, %v1568_v58  ;;  %v1435_v13 = vpack.c.bf16 %v805_v4, %v805_v4  ;;  %v12330_v18 = vcombine.high %v1570_v10, %v1570_v10  ;;  %v1575_v58 = vld [vmem:[%s14056_s5 + $0x1b0] sm:$0xff] }
 0x14b   : > { %3838 = vmatprep.subr.bf16.mxu0 %v12312_v16  ;;  %3878 = vmatprep.subr.bf16.mxu1 %v12314_v17  ;;  %v821_v16 = vrot.slane %v807_v6, %v14094_v21  ;;  %v12328_v17 = vcombine.high %v1569_v9, %v1569_v9  ;;  %v336_v4 = vld [vmem:[%s14048_s25 + $0xe0] sm:$0xff] }
 0x14d   : > { %v823_v22 = vcombine.high %v821_v16, %v821_v16  ;;  %v1440_v41 = vpack.c.bf16 %v821_v16, %v821_v16  ;;  %v14234_v16 = vrot.slane %v336_v4, %v14094_v21 }
 0x14f   : > { %v1441_v31 = vpack.c.bf16 %v823_v22, %v823_v22  ;;  %v890_v22 = vcombine.high %v14234_v16, %v14234_v16 }
 0x150   : > { %3791 = vmatmul.mubr.bf16.vlgmr.msra.gmra.mrb[76].mxu0 %v1418_v23  ;;  %3831 = vmatmul.mubr.bf16.vlgmr.msra.gmra.mrb[76].mxu1 %v1420_v24  ;;  %v824_v23 = vcombine.high %v333_v19, %v333_v19  ;;  %v1434_v24 = vpack.c.bf16 %v797_v63, %v797_v63 }
 0x151   : > { %3839 = vmatpush1.bf16.xpose.msra.mxu0 %v12311_v27  ;;  %3879 = vmatpush1.bf16.xpose.msra.mxu1 %v12313_v28  ;;  %v1572_v27 = vld [vmem:[%s14056_s5 + $0x198] sm:$0xff]  ;;  %v12327_v28 = vcombine.low %v1569_v9, %v1569_v9 }
 0x152   : > { %3870 = vmatprep.mubr.bf16.mxu0 %v1423_v29  ;;  %3910 = vmatprep.mubr.bf16.mxu1 %v1425_v30  ;;  %v12329_v29 = vcombine.low %v1570_v10, %v1570_v10  ;;  %v1439_v30 = vpack.c.bf16 %v822_v20, %v822_v20  ;;  %v12334_v35 = vcombine.high %v1572_v27, %v1572_v27  ;;  %v1577_v10 = vld [vmem:[%s14056_s5 + $0x1c0] sm:$0xff] }
 0x153   : > { %3918 = vmatprep.subr.bf16.mxu0 %v12316_v33  ;;  %3958 = vmatprep.subr.bf16.mxu1 %v12318_v34  ;;  %v838_v33 = vrot.slane %v824_v23, %v14094_v21  ;;  %v12332_v34 = vcombine.high %v1571_v26, %v1571_v26  ;;  %v337_v20 = vld [vmem:[%s14048_s25 + $0xe8] sm:$0xff] }
 0x155   : > { %v840_v38 = vcombine.high %v838_v33, %v838_v33  ;;  %v1444_v57 = vpack.c.bf16 %v838_v33, %v838_v33  ;;  %v1580_v33 = vld [vmem:[%s14056_s5 + $0x1d8] sm:$0xff] }
 0x157   : > { %v1445_v47 = vpack.c.bf16 %v840_v38, %v840_v38 }
 0x158   : > { %3871 = vmatmul.mubr.bf16.vlgmr.msra.gmra.mrb[80].mxu0 %v1422_v39  ;;  %3911 = vmatmul.mubr.bf16.vlgmr.msra.gmra.mrb[80].mxu1 %v1424_v40  ;;  %v841_v39 = vcombine.high %v334_v36, %v334_v36  ;;  %v1438_v40 = vpack.c.bf16 %v814_v15, %v814_v15  ;;  %v12343_v36 = vcombine.low %v1577_v10, %v1577_v10 }
 0x159   : > { %3919 = vmatpush1.bf16.xpose.msra.mxu0 %v12315_v43  ;;  %3959 = vmatpush1.bf16.xpose.msra.mxu1 %v12317_v44  ;;  %v1574_v43 = vld [vmem:[%s14056_s5 + $0x1a8] sm:$0xff]  ;;  %v12331_v44 = vcombine.low %v1571_v26, %v1571_v26 }
 0x15a   : > { %3950 = vmatprep.mubr.bf16.mxu0 %v1427_v45  ;;  %3990 = vmatprep.mubr.bf16.mxu1 %v1429_v46  ;;  %v12333_v45 = vcombine.low %v1572_v27, %v1572_v27  ;;  %v1443_v46 = vpack.c.bf16 %v839_v37, %v839_v37  ;;  %v12338_v51 = vcombine.high %v1574_v43, %v1574_v43 }
 0x15b   : > { %3998 = vmatprep.subr.bf16.mxu0 %v12320_v49  ;;  %4038 = vmatprep.subr.bf16.mxu1 %v12322_v50  ;;  %v855_v49 = vrot.slane %v841_v39, %v14094_v21  ;;  %v12336_v50 = vcombine.high %v1573_v42, %v1573_v42 }
 0x15d   : > { %v857_v54 = vcombine.high %v855_v49, %v855_v49  ;;  %v1448_v9 = vpack.c.bf16 %v855_v49, %v855_v49 }
 0x15f   : > { %v1449_v63 = vpack.c.bf16 %v857_v54, %v857_v54 }
 0x160   : > { %3951 = vmatmul.mubr.bf16.vlgmr.msra.gmra.mrb[84].mxu0 %v1426_v55  ;;  %3991 = vmatmul.mubr.bf16.vlgmr.msra.gmra.mrb[84].mxu1 %v1428_v56  ;;  %v858_v55 = vcombine.high %v335_v52, %v335_v52  ;;  %v1442_v56 = vpack.c.bf16 %v831_v32, %v831_v32  ;;  %v1579_v32 = vld [vmem:[%s14056_s5 + $0x1d0] sm:$0xff] }
 0x161   : > { %3999 = vmatpush1.bf16.xpose.msra.mxu0 %v12319_v59  ;;  %4039 = vmatpush1.bf16.xpose.msra.mxu1 %v12321_v60  ;;  %v1576_v59 = vld [vmem:[%s14056_s5 + $0x1b8] sm:$0xff]  ;;  %v12335_v60 = vcombine.low %v1573_v42, %v1573_v42  ;;  %v14247_v42 = vrot.slane %v337_v20, %v14094_v21 }
 0x162   : > { %4030 = vmatprep.mubr.bf16.mxu0 %v1431_v61  ;;  %4070 = vmatprep.mubr.bf16.mxu1 %v1433_v62  ;;  %v12337_v61 = vcombine.low %v1574_v43, %v1574_v43  ;;  %v1447_v62 = vpack.c.bf16 %v856_v53, %v856_v53  ;;  %v12342_v3 = vcombine.high %v1576_v59, %v1576_v59 }
 0x163   : > { %4078 = vmatprep.subr.bf16.mxu0 %v12324_v1  ;;  %4118 = vmatprep.subr.bf16.mxu1 %v12326_v2  ;;  %v872_v1 = vrot.slane %v858_v55, %v14094_v21  ;;  %v12340_v2 = vcombine.high %v1575_v58, %v1575_v58  ;;  %v1454_v55 = vpack.c.bf16 %v14234_v16, %v14234_v16 }
 0x165   : > { %v874_v6 = vcombine.high %v872_v1, %v872_v1 }
 0x167   : > { %v1453_v15 = vpack.c.bf16 %v874_v6, %v874_v6 }
 0x168   : > { %4031 = vmatmul.mubr.bf16.vlgmr.msra.gmra.mrb[88].mxu0 %v1430_v7  ;;  %4071 = vmatmul.mubr.bf16.vlgmr.msra.gmra.mrb[88].mxu1 %v1432_v8  ;;  %v875_v7 = vcombine.high %v336_v4, %v336_v4  ;;  %v1446_v8 = vpack.c.bf16 %v848_v48, %v848_v48 }
 0x169   : > { %4079 = vmatpush1.bf16.xpose.msra.mxu0 %v12323_v11  ;;  %4119 = vmatpush1.bf16.xpose.msra.mxu1 %v12325_v12  ;;  %v1578_v11 = vld [vmem:[%s14056_s5 + $0x1c8] sm:$0xff]  ;;  %v12339_v12 = vcombine.low %v1575_v58, %v1575_v58 }
 0x16a   : > { %4110 = vmatprep.mubr.bf16.mxu0 %v1435_v13  ;;  %4150 = vmatprep.mubr.bf16.mxu1 %v1437_v14  ;;  %v12341_v13 = vcombine.low %v1576_v59, %v1576_v59  ;;  %v1451_v14 = vpack.c.bf16 %v873_v5, %v873_v5  ;;  %v12346_v19 = vcombine.high %v1578_v11, %v1578_v11  ;;  %v1582_v58 = vld [vmem:[%s14056_s5 + $0x1e8] sm:$0xff] }
 0x16b   : > { %4158 = vmatprep.subr.bf16.mxu0 %v12328_v17  ;;  %4198 = vmatprep.subr.bf16.mxu1 %v12330_v18  ;;  %v14237_v17 = vrot.slane %v875_v7, %v14094_v21  ;;  %v12344_v18 = vcombine.high %v1577_v10, %v1577_v10  ;;  %v12345_v37 = vcombine.low %v1578_v11, %v1578_v11 }
 0x16c   : > { %v12354_v7 = vcombine.high %v1582_v58, %v1582_v58 }
 0x16d   : > { %v891_v23 = vcombine.high %v14237_v17, %v14237_v17 }
 0x170   : > { %4111 = vmatmul.mubr.bf16.vlgmr.msra.gmra.mrb[92].mxu0 %v1434_v24  ;;  %4151 = vmatmul.mubr.bf16.vlgmr.msra.gmra.mrb[92].mxu1 %v1436_v25  ;;  %v892_v24 = vcombine.high %v337_v20, %v337_v20  ;;  %v1584_v20 = vld [vmem:[%s14056_s5 + $0x1f8] sm:$0xff] }
 0x171   : > { %4159 = vmatpush1.bf16.xpose.msra.mxu0 %v12327_v28  ;;  %4199 = vmatpush1.bf16.xpose.msra.mxu1 %v12329_v29 }
 0x172   : > { %4190 = vmatprep.mubr.bf16.mxu0 %v1439_v30  ;;  %4230 = vmatprep.mubr.bf16.mxu1 %v1441_v31  ;;  %v1450_v30 = vpack.c.bf16 %v865_v0, %v865_v0  ;;  %v1452_v31 = vpack.c.bf16 %v872_v1, %v872_v1  ;;  %v14250_v43 = vrot.slane %v892_v24, %v14094_v21 }
 0x173   : > { %4238 = vmatprep.subr.bf16.mxu0 %v12332_v34  ;;  %4278 = vmatprep.subr.bf16.mxu1 %v12334_v35 }
 0x174   : > { %v908_v48 = vcombine.high %v14250_v43, %v14250_v43 }
 0x176   : > { %v1461_v4 = vpack.c.bf16 %v908_v48, %v908_v48 }
 0x178   : > { %4191 = vmatmul.mubr.bf16.vlgmr.msra.gmra.mrb[96].mxu0 %v1438_v40  ;;  %4231 = vmatmul.mubr.bf16.vlgmr.msra.gmra.mrb[96].mxu1 %v1440_v41  ;;  %v1455_v40 = vpack.c.bf16 %v890_v22, %v890_v22  ;;  %v1457_v41 = vpack.c.bf16 %v891_v23, %v891_v23 }
 0x179   : > { %4239 = vmatpush1.bf16.xpose.msra.mxu0 %v12331_v44  ;;  %4279 = vmatpush1.bf16.xpose.msra.mxu1 %v12333_v45  ;;  %v12348_v44 = vcombine.high %v1579_v32, %v1579_v32  ;;  %v12350_v45 = vcombine.high %v1580_v33, %v1580_v33 }
 0x17a   : > { %4270 = vmatprep.mubr.bf16.mxu0 %v1443_v46  ;;  %4310 = vmatprep.mubr.bf16.mxu1 %v1445_v47  ;;  %v338_v46 = vld [vmem:[%s14048_s25 + $0xf0] sm:$0xff]  ;;  %v907_v47 = vcombine.high %v14247_v42, %v14247_v42 }
 0x17b   : > { %4318 = vmatprep.subr.bf16.mxu0 %v12336_v50  ;;  %4358 = vmatprep.subr.bf16.mxu1 %v12338_v51  ;;  %v909_v49 = vcombine.high %v338_v46, %v338_v46 }
 0x17d   : > { %v14267_v5 = vrot.slane %v909_v49, %v14094_v21 }
 0x17f   : > { %v925_v10 = vcombine.high %v14267_v5, %v14267_v5 }
 0x180   : > { %4271 = vmatmul.mubr.bf16.vlgmr.msra.gmra.mrb[100].mxu0 %v1442_v56  ;;  %4311 = vmatmul.mubr.bf16.vlgmr.msra.gmra.mrb[100].mxu1 %v1444_v57  ;;  %v1456_v56 = vpack.c.bf16 %v14237_v17, %v14237_v17  ;;  %v1581_v57 = vld [vmem:[%s14056_s5 + $0x1e0] sm:$0xff]  ;;  %v1458_v17 = vpack.c.bf16 %v14247_v42, %v14247_v42 }
 0x181   : > { %4319 = vmatpush1.bf16.xpose.msra.mxu0 %v12335_v60  ;;  %4359 = vmatpush1.bf16.xpose.msra.mxu1 %v12337_v61  ;;  %v12347_v61 = vcombine.low %v1579_v32, %v1579_v32  ;;  %v12352_v6 = vcombine.high %v1581_v57, %v1581_v57  ;;  %v12351_v24 = vcombine.low %v1581_v57, %v1581_v57 }
 0x182   : > { %4350 = vmatprep.mubr.bf16.mxu0 %v1447_v62  ;;  %4390 = vmatprep.mubr.bf16.mxu1 %v1449_v63  ;;  %v12349_v62 = vcombine.low %v1580_v33, %v1580_v33  ;;  %v14264_v63 = vrot.slane %v338_v46, %v14094_v21  ;;  %v1585_v46 = vld [vmem:[%s14056_s5 + $0x200] sm:$0xff] }
 0x183   : > { %4398 = vmatprep.subr.bf16.mxu0 %v12340_v2  ;;  %4438 = vmatprep.subr.bf16.mxu1 %v12342_v3  ;;  %v1459_v3 = vpack.c.bf16 %v907_v47, %v907_v47  ;;  %v1586_v47 = vld [vmem:[%s14056_s5 + $0x208] sm:$0xff] }
 0x188   : > { %4351 = vmatmul.mubr.bf16.vlgmr.msra.gmra.mrb[104].mxu0 %v1446_v8  ;;  %4391 = vmatmul.mubr.bf16.vlgmr.msra.gmra.mrb[104].mxu1 %v1448_v9  ;;  %v339_v8 = vld [vmem:[%s14048_s25 + $0xf8] sm:$0xff]  ;;  %v924_v9 = vcombine.high %v14264_v63, %v14264_v63 }
 0x189   : > { %4399 = vmatpush1.bf16.xpose.msra.mxu0 %v12339_v12  ;;  %4439 = vmatpush1.bf16.xpose.msra.mxu1 %v12341_v13  ;;  %v926_v11 = vcombine.high %v339_v8, %v339_v8 }
 0x18a   : > { %4430 = vmatprep.mubr.bf16.mxu0 %v1451_v14  ;;  %4470 = vmatprep.mubr.bf16.mxu1 %v1453_v15 }
 0x18b   : > { %v2272_v25 = vpop.f32.mrb[0].mxu0  ;;  %v2312_v26 = vpop.f32.mrb[0].mxu1  ;;  %4478 = vmatprep.subr.bf16.mxu0 %v12344_v18  ;;  %4518 = vmatprep.subr.bf16.mxu1 %v12346_v19  ;;  %v1460_v18 = vpack.c.bf16 %v14250_v43, %v14250_v43  ;;  %v1583_v19 = vld [vmem:[%s14056_s5 + $0x1f0] sm:$0xff]  ;;  %v14284_v32 = vrot.slane %v926_v11, %v14094_v21 }
 0x18c   : > { %v2313_v27 = vadd.f32 %v2312_v26, %v2272_v25  ;;  %v2274_v28 = vpop.f32.mrb[1].mxu0  ;;  %v2314_v29 = vpop.f32.mrb[1].mxu1  ;;  %v12353_v25 = vcombine.low %v1582_v58, %v1582_v58  ;;  %v1463_v26 = vpack.c.bf16 %v924_v9, %v924_v9  ;;  %v12356_v33 = vcombine.high %v1583_v19, %v1583_v19  ;;  %v1588_v9 = vld [vmem:[%s14056_s5 + $0x218] sm:$0xff] }
 0x18d   : > { %v2275_v34 = vpop.f32.mrb[2].mxu0  ;;  %v2315_v35 = vpop.f32.mrb[2].mxu1 }
 0x18e   : > { %v2276_v38 = vpop.f32.mrb[3].mxu0  ;;  %v2316_v39 = vpop.f32.mrb[3].mxu1  ;;  %v12358_v34 = vcombine.high %v1584_v20, %v1584_v20  ;;  %v340_v35 = vld [vmem:[%s14048_s25 + $0x100] sm:$0xff] }
 0x18f   : > { %v943_v38 = vcombine.high %v340_v35, %v340_v35 }
 0x190   : > { %4431 = vmatmul.mubr.bf16.vlgmr.msra.gmra.mrb[108].mxu0 %v1450_v30  ;;  %4471 = vmatmul.mubr.bf16.vlgmr.msra.gmra.mrb[108].mxu1 %v1452_v31  ;;  %v1465_v30 = vpack.c.bf16 %v925_v10, %v925_v10  ;;  %v14281_v31 = vrot.slane %v339_v8, %v14094_v21  ;;  %v1587_v8 = vld [vmem:[%s14056_s5 + $0x210] sm:$0xff] }
 0x191   : > { %4479 = vmatpush1.bf16.xpose.msra.mxu0 %v12343_v36  ;;  %4519 = vmatpush1.bf16.xpose.msra.mxu1 %v12345_v37  ;;  %v942_v37 = vcombine.high %v14284_v32, %v14284_v32  ;;  %v14301_v58 = vrot.slane %v943_v38, %v14094_v21 }
 0x192   : > { %4510 = vmatprep.mubr.bf16.mxu0 %v1455_v40  ;;  %4550 = vmatprep.mubr.bf16.mxu1 %v1457_v41  ;;  %v941_v36 = vcombine.high %v14281_v31, %v14281_v31 }
 0x193   : > { %v2352_v50 = vpop.f32.mrb[4].mxu0  ;;  %v2392_v51 = vpop.f32.mrb[4].mxu1  ;;  %4558 = vmatprep.subr.bf16.mxu0 %v12348_v44  ;;  %4598 = vmatprep.subr.bf16.mxu1 %v12350_v45  ;;  %v1462_v44 = vpack.c.bf16 %v14264_v63, %v14264_v63  ;;  %v1464_v45 = vpack.c.bf16 %v14267_v5, %v14267_v5  ;;  %v1469_v57 = vpack.c.bf16 %v942_v37, %v942_v37 }
 0x194   : > { %v2353_v52 = vadd.f32 %v2352_v50, %v2313_v27  ;;  %v2354_v53 = vpop.f32.mrb[5].mxu0  ;;  %v2394_v54 = vpop.f32.mrb[5].mxu1  ;;  %v12355_v50 = vcombine.low %v1583_v19, %v1583_v19  ;;  %v959_v63 = vcombine.high %v14301_v58, %v14301_v58 }
 0x195   : > { %v2355_v59 = vpop.f32.mrb[6].mxu0  ;;  %v2395_v60 = vpop.f32.mrb[6].mxu1 }
 0x196   : > { %v2393_v0 = vadd.f32 %v2392_v51, %v2353_v52  ;;  %v2356_v1 = vpop.f32.mrb[7].mxu0  ;;  %v2396_v2 = vpop.f32.mrb[7].mxu1  ;;  %v12357_v51 = vcombine.low %v1584_v20, %v1584_v20  ;;  %v14298_v52 = vrot.slane %v340_v35, %v14094_v21  ;;  %v12360_v59 = vcombine.high %v1585_v46, %v1585_v46  ;;  %v1589_v35 = vld [vmem:[%s14056_s5 + $0x220] sm:$0xff] }
 0x197   : > { %v12362_v60 = vcombine.high %v1586_v47, %v1586_v47 }
 0x198   : > { %4511 = vmatmul.mubr.bf16.vlgmr.msra.gmra.mrb[112].mxu0 %v1454_v55  ;;  %4551 = vmatmul.mubr.bf16.vlgmr.msra.gmra.mrb[112].mxu1 %v1456_v56  ;;  %v1467_v56 = vpack.c.bf16 %v941_v36, %v941_v36  ;;  %v1590_v36 = vld [vmem:[%s14056_s5 + $0x228] sm:$0xff] }
 0x199   : > { %4559 = vmatpush1.bf16.xpose.msra.mxu0 %v12347_v61  ;;  %4599 = vmatpush1.bf16.xpose.msra.mxu1 %v12349_v62  ;;  %v341_v61 = vld [vmem:[%s14048_s25 + $0x108] sm:$0xff]  ;;  %v958_v62 = vcombine.high %v14298_v52, %v14298_v52 }
 0x19a   : > { %4590 = vmatprep.mubr.bf16.mxu0 %v1459_v3  ;;  %4630 = vmatprep.mubr.bf16.mxu1 %v1461_v4  ;;  %v14315_v19 = vrot.slane %v341_v61, %v14094_v21 }
 0x19b   : > { %v2432_v12 = vpop.f32.mrb[8].mxu0  ;;  %v2472_v13 = vpop.f32.mrb[8].mxu1  ;;  %4638 = vmatprep.subr.bf16.mxu0 %v12352_v6  ;;  %4678 = vmatprep.subr.bf16.mxu1 %v12354_v7  ;;  %v1466_v6 = vpack.c.bf16 %v14281_v31, %v14281_v31  ;;  %v1468_v7 = vpack.c.bf16 %v14284_v32, %v14284_v32 }
 0x19c   : > { %v2433_v14 = vadd.f32 %v2432_v12, %v2393_v0  ;;  %v2434_v15 = vpop.f32.mrb[9].mxu0  ;;  %v2474_v16 = vpop.f32.mrb[9].mxu1  ;;  %v960_v0 = vcombine.high %v341_v61, %v341_v61  ;;  %v12359_v12 = vcombine.low %v1585_v46, %v1585_v46  ;;  %v1591_v61 = vld [vmem:[%s14056_s5 + $0x230] sm:$0xff] }
 0x19d   : > { %v2435_v22 = vpop.f32.mrb[10].mxu0  ;;  %v2475_v23 = vpop.f32.mrb[10].mxu1 }
 0x19e   : > { %v2473_v27 = vadd.f32 %v2472_v13, %v2433_v14  ;;  %v2436_v28 = vpop.f32.mrb[11].mxu0  ;;  %v2476_v29 = vpop.f32.mrb[11].mxu1  ;;  %v12361_v13 = vcombine.low %v1586_v47, %v1586_v47  ;;  %v1471_v14 = vpack.c.bf16 %v958_v62, %v958_v62  ;;  %v14318_v20 = vrot.slane %v960_v0, %v14094_v21  ;;  %v1592_v62 = vld [vmem:[%s14056_s5 + $0x238] sm:$0xff] }
 0x19f   : > { %v12364_v22 = vcombine.high %v1587_v8, %v1587_v8  ;;  %v12366_v23 = vcombine.high %v1588_v9, %v1588_v9 }
 0x1a0   : > { %4591 = vmatmul.mubr.bf16.vlgmr.msra.gmra.mrb[116].mxu0 %v1458_v17  ;;  %4631 = vmatmul.mubr.bf16.vlgmr.msra.gmra.mrb[116].mxu1 %v1460_v18  ;;  %v1473_v18 = vpack.c.bf16 %v959_v63, %v959_v63 }
 0x1a1   : > { %4639 = vmatpush1.bf16.xpose.msra.mxu0 %v12351_v24  ;;  %4679 = vmatpush1.bf16.xpose.msra.mxu1 %v12353_v25  ;;  %v342_v24 = vld [vmem:[%s14048_s25 + $0x110] sm:$0xff]  ;;  %v975_v25 = vcombine.high %v14315_v19, %v14315_v19 }
 0x1a2   : > { %4670 = vmatprep.mubr.bf16.mxu0 %v1463_v26  ;;  %4710 = vmatprep.mubr.bf16.mxu1 %v1465_v30  ;;  %v976_v26 = vcombine.high %v14318_v20, %v14318_v20 }
 0x1a3   : > { %v2512_v39 = vpop.f32.mrb[12].mxu0  ;;  %v2552_v40 = vpop.f32.mrb[12].mxu1  ;;  %4718 = vmatprep.subr.bf16.mxu0 %v12356_v33  ;;  %4758 = vmatprep.subr.bf16.mxu1 %v12358_v34  ;;  %v1470_v33 = vpack.c.bf16 %v14298_v52, %v14298_v52  ;;  %v1472_v34 = vpack.c.bf16 %v14301_v58, %v14301_v58 }
 0x1a4   : > { %v2513_v41 = vadd.f32 %v2512_v39, %v2473_v27  ;;  %v2514_v42 = vpop.f32.mrb[13].mxu0  ;;  %v2554_v43 = vpop.f32.mrb[13].mxu1  ;;  %v977_v27 = vcombine.high %v342_v24, %v342_v24  ;;  %v12363_v39 = vcombine.low %v1587_v8, %v1587_v8  ;;  %v1477_v46 = vpack.c.bf16 %v976_v26, %v976_v26 }
 0x1a5   : > { %v2515_v48 = vpop.f32.mrb[14].mxu0  ;;  %v2555_v49 = vpop.f32.mrb[14].mxu1 }
 0x1a6   : > { %v2553_v53 = vadd.f32 %v2552_v40, %v2513_v41  ;;  %v2516_v54 = vpop.f32.mrb[15].mxu0  ;;  %v2556_v55 = vpop.f32.mrb[15].mxu1  ;;  %v12365_v40 = vcombine.low %v1588_v9, %v1588_v9  ;;  %v14332_v41 = vrot.slane %v342_v24, %v14094_v21  ;;  %v14335_v47 = vrot.slane %v977_v27, %v14094_v21  ;;  %v1593_v24 = vld [vmem:[%s14056_s5 + $0x240] sm:$0xff] }
 0x1a7   : > { %v12368_v48 = vcombine.high %v1589_v35, %v1589_v35  ;;  %v12370_v49 = vcombine.high %v1590_v36, %v1590_v36 }
 0x1a8   : > { %4671 = vmatmul.mubr.bf16.vlgmr.msra.gmra.mrb[120].mxu0 %v1462_v44  ;;  %4711 = vmatmul.mubr.bf16.vlgmr.msra.gmra.mrb[120].mxu1 %v1464_v45  ;;  %v1475_v45 = vpack.c.bf16 %v975_v25, %v975_v25  ;;  %v993_v52 = vcombine.high %v14335_v47, %v14335_v47  ;;  %v1594_v25 = vld [vmem:[%s14056_s5 + $0x248] sm:$0xff] }
 0x1a9   : > { %4719 = vmatpush1.bf16.xpose.msra.mxu0 %v12355_v50  ;;  %4759 = vmatpush1.bf16.xpose.msra.mxu1 %v12357_v51  ;;  %v343_v50 = vld [vmem:[%s14048_s25 + $0x118] sm:$0xff]  ;;  %v992_v51 = vcombine.high %v14332_v41, %v14332_v41 }
 0x1aa   : > { %4750 = vmatprep.mubr.bf16.mxu0 %v1467_v56  ;;  %4790 = vmatprep.mubr.bf16.mxu1 %v1469_v57  ;;  %v14349_v8 = vrot.slane %v343_v50, %v14094_v21 }
 0x1ab   : > { %v2592_v1 = vpop.f32.mrb[16].mxu0  ;;  %v2632_v2 = vpop.f32.mrb[16].mxu1  ;;  %4798 = vmatprep.subr.bf16.mxu0 %v12360_v59  ;;  %4838 = vmatprep.subr.bf16.mxu1 %v12362_v60  ;;  %v1474_v59 = vpack.c.bf16 %v14315_v19, %v14315_v19  ;;  %v1476_v60 = vpack.c.bf16 %v14318_v20, %v14318_v20 }
 0x1ac   : > { %v2593_v3 = vadd.f32 %v2592_v1, %v2553_v53  ;;  %v2594_v4 = vpop.f32.mrb[17].mxu0  ;;  %v2634_v5 = vpop.f32.mrb[17].mxu1  ;;  %v994_v53 = vcombine.high %v343_v50, %v343_v50  ;;  %v12367_v1 = vcombine.low %v1589_v35, %v1589_v35  ;;  %v1595_v50 = vld [vmem:[%s14056_s5 + $0x250] sm:$0xff] }
 0x1ad   : > { %v2595_v10 = vpop.f32.mrb[18].mxu0  ;;  %v2635_v11 = vpop.f32.mrb[18].mxu1 }
 0x1ae   : > { %v2633_v15 = vadd.f32 %v2632_v2, %v2593_v3  ;;  %v2596_v16 = vpop.f32.mrb[19].mxu0  ;;  %v2636_v17 = vpop.f32.mrb[19].mxu1  ;;  %v12369_v2 = vcombine.low %v1590_v36, %v1590_v36  ;;  %v1479_v3 = vpack.c.bf16 %v992_v51, %v992_v51  ;;  %v14352_v9 = vrot.slane %v994_v53, %v14094_v21  ;;  %v1596_v51 = vld [vmem:[%s14056_s5 + $0x258] sm:$0xff] }
 0x1af   : > { %v12372_v10 = vcombine.high %v1591_v61, %v1591_v61  ;;  %v12374_v11 = vcombine.high %v1592_v62, %v1592_v62 }
 0x1b0   : > { %4751 = vmatmul.mubr.bf16.vlgmr.msra.gmra.mrb[124].mxu0 %v1466_v6  ;;  %4791 = vmatmul.mubr.bf16.vlgmr.msra.gmra.mrb[124].mxu1 %v1468_v7  ;;  %v1481_v7 = vpack.c.bf16 %v993_v52, %v993_v52 }
 0x1b1   : > { %4799 = vmatpush1.bf16.xpose.msra.mxu0 %v12359_v12  ;;  %4839 = vmatpush1.bf16.xpose.msra.mxu1 %v12361_v13  ;;  %v344_v12 = vld [vmem:[%s14048_s25 + $0x120] sm:$0xff]  ;;  %v1009_v13 = vcombine.high %v14349_v8, %v14349_v8 }
 0x1b2   : > { %4830 = vmatprep.mubr.bf16.mxu0 %v1471_v14  ;;  %4870 = vmatprep.mubr.bf16.mxu1 %v1473_v18  ;;  %v1010_v14 = vcombine.high %v14352_v9, %v14352_v9 }
 0x1b3   : > { %v2672_v28 = vpop.f32.mrb[20].mxu0  ;;  %v2712_v29 = vpop.f32.mrb[20].mxu1  ;;  %4878 = vmatprep.subr.bf16.mxu0 %v12364_v22  ;;  %4918 = vmatprep.subr.bf16.mxu1 %v12366_v23  ;;  %v1478_v22 = vpack.c.bf16 %v14332_v41, %v14332_v41  ;;  %v1480_v23 = vpack.c.bf16 %v14335_v47, %v14335_v47 }
 0x1b4   : > { %v2673_v30 = vadd.f32 %v2672_v28, %v2633_v15  ;;  %v2674_v31 = vpop.f32.mrb[21].mxu0  ;;  %v2714_v32 = vpop.f32.mrb[21].mxu1  ;;  %v1011_v15 = vcombine.high %v344_v12, %v344_v12  ;;  %v12371_v28 = vcombine.low %v1591_v61, %v1591_v61  ;;  %v1485_v35 = vpack.c.bf16 %v1010_v14, %v1010_v14 }
 0x1b5   : > { %v2675_v37 = vpop.f32.mrb[22].mxu0  ;;  %v2715_v38 = vpop.f32.mrb[22].mxu1 }
 0x1b6   : > { %v2713_v42 = vadd.f32 %v2712_v29, %v2673_v30  ;;  %v2676_v43 = vpop.f32.mrb[23].mxu0  ;;  %v2716_v44 = vpop.f32.mrb[23].mxu1  ;;  %v12373_v29 = vcombine.low %v1592_v62, %v1592_v62  ;;  %v14366_v30 = vrot.slane %v344_v12, %v14094_v21  ;;  %v14369_v36 = vrot.slane %v1011_v15, %v14094_v21  ;;  %v1597_v12 = vld [vmem:[%s14056_s5 + $0x260] sm:$0xff] }
 0x1b7   : > { %v12376_v37 = vcombine.high %v1593_v24, %v1593_v24  ;;  %v12378_v38 = vcombine.high %v1594_v25, %v1594_v25 }
 0x1b8   : > { %4831 = vmatmul.mubr.bf16.vlgmr.msra.gmra.mrb[128].mxu0 %v1470_v33  ;;  %4871 = vmatmul.mubr.bf16.vlgmr.msra.gmra.mrb[128].mxu1 %v1472_v34  ;;  %v1483_v34 = vpack.c.bf16 %v1009_v13, %v1009_v13  ;;  %v1027_v41 = vcombine.high %v14369_v36, %v14369_v36  ;;  %v1598_v13 = vld [vmem:[%s14056_s5 + $0x268] sm:$0xff] }
 0x1b9   : > { %4879 = vmatpush1.bf16.xpose.msra.mxu0 %v12363_v39  ;;  %4919 = vmatpush1.bf16.xpose.msra.mxu1 %v12365_v40  ;;  %v345_v39 = vld [vmem:[%s14048_s25 + $0x128] sm:$0xff]  ;;  %v1026_v40 = vcombine.high %v14366_v30, %v14366_v30 }
 0x1ba   : > { %4910 = vmatprep.mubr.bf16.mxu0 %v1475_v45  ;;  %4950 = vmatprep.mubr.bf16.mxu1 %v1477_v46  ;;  %v14383_v61 = vrot.slane %v345_v39, %v14094_v21 }
 0x1bb   : > { %v2752_v54 = vpop.f32.mrb[24].mxu0  ;;  %v2792_v55 = vpop.f32.mrb[24].mxu1  ;;  %4958 = vmatprep.subr.bf16.mxu0 %v12368_v48  ;;  %4998 = vmatprep.subr.bf16.mxu1 %v12370_v49  ;;  %v1482_v48 = vpack.c.bf16 %v14349_v8, %v14349_v8  ;;  %v1484_v49 = vpack.c.bf16 %v14352_v9, %v14352_v9 }
 0x1bc   : > { %v2753_v56 = vadd.f32 %v2752_v54, %v2713_v42  ;;  %v2754_v57 = vpop.f32.mrb[25].mxu0  ;;  %v2794_v58 = vpop.f32.mrb[25].mxu1  ;;  %v1028_v42 = vcombine.high %v345_v39, %v345_v39  ;;  %v12375_v54 = vcombine.low %v1593_v24, %v1593_v24  ;;  %v1599_v39 = vld [vmem:[%s14056_s5 + $0x270] sm:$0xff] }
 0x1bd   : > { %v2755_v63 = vpop.f32.mrb[26].mxu0  ;;  %v2795_v0 = vpop.f32.mrb[26].mxu1 }
 0x1be   : > { %v2793_v4 = vadd.f32 %v2792_v55, %v2753_v56  ;;  %v2756_v5 = vpop.f32.mrb[27].mxu0  ;;  %v2796_v6 = vpop.f32.mrb[27].mxu1  ;;  %v12377_v55 = vcombine.low %v1594_v25, %v1594_v25  ;;  %v1487_v56 = vpack.c.bf16 %v1026_v40, %v1026_v40  ;;  %v14386_v62 = vrot.slane %v1028_v42, %v14094_v21  ;;  %v1600_v40 = vld [vmem:[%s14056_s5 + $0x278] sm:$0xff] }
 0x1bf   : > { %v12380_v63 = vcombine.high %v1595_v50, %v1595_v50  ;;  %v12382_v0 = vcombine.high %v1596_v51, %v1596_v51 }
 0x1c0   : > { %4911 = vmatmul.mubr.bf16.vlgmr.msra.gmra.mrb[132].mxu0 %v1474_v59  ;;  %4951 = vmatmul.mubr.bf16.vlgmr.msra.gmra.mrb[132].mxu1 %v1476_v60  ;;  %v1489_v60 = vpack.c.bf16 %v1027_v41, %v1027_v41 }
 0x1c1   : > { %4959 = vmatpush1.bf16.xpose.msra.mxu0 %v12367_v1  ;;  %4999 = vmatpush1.bf16.xpose.msra.mxu1 %v12369_v2  ;;  %v346_v1 = vld [vmem:[%s14048_s25 + $0x130] sm:$0xff]  ;;  %v1043_v2 = vcombine.high %v14383_v61, %v14383_v61 }
 0x1c2   : > { %4990 = vmatprep.mubr.bf16.mxu0 %v1479_v3  ;;  %5030 = vmatprep.mubr.bf16.mxu1 %v1481_v7  ;;  %v1044_v3 = vcombine.high %v14386_v62, %v14386_v62 }
 0x1c3   : > { %v2832_v16 = vpop.f32.mrb[28].mxu0  ;;  %v2872_v17 = vpop.f32.mrb[28].mxu1  ;;  %5038 = vmatprep.subr.bf16.mxu0 %v12372_v10  ;;  %5078 = vmatprep.subr.bf16.mxu1 %v12374_v11  ;;  %v1486_v10 = vpack.c.bf16 %v14366_v30, %v14366_v30  ;;  %v1488_v11 = vpack.c.bf16 %v14369_v36, %v14369_v36 }
 0x1c4   : > { %v2833_v18 = vadd.f32 %v2832_v16, %v2793_v4  ;;  %v2834_v19 = vpop.f32.mrb[29].mxu0  ;;  %v2874_v20 = vpop.f32.mrb[29].mxu1  ;;  %v1045_v4 = vcombine.high %v346_v1, %v346_v1  ;;  %v12379_v16 = vcombine.low %v1595_v50, %v1595_v50  ;;  %v1493_v24 = vpack.c.bf16 %v1044_v3, %v1044_v3 }
 0x1c5   : > { %v2835_v26 = vpop.f32.mrb[30].mxu0  ;;  %v2875_v27 = vpop.f32.mrb[30].mxu1 }
 0x1c6   : > { %v2873_v31 = vadd.f32 %v2872_v17, %v2833_v18  ;;  %v2836_v32 = vpop.f32.mrb[31].mxu0  ;;  %v2876_v33 = vpop.f32.mrb[31].mxu1  ;;  %v12381_v17 = vcombine.low %v1596_v51, %v1596_v51  ;;  %v14400_v18 = vrot.slane %v346_v1, %v14094_v21  ;;  %v14403_v25 = vrot.slane %v1045_v4, %v14094_v21  ;;  %v1601_v1 = vld [vmem:[%s14056_s5 + $0x280] sm:$0xff] }
 0x1c7   : > { %v12384_v26 = vcombine.high %v1597_v12, %v1597_v12  ;;  %v12386_v27 = vcombine.high %v1598_v13, %v1598_v13 }
 0x1c8   : > { %4991 = vmatmul.mubr.bf16.vlgmr.msra.gmra.mrb[136].mxu0 %v1478_v22  ;;  %5031 = vmatmul.mubr.bf16.vlgmr.msra.gmra.mrb[136].mxu1 %v1480_v23  ;;  %v1491_v23 = vpack.c.bf16 %v1043_v2, %v1043_v2  ;;  %v1061_v30 = vcombine.high %v14403_v25, %v14403_v25  ;;  %v1602_v2 = vld [vmem:[%s14056_s5 + $0x288] sm:$0xff] }
 0x1c9   : > { %5039 = vmatpush1.bf16.xpose.msra.mxu0 %v12371_v28  ;;  %5079 = vmatpush1.bf16.xpose.msra.mxu1 %v12373_v29  ;;  %v347_v28 = vld [vmem:[%s14048_s25 + $0x138] sm:$0xff]  ;;  %v1060_v29 = vcombine.high %v14400_v18, %v14400_v18 }
 0x1ca   : > { %5070 = vmatprep.mubr.bf16.mxu0 %v1483_v34  ;;  %5110 = vmatprep.mubr.bf16.mxu1 %v1485_v35  ;;  %v14417_v50 = vrot.slane %v347_v28, %v14094_v21 }
 0x1cb   : > { %v2912_v43 = vpop.f32.mrb[32].mxu0  ;;  %v2952_v44 = vpop.f32.mrb[32].mxu1  ;;  %5118 = vmatprep.subr.bf16.mxu0 %v12376_v37  ;;  %5158 = vmatprep.subr.bf16.mxu1 %v12378_v38  ;;  %v1490_v37 = vpack.c.bf16 %v14383_v61, %v14383_v61  ;;  %v1492_v38 = vpack.c.bf16 %v14386_v62, %v14386_v62 }
 0x1cc   : > { %v2913_v45 = vadd.f32 %v2912_v43, %v2873_v31  ;;  %v2914_v46 = vpop.f32.mrb[33].mxu0  ;;  %v2954_v47 = vpop.f32.mrb[33].mxu1  ;;  %v1062_v31 = vcombine.high %v347_v28, %v347_v28  ;;  %v12383_v43 = vcombine.low %v1597_v12, %v1597_v12  ;;  %v1603_v28 = vld [vmem:[%s14056_s5 + $0x290] sm:$0xff] }
 0x1cd   : > { %v2915_v52 = vpop.f32.mrb[34].mxu0  ;;  %v2955_v53 = vpop.f32.mrb[34].mxu1 }
 0x1ce   : > { %v2953_v57 = vadd.f32 %v2952_v44, %v2913_v45  ;;  %v2916_v58 = vpop.f32.mrb[35].mxu0  ;;  %v2956_v59 = vpop.f32.mrb[35].mxu1  ;;  %v12385_v44 = vcombine.low %v1598_v13, %v1598_v13  ;;  %v1495_v45 = vpack.c.bf16 %v1060_v29, %v1060_v29  ;;  %v14420_v51 = vrot.slane %v1062_v31, %v14094_v21  ;;  %v1604_v29 = vld [vmem:[%s14056_s5 + $0x298] sm:$0xff] }
 0x1cf   : > { %v12388_v52 = vcombine.high %v1599_v39, %v1599_v39  ;;  %v12390_v53 = vcombine.high %v1600_v40, %v1600_v40 }
 0x1d0   : > { %5071 = vmatmul.mubr.bf16.vlgmr.msra.gmra.mrb[140].mxu0 %v1482_v48  ;;  %5111 = vmatmul.mubr.bf16.vlgmr.msra.gmra.mrb[140].mxu1 %v1484_v49  ;;  %v1497_v49 = vpack.c.bf16 %v1061_v30, %v1061_v30 }
 0x1d1   : > { %5119 = vmatpush1.bf16.xpose.msra.mxu0 %v12375_v54  ;;  %5159 = vmatpush1.bf16.xpose.msra.mxu1 %v12377_v55  ;;  %v348_v54 = vld [vmem:[%s14048_s25 + $0x140] sm:$0xff]  ;;  %v1077_v55 = vcombine.high %v14417_v50, %v14417_v50 }
 0x1d2   : > { %5150 = vmatprep.mubr.bf16.mxu0 %v1487_v56  ;;  %5190 = vmatprep.mubr.bf16.mxu1 %v1489_v60  ;;  %v1078_v56 = vcombine.high %v14420_v51, %v14420_v51 }
 0x1d3   : > { %v2992_v5 = vpop.f32.mrb[36].mxu0  ;;  %v3032_v6 = vpop.f32.mrb[36].mxu1  ;;  %5198 = vmatprep.subr.bf16.mxu0 %v12380_v63  ;;  %5238 = vmatprep.subr.bf16.mxu1 %v12382_v0  ;;  %v1494_v63 = vpack.c.bf16 %v14400_v18, %v14400_v18  ;;  %v1496_v0 = vpack.c.bf16 %v14403_v25, %v14403_v25 }
 0x1d4   : > { %v2993_v7 = vadd.f32 %v2992_v5, %v2953_v57  ;;  %v2994_v8 = vpop.f32.mrb[37].mxu0  ;;  %v3034_v9 = vpop.f32.mrb[37].mxu1  ;;  %v1079_v57 = vcombine.high %v348_v54, %v348_v54  ;;  %v12387_v5 = vcombine.low %v1599_v39, %v1599_v39  ;;  %v1501_v12 = vpack.c.bf16 %v1078_v56, %v1078_v56 }
 0x1d5   : > { %v2995_v14 = vpop.f32.mrb[38].mxu0  ;;  %v3035_v15 = vpop.f32.mrb[38].mxu1 }
 0x1d6   : > { %v3033_v19 = vadd.f32 %v3032_v6, %v2993_v7  ;;  %v2996_v20 = vpop.f32.mrb[39].mxu0  ;;  %v3036_v22 = vpop.f32.mrb[39].mxu1  ;;  %v12389_v6 = vcombine.low %v1600_v40, %v1600_v40  ;;  %v14434_v7 = vrot.slane %v348_v54, %v14094_v21  ;;  %v14437_v13 = vrot.slane %v1079_v57, %v14094_v21  ;;  %v1605_v54 = vld [vmem:[%s14056_s5 + $0x2a0] sm:$0xff] }
 0x1d7   : > { %v12392_v14 = vcombine.high %v1601_v1, %v1601_v1  ;;  %v12394_v15 = vcombine.high %v1602_v2, %v1602_v2 }
 0x1d8   : > { %5151 = vmatmul.mubr.bf16.vlgmr.msra.gmra.mrb[144].mxu0 %v1486_v10  ;;  %5191 = vmatmul.mubr.bf16.vlgmr.msra.gmra.mrb[144].mxu1 %v1488_v11  ;;  %v1499_v11 = vpack.c.bf16 %v1077_v55, %v1077_v55  ;;  %v1095_v18 = vcombine.high %v14437_v13, %v14437_v13  ;;  %v1606_v55 = vld [vmem:[%s14056_s5 + $0x2a8] sm:$0xff] }
 0x1d9   : > { %5199 = vmatpush1.bf16.xpose.msra.mxu0 %v12379_v16  ;;  %5239 = vmatpush1.bf16.xpose.msra.mxu1 %v12381_v17  ;;  %v349_v16 = vld [vmem:[%s14048_s25 + $0x148] sm:$0xff]  ;;  %v1094_v17 = vcombine.high %v14434_v7, %v14434_v7 }
 0x1da   : > { %5230 = vmatprep.mubr.bf16.mxu0 %v1491_v23  ;;  %5270 = vmatprep.mubr.bf16.mxu1 %v1493_v24  ;;  %v14451_v39 = vrot.slane %v349_v16, %v14094_v21 }
 0x1db   : > { %v3072_v32 = vpop.f32.mrb[40].mxu0  ;;  %v3112_v33 = vpop.f32.mrb[40].mxu1  ;;  %5278 = vmatprep.subr.bf16.mxu0 %v12384_v26  ;;  %5318 = vmatprep.subr.bf16.mxu1 %v12386_v27  ;;  %v1498_v26 = vpack.c.bf16 %v14417_v50, %v14417_v50  ;;  %v1500_v27 = vpack.c.bf16 %v14420_v51, %v14420_v51 }
 0x1dc   : > { %v3073_v34 = vadd.f32 %v3072_v32, %v3033_v19  ;;  %v3074_v35 = vpop.f32.mrb[41].mxu0  ;;  %v3114_v36 = vpop.f32.mrb[41].mxu1  ;;  %v1096_v19 = vcombine.high %v349_v16, %v349_v16  ;;  %v12391_v32 = vcombine.low %v1601_v1, %v1601_v1  ;;  %v1607_v16 = vld [vmem:[%s14056_s5 + $0x2b0] sm:$0xff] }
 0x1dd   : > { %v3075_v41 = vpop.f32.mrb[42].mxu0  ;;  %v3115_v42 = vpop.f32.mrb[42].mxu1 }
 0x1de   : > { %v3113_v46 = vadd.f32 %v3112_v33, %v3073_v34  ;;  %v3076_v47 = vpop.f32.mrb[43].mxu0  ;;  %v3116_v48 = vpop.f32.mrb[43].mxu1  ;;  %v12393_v33 = vcombine.low %v1602_v2, %v1602_v2  ;;  %v1503_v34 = vpack.c.bf16 %v1094_v17, %v1094_v17  ;;  %v14454_v40 = vrot.slane %v1096_v19, %v14094_v21  ;;  %v1608_v17 = vld [vmem:[%s14056_s5 + $0x2b8] sm:$0xff] }
 0x1df   : > { %v12396_v41 = vcombine.high %v1603_v28, %v1603_v28  ;;  %v12398_v42 = vcombine.high %v1604_v29, %v1604_v29 }
 0x1e0   : > { %5231 = vmatmul.mubr.bf16.vlgmr.msra.gmra.mrb[148].mxu0 %v1490_v37  ;;  %5271 = vmatmul.mubr.bf16.vlgmr.msra.gmra.mrb[148].mxu1 %v1492_v38  ;;  %v1505_v38 = vpack.c.bf16 %v1095_v18, %v1095_v18 }
 0x1e1   : > { %5279 = vmatpush1.bf16.xpose.msra.mxu0 %v12383_v43  ;;  %5319 = vmatpush1.bf16.xpose.msra.mxu1 %v12385_v44  ;;  %v350_v43 = vld [vmem:[%s14048_s25 + $0x150] sm:$0xff]  ;;  %v1111_v44 = vcombine.high %v14451_v39, %v14451_v39 }
 0x1e2   : > { %5310 = vmatprep.mubr.bf16.mxu0 %v1495_v45  ;;  %5350 = vmatprep.mubr.bf16.mxu1 %v1497_v49  ;;  %v1112_v45 = vcombine.high %v14454_v40, %v14454_v40 }
 0x1e3   : > { %v3152_v58 = vpop.f32.mrb[44].mxu0  ;;  %v3192_v59 = vpop.f32.mrb[44].mxu1  ;;  %5358 = vmatprep.subr.bf16.mxu0 %v12388_v52  ;;  %5398 = vmatprep.subr.bf16.mxu1 %v12390_v53  ;;  %v1502_v52 = vpack.c.bf16 %v14434_v7, %v14434_v7  ;;  %v1504_v53 = vpack.c.bf16 %v14437_v13, %v14437_v13 }
 0x1e4   : > { %v3153_v60 = vadd.f32 %v3152_v58, %v3113_v46  ;;  %v3154_v61 = vpop.f32.mrb[45].mxu0  ;;  %v3194_v62 = vpop.f32.mrb[45].mxu1  ;;  %v1113_v46 = vcombine.high %v350_v43, %v350_v43  ;;  %v12395_v58 = vcombine.low %v1603_v28, %v1603_v28  ;;  %v1509_v1 = vpack.c.bf16 %v1112_v45, %v1112_v45 }
 0x1e5   : > { %v3155_v3 = vpop.f32.mrb[46].mxu0  ;;  %v3195_v4 = vpop.f32.mrb[46].mxu1  ;;  %v12403_v45 = vcombine.low %v1607_v16, %v1607_v16 }
 0x1e6   : > { %v3193_v8 = vadd.f32 %v3192_v59, %v3153_v60  ;;  %v3156_v9 = vpop.f32.mrb[47].mxu0  ;;  %v3196_v10 = vpop.f32.mrb[47].mxu1  ;;  %v12397_v59 = vcombine.low %v1604_v29, %v1604_v29  ;;  %v14468_v60 = vrot.slane %v350_v43, %v14094_v21  ;;  %v14471_v2 = vrot.slane %v1113_v46, %v14094_v21 }
 0x1e7   : > { %v12400_v3 = vcombine.high %v1605_v54, %v1605_v54  ;;  %v12402_v4 = vcombine.high %v1606_v55, %v1606_v55  ;;  %v12405_v46 = vcombine.low %v1608_v17, %v1608_v17 }
 0x1e8   : > { %5311 = vmatmul.mubr.bf16.vlgmr.msra.gmra.mrb[152].mxu0 %v1494_v63  ;;  %5351 = vmatmul.mubr.bf16.vlgmr.msra.gmra.mrb[152].mxu1 %v1496_v0  ;;  %v1507_v0 = vpack.c.bf16 %v1111_v44, %v1111_v44  ;;  %v1129_v7 = vcombine.high %v14471_v2, %v14471_v2 }
 0x1e9   : > { %5359 = vmatpush1.bf16.xpose.msra.mxu0 %v12387_v5  ;;  %5399 = vmatpush1.bf16.xpose.msra.mxu1 %v12389_v6  ;;  %v351_v5 = vld [vmem:[%s14048_s25 + $0x158] sm:$0xff]  ;;  %v1128_v6 = vcombine.high %v14468_v60, %v14468_v60 }
 0x1ea   : > { %5390 = vmatprep.mubr.bf16.mxu0 %v1499_v11  ;;  %5430 = vmatprep.mubr.bf16.mxu1 %v1501_v12  ;;  %v1137_v28 = vrot.slane %v351_v5, %v14094_v21 }
 0x1eb   : > { %v3232_v20 = vpop.f32.mrb[48].mxu0  ;;  %v3272_v22 = vpop.f32.mrb[48].mxu1  ;;  %5438 = vmatprep.subr.bf16.mxu0 %v12392_v14  ;;  %5478 = vmatprep.subr.bf16.mxu1 %v12394_v15  ;;  %v1506_v14 = vpack.c.bf16 %v14451_v39, %v14451_v39  ;;  %v1508_v15 = vpack.c.bf16 %v14454_v40, %v14454_v40  ;;  %v1510_v40 = vpack.c.bf16 %v14468_v60, %v14468_v60 }
 0x1ec   : > { %v3233_v23 = vadd.f32 %v3232_v20, %v3193_v8  ;;  %v3234_v24 = vpop.f32.mrb[49].mxu0  ;;  %v3274_v25 = vpop.f32.mrb[49].mxu1  ;;  %v1130_v8 = vcombine.high %v351_v5, %v351_v5  ;;  %v12399_v20 = vcombine.low %v1605_v54, %v1605_v54 }
 0x1ed   : > { %v3235_v30 = vpop.f32.mrb[50].mxu0  ;;  %v3275_v31 = vpop.f32.mrb[50].mxu1 }
 0x1ee   : > { %v3273_v35 = vadd.f32 %v3272_v22, %v3233_v23  ;;  %v3236_v36 = vpop.f32.mrb[51].mxu0  ;;  %v3276_v37 = vpop.f32.mrb[51].mxu1  ;;  %v12401_v22 = vcombine.low %v1606_v55, %v1606_v55  ;;  %v1511_v23 = vpack.c.bf16 %v1128_v6, %v1128_v6  ;;  %v1144_v29 = vrot.slane %v1130_v8, %v14094_v21 }
 0x1ef   : > { %v12404_v30 = vcombine.high %v1607_v16, %v1607_v16  ;;  %v12406_v31 = vcombine.high %v1608_v17, %v1608_v17  ;;  %v352_v36 = vld [vmem:[%s14048_s25 + $0x160] sm:$0x3f] }
 0x1f0   : > { %5391 = vmatmul.mubr.bf16.vlgmr.msra.gmra.mrb[156].mxu0 %v1498_v26  ;;  %5431 = vmatmul.mubr.bf16.vlgmr.msra.gmra.mrb[156].mxu1 %v1500_v27  ;;  %v1513_v27 = vpack.c.bf16 %v1129_v7, %v1129_v7 }
 0x1f1   : > { %5439 = vmatpush1.bf16.xpose.msra.mxu0 %v12391_v32  ;;  %5479 = vmatpush1.bf16.xpose.msra.mxu1 %v12393_v33  ;;  %v1145_v32 = vcombine.high %v1137_v28, %v1137_v28  ;;  %v1146_v33 = vcombine.high %v1144_v29, %v1144_v29 }
 0x1f2   : > { %5470 = vmatprep.mubr.bf16.mxu0 %v1503_v34  ;;  %5510 = vmatprep.mubr.bf16.mxu1 %v1505_v38 }
 0x1f3   : > { %v3312_v47 = vpop.f32.mrb[52].mxu0  ;;  %v3352_v48 = vpop.f32.mrb[52].mxu1  ;;  %5518 = vmatprep.subr.bf16.mxu0 %v12396_v41  ;;  %5558 = vmatprep.subr.bf16.mxu1 %v12398_v42  ;;  %v1512_v41 = vpack.c.bf16 %v14471_v2, %v14471_v2  ;;  %v1609_v42 = vld [vmem:[%s14056_s5 + $0x2c0] sm:$0xff] }
 0x1f4   : > { %v3313_v49 = vadd.f32 %v3312_v47, %v3273_v35  ;;  %v3314_v50 = vpop.f32.mrb[53].mxu0  ;;  %v3354_v51 = vpop.f32.mrb[53].mxu1  ;;  %v12407_v2 = vcombine.low %v1609_v42, %v1609_v42 }
 0x1f5   : > { %v3315_v56 = vpop.f32.mrb[54].mxu0  ;;  %v3355_v57 = vpop.f32.mrb[54].mxu1  ;;  %v1515_v50 = vpack.c.bf16 %v1145_v32, %v1145_v32  ;;  %v1517_v51 = vpack.c.bf16 %v1146_v33, %v1146_v33 }
 0x1f6   : > { %v3353_v61 = vadd.f32 %v3352_v48, %v3313_v49  ;;  %v3316_v62 = vpop.f32.mrb[55].mxu0  ;;  %v3356_v63 = vpop.f32.mrb[55].mxu1  ;;  %v13849_v57 = vmov 0.0  }
 0x1f7   : > { %v1516_v62 = vpack.c.bf16 %v1144_v29, %v1144_v29  ;;  %v1147_v63 = vcombine.high %v352_v36, %v352_v36 }
 0x1f8   : > { %5471 = vmatmul.mubr.bf16.vlgmr.msra.gmra.mrb[160].mxu0 %v1502_v52  ;;  %5511 = vmatmul.mubr.bf16.vlgmr.msra.gmra.mrb[160].mxu1 %v1504_v53  ;;  %v1154_v52 = vrot.slane %v352_v36, %v14094_v21  ;;  %v12408_v53 = vcombine.high %v1609_v42, %v1609_v42 }
 0x1f9   : > { %5519 = vmatpush1.bf16.xpose.msra.mxu0 %v12395_v58  ;;  %5559 = vmatpush1.bf16.xpose.msra.mxu1 %v12397_v59  ;;  %v1161_v8 = vrot.slane %v1147_v63, %v14094_v21 }
 0x1fa   : > { %5550 = vmatprep.mubr.bf16.mxu0 %v1507_v0  ;;  %5590 = vmatprep.mubr.bf16.mxu1 %v1509_v1  ;;  %v1162_v54 = vcombine.high %v1154_v52, %v1154_v52 }
 0x1fb   : > { %v3392_v9 = vpop.f32.mrb[56].mxu0  ;;  %v3432_v10 = vpop.f32.mrb[56].mxu1  ;;  %5598 = vmatprep.subr.bf16.mxu0 %v12400_v3  ;;  %5638 = vmatprep.subr.bf16.mxu1 %v12402_v4  ;;  %v13458_v3 = vld [vmem:[%s14056_s5 + $0x2c8] ss:$0 sps:$4 sm:$0xff]  }
 0x1fc   : > { %v3393_v11 = vadd.f32 %v3392_v9, %v3353_v61  ;;  %v3394_v12 = vpop.f32.mrb[57].mxu0  ;;  %v3434_v13 = vpop.f32.mrb[57].mxu1  ;;  %v1514_v61 = vpack.c.bf16 %v1137_v28, %v1137_v28  ;;  %v1519_v7 = vpack.c.bf16 %v1162_v54, %v1162_v54 }
 0x1fd   : > { %v3395_v18 = vpop.f32.mrb[58].mxu0  ;;  %v3435_v19 = vpop.f32.mrb[58].mxu1 }
 0x1fe   : > { %v3433_v24 = vadd.f32 %v3432_v10, %v3393_v11  ;;  %v3396_v25 = vpop.f32.mrb[59].mxu0  ;;  %v3436_v26 = vpop.f32.mrb[59].mxu1 }
 0x200   : > { %5551 = vmatmul.mubr.bf16.vlgmr.msra.gmra.mrb[164].mxu0 %v1506_v14  ;;  %5591 = vmatmul.mubr.bf16.vlgmr.msra.gmra.mrb[164].mxu1 %v1508_v15  ;;  %v1518_v14 = vpack.c.bf16 %v1154_v52, %v1154_v52  ;;  %v1520_v15 = vpack.c.bf16 %v1161_v8, %v1161_v8 }
 0x201   : > { %5599 = vmatpush1.bf16.xpose.msra.mxu0 %v12399_v20  ;;  %5639 = vmatpush1.bf16.xpose.msra.mxu1 %v12401_v22 }
 0x202   : > { %5630 = vmatprep.mubr.bf16.mxu0 %v1511_v23  ;;  %5670 = vmatprep.mubr.bf16.mxu1 %v1513_v27 }
 0x203   : > { %v3472_v34 = vpop.f32.mrb[60].mxu0  ;;  %v3512_v35 = vpop.f32.mrb[60].mxu1  ;;  %5678 = vmatprep.subr.bf16.mxu0 %v12404_v30  ;;  %5718 = vmatprep.subr.bf16.mxu1 %v12406_v31 }
 0x204   : > { %v3473_v37 = vadd.f32 %v3472_v34, %v3433_v24  ;;  %v3474_v38 = vpop.f32.mrb[61].mxu0  ;;  %v3514_v39 = vpop.f32.mrb[61].mxu1 }
 0x205   : > { %v3475_v43 = vpop.f32.mrb[62].mxu0  ;;  %v3515_v44 = vpop.f32.mrb[62].mxu1 }
 0x206   : > { %v3513_v47 = vadd.f32 %v3512_v35, %v3473_v37  ;;  %v3476_v48 = vpop.f32.mrb[63].mxu0  ;;  %v3516_v49 = vpop.f32.mrb[63].mxu1 }
 0x208   : > { %5631 = vmatmul.mubr.bf16.vlgmr.msra.gmra.mrb[168].mxu0 %v1510_v40  ;;  %5671 = vmatmul.mubr.bf16.vlgmr.msra.gmra.mrb[168].mxu1 %v1512_v41 }
 0x209   : > { %5679 = vmatpush1.bf16.xpose.msra.mxu0 %v12403_v45  ;;  %5719 = vmatpush1.bf16.xpose.msra.mxu1 %v12405_v46 }
 0x20a   : > { %5710 = vmatprep.mubr.bf16.mxu0 %v1515_v50  ;;  %5750 = vmatprep.mubr.bf16.mxu1 %v1517_v51 }
 0x20b   : > { %v3552_v55 = vpop.f32.mrb[64].mxu0  ;;  %v3592_v56 = vpop.f32.mrb[64].mxu1  ;;  %5758 = vmatprep.subr.bf16.mxu0 %v12408_v53  ;;  %13135 = vmatprep.subr.bf16.mxu1 %v13849_v57 }
 0x20c   : > { %v3553_v58 = vadd.f32 %v3552_v55, %v3513_v47  ;;  %v3554_v59 = vpop.f32.mrb[65].mxu0  ;;  %v3594_v60 = vpop.f32.mrb[65].mxu1 }
 0x20d   : > { %v3555_v0 = vpop.f32.mrb[66].mxu0  ;;  %v3595_v1 = vpop.f32.mrb[66].mxu1 }
 0x20e   : > { %v3593_v4 = vadd.f32 %v3592_v56, %v3553_v58  ;;  %v3556_v5 = vpop.f32.mrb[67].mxu0  ;;  %v3596_v6 = vpop.f32.mrb[67].mxu1 }
 0x210   : > { %5711 = vmatmul.mubr.bf16.vlgmr.msra.gmra.mrb[172].mxu0 %v1514_v61  ;;  %5751 = vmatmul.mubr.bf16.vlgmr.msra.gmra.mrb[172].mxu1 %v1516_v62 }
 0x211   : > { %5759 = vmatpush1.bf16.xpose.msra.mxu0 %v12407_v2  ;;  %13136 = vmatpush3.bf16.xpose.msra.mxu1 %v13458_v3 }
 0x212   : > { %5790 = vmatprep.mubr.bf16.mxu0 %v1519_v7  ;;  %13137 = vmatprep.mubr.msk.bf16.mxu1 %vm13850_vm2, %v13849_v57 }
 0x213   : > { %v3632_v9 = vpop.f32.mrb[68].mxu0  ;;  %v3672_v10 = vpop.f32.mrb[68].mxu1 }
 0x214   : > { %v3633_v11 = vadd.f32 %v3632_v9, %v3593_v4  ;;  %v3634_v12 = vpop.f32.mrb[69].mxu0  ;;  %v3674_v13 = vpop.f32.mrb[69].mxu1 }
 0x215   : > { %v3635_v16 = vpop.f32.mrb[70].mxu0  ;;  %v3675_v17 = vpop.f32.mrb[70].mxu1 }
 0x216   : > { %v3673_v18 = vadd.f32 %v3672_v10, %v3633_v11  ;;  %v3636_v19 = vpop.f32.mrb[71].mxu0  ;;  %v3676_v20 = vpop.f32.mrb[71].mxu1 }
 0x218   : > { %5791 = vmatmul.mubr.bf16.vlgmr.msra.gmra.mrb[176].mxu0 %v1518_v14  ;;  %13138 = vmatmul.mubr.bf16.vlgmr.msra.gmra.mrb[176].mxu1 %v1520_v15 }
 0x21b   : > { %v3712_v21 = vpop.f32.mrb[72].mxu0  ;;  %v3752_v22 = vpop.f32.mrb[72].mxu1 }
 0x21c   : > { %v3713_v23 = vadd.f32 %v3712_v21, %v3673_v18  ;;  %v3714_v24 = vpop.f32.mrb[73].mxu0  ;;  %v3754_v25 = vpop.f32.mrb[73].mxu1 }
 0x21d   : > { %v3715_v26 = vpop.f32.mrb[74].mxu0  ;;  %v3755_v27 = vpop.f32.mrb[74].mxu1 }
 0x21e   : > { %v3753_v28 = vadd.f32 %v3752_v22, %v3713_v23  ;;  %v3716_v29 = vpop.f32.mrb[75].mxu0  ;;  %v3756_v30 = vpop.f32.mrb[75].mxu1 }
 0x223   : > { %v3792_v31 = vpop.f32.mrb[76].mxu0  ;;  %v3832_v32 = vpop.f32.mrb[76].mxu1 }
 0x224   : > { %v3793_v33 = vadd.f32 %v3792_v31, %v3753_v28  ;;  %v3794_v34 = vpop.f32.mrb[77].mxu0  ;;  %v3834_v35 = vpop.f32.mrb[77].mxu1 }
 0x225   : > { %v3795_v36 = vpop.f32.mrb[78].mxu0  ;;  %v3835_v37 = vpop.f32.mrb[78].mxu1 }
 0x226   : > { %v3833_v38 = vadd.f32 %v3832_v32, %v3793_v33  ;;  %v3796_v39 = vpop.f32.mrb[79].mxu0  ;;  %v3836_v40 = vpop.f32.mrb[79].mxu1 }
 0x22b   : > { %v3872_v41 = vpop.f32.mrb[80].mxu0  ;;  %v3912_v42 = vpop.f32.mrb[80].mxu1 }
 0x22c   : > { %v3873_v43 = vadd.f32 %v3872_v41, %v3833_v38  ;;  %v3874_v44 = vpop.f32.mrb[81].mxu0  ;;  %v3914_v45 = vpop.f32.mrb[81].mxu1 }
 0x22d   : > { %v3875_v46 = vpop.f32.mrb[82].mxu0  ;;  %v3915_v47 = vpop.f32.mrb[82].mxu1 }
 0x22e   : > { %v3913_v48 = vadd.f32 %v3912_v42, %v3873_v43  ;;  %v3876_v49 = vpop.f32.mrb[83].mxu0  ;;  %v3916_v50 = vpop.f32.mrb[83].mxu1 }
 0x233   : > { %v3952_v51 = vpop.f32.mrb[84].mxu0  ;;  %v3992_v52 = vpop.f32.mrb[84].mxu1 }
 0x234   : > { %v3953_v53 = vadd.f32 %v3952_v51, %v3913_v48  ;;  %v3954_v54 = vpop.f32.mrb[85].mxu0  ;;  %v3994_v55 = vpop.f32.mrb[85].mxu1 }
 0x235   : > { %v3955_v56 = vpop.f32.mrb[86].mxu0  ;;  %v3995_v57 = vpop.f32.mrb[86].mxu1 }
 0x236   : > { %v3993_v58 = vadd.f32 %v3992_v52, %v3953_v53  ;;  %v3956_v59 = vpop.f32.mrb[87].mxu0  ;;  %v3996_v60 = vpop.f32.mrb[87].mxu1 }
 0x23b   : > { %v4032_v61 = vpop.f32.mrb[88].mxu0  ;;  %v4072_v62 = vpop.f32.mrb[88].mxu1 }
 0x23c   : > { %v4033_v63 = vadd.f32 %v4032_v61, %v3993_v58  ;;  %v4034_v0 = vpop.f32.mrb[89].mxu0  ;;  %v4074_v1 = vpop.f32.mrb[89].mxu1 }
 0x23d   : > { %v4035_v2 = vpop.f32.mrb[90].mxu0  ;;  %v4075_v3 = vpop.f32.mrb[90].mxu1 }
 0x23e   : > { %v4073_v4 = vadd.f32 %v4072_v62, %v4033_v63  ;;  %v4036_v5 = vpop.f32.mrb[91].mxu0  ;;  %v4076_v6 = vpop.f32.mrb[91].mxu1 }
 0x243   : > { %v4112_v7 = vpop.f32.mrb[92].mxu0  ;;  %v4152_v8 = vpop.f32.mrb[92].mxu1 }
 0x244   : > { %v4113_v9 = vadd.f32 %v4112_v7, %v4073_v4  ;;  %v4114_v10 = vpop.f32.mrb[93].mxu0  ;;  %v4154_v11 = vpop.f32.mrb[93].mxu1 }
 0x245   : > { %v4115_v12 = vpop.f32.mrb[94].mxu0  ;;  %v4155_v13 = vpop.f32.mrb[94].mxu1 }
 0x246   : > { %v4153_v14 = vadd.f32 %v4152_v8, %v4113_v9  ;;  %v4116_v15 = vpop.f32.mrb[95].mxu0  ;;  %v4156_v16 = vpop.f32.mrb[95].mxu1 }
 0x24b   : > { %v4192_v17 = vpop.f32.mrb[96].mxu0  ;;  %v4232_v18 = vpop.f32.mrb[96].mxu1 }
 0x24c   : > { %v4193_v19 = vadd.f32 %v4192_v17, %v4153_v14  ;;  %v4194_v20 = vpop.f32.mrb[97].mxu0  ;;  %v4234_v21 = vpop.f32.mrb[97].mxu1 }
 0x24d   : > { %v4195_v22 = vpop.f32.mrb[98].mxu0  ;;  %v4235_v23 = vpop.f32.mrb[98].mxu1 }
 0x24e   : > { %v4233_v24 = vadd.f32 %v4232_v18, %v4193_v19  ;;  %v4196_v25 = vpop.f32.mrb[99].mxu0  ;;  %v4236_v26 = vpop.f32.mrb[99].mxu1 }
 0x253   : > { %v4272_v27 = vpop.f32.mrb[100].mxu0  ;;  %v4312_v28 = vpop.f32.mrb[100].mxu1 }
 0x254   : > { %v4273_v29 = vadd.f32 %v4272_v27, %v4233_v24  ;;  %v4274_v30 = vpop.f32.mrb[101].mxu0  ;;  %v4314_v31 = vpop.f32.mrb[101].mxu1 }
 0x255   : > { %v4275_v32 = vpop.f32.mrb[102].mxu0  ;;  %v4315_v33 = vpop.f32.mrb[102].mxu1 }
 0x256   : > { %v4313_v34 = vadd.f32 %v4312_v28, %v4273_v29  ;;  %v4276_v35 = vpop.f32.mrb[103].mxu0  ;;  %v4316_v36 = vpop.f32.mrb[103].mxu1 }
 0x25b   : > { %v4352_v37 = vpop.f32.mrb[104].mxu0  ;;  %v4392_v38 = vpop.f32.mrb[104].mxu1 }
 0x25c   : > { %v4353_v39 = vadd.f32 %v4352_v37, %v4313_v34  ;;  %v4354_v40 = vpop.f32.mrb[105].mxu0  ;;  %v4394_v41 = vpop.f32.mrb[105].mxu1 }
 0x25d   : > { %v4355_v42 = vpop.f32.mrb[106].mxu0  ;;  %v4395_v43 = vpop.f32.mrb[106].mxu1 }
 0x25e   : > { %v4393_v44 = vadd.f32 %v4392_v38, %v4353_v39  ;;  %v4356_v45 = vpop.f32.mrb[107].mxu0  ;;  %v4396_v46 = vpop.f32.mrb[107].mxu1 }
 0x263   : > { %v4432_v47 = vpop.f32.mrb[108].mxu0  ;;  %v4472_v48 = vpop.f32.mrb[108].mxu1 }
 0x264   : > { %v4433_v49 = vadd.f32 %v4432_v47, %v4393_v44  ;;  %v4434_v50 = vpop.f32.mrb[109].mxu0  ;;  %v4474_v51 = vpop.f32.mrb[109].mxu1 }
 0x265   : > { %v4435_v52 = vpop.f32.mrb[110].mxu0  ;;  %v4475_v53 = vpop.f32.mrb[110].mxu1 }
 0x266   : > { %v4473_v54 = vadd.f32 %v4472_v48, %v4433_v49  ;;  %v4436_v55 = vpop.f32.mrb[111].mxu0  ;;  %v4476_v56 = vpop.f32.mrb[111].mxu1 }
 0x26b   : > { %v4512_v57 = vpop.f32.mrb[112].mxu0  ;;  %v4552_v58 = vpop.f32.mrb[112].mxu1 }
 0x26c   : > { %v4513_v59 = vadd.f32 %v4512_v57, %v4473_v54  ;;  %v4514_v60 = vpop.f32.mrb[113].mxu0  ;;  %v4554_v61 = vpop.f32.mrb[113].mxu1 }
 0x26d   : > { %v4515_v62 = vpop.f32.mrb[114].mxu0  ;;  %v4555_v63 = vpop.f32.mrb[114].mxu1 }
 0x26e   : > { %v4553_v0 = vadd.f32 %v4552_v58, %v4513_v59  ;;  %v4516_v1 = vpop.f32.mrb[115].mxu0  ;;  %v4556_v2 = vpop.f32.mrb[115].mxu1 }
 0x273   : > { %v4592_v3 = vpop.f32.mrb[116].mxu0  ;;  %v4632_v4 = vpop.f32.mrb[116].mxu1 }
 0x274   : > { %v4593_v5 = vadd.f32 %v4592_v3, %v4553_v0  ;;  %v4594_v6 = vpop.f32.mrb[117].mxu0  ;;  %v4634_v7 = vpop.f32.mrb[117].mxu1 }
 0x275   : > { %v4595_v8 = vpop.f32.mrb[118].mxu0  ;;  %v4635_v9 = vpop.f32.mrb[118].mxu1 }
 0x276   : > { %v4633_v10 = vadd.f32 %v4632_v4, %v4593_v5  ;;  %v4596_v11 = vpop.f32.mrb[119].mxu0  ;;  %v4636_v12 = vpop.f32.mrb[119].mxu1 }
 0x27b   : > { %v4672_v13 = vpop.f32.mrb[120].mxu0  ;;  %v4712_v14 = vpop.f32.mrb[120].mxu1 }
 0x27c   : > { %v4673_v15 = vadd.f32 %v4672_v13, %v4633_v10  ;;  %v4674_v16 = vpop.f32.mrb[121].mxu0  ;;  %v4714_v17 = vpop.f32.mrb[121].mxu1 }
 0x27d   : > { %v4675_v18 = vpop.f32.mrb[122].mxu0  ;;  %v4715_v19 = vpop.f32.mrb[122].mxu1 }
 0x27e   : > { %v4713_v20 = vadd.f32 %v4712_v14, %v4673_v15  ;;  %v4676_v21 = vpop.f32.mrb[123].mxu0  ;;  %v4716_v22 = vpop.f32.mrb[123].mxu1 }
 0x283   : > { %v4752_v23 = vpop.f32.mrb[124].mxu0  ;;  %v4792_v24 = vpop.f32.mrb[124].mxu1 }
 0x284   : > { %v4753_v25 = vadd.f32 %v4752_v23, %v4713_v20  ;;  %v4754_v26 = vpop.f32.mrb[125].mxu0  ;;  %v4794_v27 = vpop.f32.mrb[125].mxu1 }
 0x285   : > { %v4755_v28 = vpop.f32.mrb[126].mxu0  ;;  %v4795_v29 = vpop.f32.mrb[126].mxu1 }
 0x286   : > { %v4793_v30 = vadd.f32 %v4792_v24, %v4753_v25  ;;  %v4756_v31 = vpop.f32.mrb[127].mxu0  ;;  %v4796_v32 = vpop.f32.mrb[127].mxu1 }
 0x28b   : > { %v4832_v33 = vpop.f32.mrb[128].mxu0  ;;  %v4872_v34 = vpop.f32.mrb[128].mxu1 }
 0x28c   : > { %v4833_v35 = vadd.f32 %v4832_v33, %v4793_v30  ;;  %v4834_v36 = vpop.f32.mrb[129].mxu0  ;;  %v4874_v37 = vpop.f32.mrb[129].mxu1 }
 0x28d   : > { %v4835_v38 = vpop.f32.mrb[130].mxu0  ;;  %v4875_v39 = vpop.f32.mrb[130].mxu1 }
 0x28e   : > { %v4873_v40 = vadd.f32 %v4872_v34, %v4833_v35  ;;  %v4836_v41 = vpop.f32.mrb[131].mxu0  ;;  %v4876_v42 = vpop.f32.mrb[131].mxu1 }
 0x293   : > { %v4912_v43 = vpop.f32.mrb[132].mxu0  ;;  %v4952_v44 = vpop.f32.mrb[132].mxu1 }
 0x294   : > { %v4913_v45 = vadd.f32 %v4912_v43, %v4873_v40  ;;  %v4914_v46 = vpop.f32.mrb[133].mxu0  ;;  %v4954_v47 = vpop.f32.mrb[133].mxu1 }
 0x295   : > { %v4915_v48 = vpop.f32.mrb[134].mxu0  ;;  %v4955_v49 = vpop.f32.mrb[134].mxu1 }
 0x296   : > { %v4953_v50 = vadd.f32 %v4952_v44, %v4913_v45  ;;  %v4916_v51 = vpop.f32.mrb[135].mxu0  ;;  %v4956_v52 = vpop.f32.mrb[135].mxu1 }
 0x29b   : > { %v4992_v53 = vpop.f32.mrb[136].mxu0  ;;  %v5032_v54 = vpop.f32.mrb[136].mxu1 }
 0x29c   : > { %v4993_v55 = vadd.f32 %v4992_v53, %v4953_v50  ;;  %v4994_v56 = vpop.f32.mrb[137].mxu0  ;;  %v5034_v57 = vpop.f32.mrb[137].mxu1 }
 0x29d   : > { %v4995_v58 = vpop.f32.mrb[138].mxu0  ;;  %v5035_v59 = vpop.f32.mrb[138].mxu1 }
 0x29e   : > { %v5033_v60 = vadd.f32 %v5032_v54, %v4993_v55  ;;  %v4996_v61 = vpop.f32.mrb[139].mxu0  ;;  %v5036_v62 = vpop.f32.mrb[139].mxu1 }
 0x2a3   : > { %v5072_v63 = vpop.f32.mrb[140].mxu0  ;;  %v5112_v0 = vpop.f32.mrb[140].mxu1 }
 0x2a4   : > { %v5073_v1 = vadd.f32 %v5072_v63, %v5033_v60  ;;  %v5074_v2 = vpop.f32.mrb[141].mxu0  ;;  %v5114_v3 = vpop.f32.mrb[141].mxu1 }
 0x2a5   : > { %v5075_v4 = vpop.f32.mrb[142].mxu0  ;;  %v5115_v5 = vpop.f32.mrb[142].mxu1 }
 0x2a6   : > { %v5113_v6 = vadd.f32 %v5112_v0, %v5073_v1  ;;  %v5076_v7 = vpop.f32.mrb[143].mxu0  ;;  %v5116_v8 = vpop.f32.mrb[143].mxu1 }
 0x2ab   : > { %v5152_v9 = vpop.f32.mrb[144].mxu0  ;;  %v5192_v10 = vpop.f32.mrb[144].mxu1 }
 0x2ac   : > { %v5153_v11 = vadd.f32 %v5152_v9, %v5113_v6  ;;  %v5154_v12 = vpop.f32.mrb[145].mxu0  ;;  %v5194_v13 = vpop.f32.mrb[145].mxu1 }
 0x2ad   : > { %v5155_v14 = vpop.f32.mrb[146].mxu0  ;;  %v5195_v15 = vpop.f32.mrb[146].mxu1 }
 0x2ae   : > { %v5193_v16 = vadd.f32 %v5192_v10, %v5153_v11  ;;  %v5156_v17 = vpop.f32.mrb[147].mxu0  ;;  %v5196_v18 = vpop.f32.mrb[147].mxu1 }
 0x2b3   : > { %v5232_v19 = vpop.f32.mrb[148].mxu0  ;;  %v5272_v20 = vpop.f32.mrb[148].mxu1 }
 0x2b4   : > { %v5233_v21 = vadd.f32 %v5232_v19, %v5193_v16  ;;  %v5234_v22 = vpop.f32.mrb[149].mxu0  ;;  %v5274_v23 = vpop.f32.mrb[149].mxu1 }
 0x2b5   : > { %v5235_v24 = vpop.f32.mrb[150].mxu0  ;;  %v5275_v25 = vpop.f32.mrb[150].mxu1 }
 0x2b6   : > { %v5273_v26 = vadd.f32 %v5272_v20, %v5233_v21  ;;  %v5236_v27 = vpop.f32.mrb[151].mxu0  ;;  %v5276_v28 = vpop.f32.mrb[151].mxu1 }
 0x2bb   : > { %v5312_v29 = vpop.f32.mrb[152].mxu0  ;;  %v5352_v30 = vpop.f32.mrb[152].mxu1 }
 0x2bc   : > { %v5313_v31 = vadd.f32 %v5312_v29, %v5273_v26  ;;  %v5314_v32 = vpop.f32.mrb[153].mxu0  ;;  %v5354_v33 = vpop.f32.mrb[153].mxu1 }
 0x2bd   : > { %v5315_v34 = vpop.f32.mrb[154].mxu0  ;;  %v5355_v35 = vpop.f32.mrb[154].mxu1 }
 0x2be   : > { %v5353_v36 = vadd.f32 %v5352_v30, %v5313_v31  ;;  %v5316_v37 = vpop.f32.mrb[155].mxu0  ;;  %v5356_v38 = vpop.f32.mrb[155].mxu1  ;;  %v353_v30 = vld [vmem:[%s14073_s28] sm:$0x3] }
 0x2c3   : > { %v5392_v39 = vpop.f32.mrb[156].mxu0  ;;  %v5432_v40 = vpop.f32.mrb[156].mxu1 }
 0x2c4   : > { %v5393_v41 = vadd.f32 %v5392_v39, %v5353_v36  ;;  %v5394_v42 = vpop.f32.mrb[157].mxu0  ;;  %v5434_v43 = vpop.f32.mrb[157].mxu1 }
 0x2c5   : > { %v5395_v44 = vpop.f32.mrb[158].mxu0  ;;  %v5435_v45 = vpop.f32.mrb[158].mxu1 }
 0x2c6   : > { %v5433_v46 = vadd.f32 %v5432_v40, %v5393_v41  ;;  %v5396_v47 = vpop.f32.mrb[159].mxu0  ;;  %v5436_v48 = vpop.f32.mrb[159].mxu1 }
 0x2cb   : > { %v5472_v49 = vpop.f32.mrb[160].mxu0  ;;  %v5512_v50 = vpop.f32.mrb[160].mxu1 }
 0x2cc   : > { %v5473_v51 = vadd.f32 %v5472_v49, %v5433_v46  ;;  %v5474_v52 = vpop.f32.mrb[161].mxu0  ;;  %v5514_v53 = vpop.f32.mrb[161].mxu1 }
 0x2cd   : > { %v5475_v54 = vpop.f32.mrb[162].mxu0  ;;  %v5515_v55 = vpop.f32.mrb[162].mxu1 }
 0x2ce   : > { %v5513_v56 = vadd.f32 %v5512_v50, %v5473_v51  ;;  %v5476_v57 = vpop.f32.mrb[163].mxu0  ;;  %v5516_v58 = vpop.f32.mrb[163].mxu1 }
 0x2d3   : > { %v5552_v59 = vpop.f32.mrb[164].mxu0  ;;  %v5592_v60 = vpop.f32.mrb[164].mxu1 }
 0x2d4   : > { %v5553_v61 = vadd.f32 %v5552_v59, %v5513_v56  ;;  %v5554_v62 = vpop.f32.mrb[165].mxu0  ;;  %v5594_v63 = vpop.f32.mrb[165].mxu1 }
 0x2d5   : > { %v5555_v0 = vpop.f32.mrb[166].mxu0  ;;  %v5595_v1 = vpop.f32.mrb[166].mxu1 }
 0x2d6   : > { %v5593_v2 = vadd.f32 %v5592_v60, %v5553_v61  ;;  %v5556_v3 = vpop.f32.mrb[167].mxu0  ;;  %v5596_v4 = vpop.f32.mrb[167].mxu1 }
 0x2db   : > { %v5632_v5 = vpop.f32.mrb[168].mxu0  ;;  %v5672_v6 = vpop.f32.mrb[168].mxu1 }
 0x2dc   : > { %v5633_v7 = vadd.f32 %v5632_v5, %v5593_v2  ;;  %v5634_v8 = vpop.f32.mrb[169].mxu0  ;;  %v5674_v9 = vpop.f32.mrb[169].mxu1 }
 0x2dd   : > { %v5635_v10 = vpop.f32.mrb[170].mxu0  ;;  %v5675_v11 = vpop.f32.mrb[170].mxu1 }
 0x2de   : > { %v5673_v12 = vadd.f32 %v5672_v6, %v5633_v7  ;;  %v5636_v13 = vpop.f32.mrb[171].mxu0  ;;  %v5676_v14 = vpop.f32.mrb[171].mxu1 }
 0x2e3   : > { %v5712_v15 = vpop.f32.mrb[172].mxu0  ;;  %v5752_v16 = vpop.f32.mrb[172].mxu1 }
 0x2e4   : > { %v5713_v17 = vadd.f32 %v5712_v15, %v5673_v12  ;;  %v5714_v18 = vpop.f32.mrb[173].mxu0  ;;  %v5754_v19 = vpop.f32.mrb[173].mxu1 }
 0x2e5   : > { %v5715_v20 = vpop.f32.mrb[174].mxu0  ;;  %v5755_v21 = vpop.f32.mrb[174].mxu1 }
 0x2e6   : > { %v5753_v22 = vadd.f32 %v5752_v16, %v5713_v17  ;;  %v5716_v23 = vpop.f32.mrb[175].mxu0  ;;  %v5756_v24 = vpop.f32.mrb[175].mxu1 }
 0x2eb   : > { %v5792_v25 = vpop.f32.mrb[176].mxu0  ;;  %v5832_v26 = vpop.f32.mrb[176].mxu1 }
 0x2ec   : > { %v5793_v27 = vadd.f32 %v5792_v25, %v5753_v22  ;;  %v5794_v28 = vpop.f32.mrb[177].mxu0  ;;  %v13139_v29 = vpop.f32.mrb[177].mxu1 }
 0x2ed   : > { %v5795_v31 = vpop.f32.mrb[178].mxu0  ;;  %v5835_v32 = vpop.f32.mrb[178].mxu1 }
 0x2ee   : > { %v5833_v33 = vadd.f32 %v5832_v26, %v5793_v27  ;;  %v5796_v34 = vpop.f32.mrb[179].mxu0  ;;  %v13140_v35 = vpop.f32.mrb[179].mxu1 }
 0x2f0   : > { %v5838_v36 = vadd.f32 %v5833_v33, %v353_v30 }
 0x2f2   : > { %5840 = vst.msk [vmem:[%s14073_s28] sm:$0x3] %vm5839_vm3, %v5838_v36 }
 0x2f3 PF: > { %p12410_p1 = scmp.le.s32.totalorder %s14085_s7, 91200 }
 0x2f4   : > { %v7776_v37 = vld [vmem:[%s14056_s5] sm:$0xff] (!%p12410_p1)  ;;  %v7777_v38 = vld [vmem:[%s14056_s5 + $0x8] sm:$0xff] (!%p12410_p1)  ;;  %v5845_v39 = vlaneseq (!%p12410_p1)  ;;  %v14502_v40 = vstv (!%p12410_p1), %s302_s8  ;;  %v14506_v46 = vld [vmem:[%s14056_s5 + $0x10] sm:$0xff] (!%p12410_p1)  ;;  %v13851_v48 = vmov (!%p12410_p1), 1983009808  }
 0x2f5   : > { %5844 = sbr.rel (%p12410_p1) target bundleno = 1342 (0x53e), region = 60  ;;  %v6384_v41 = vld [vmem:[%s14048_s25] sm:$0xff] (!%p12410_p1)  ;;  %v12412_v42 = vcombine.high (!%p12410_p1), %v7776_v37, %v7776_v37  ;;  %v12411_v43 = vcombine.low (!%p12410_p1), %v7776_v37, %v7776_v37  ;;  %v12414_v44 = vcombine.high (!%p12410_p1), %v7777_v38, %v7777_v38  ;;  %v12413_v45 = vcombine.low (!%p12410_p1), %v7777_v38, %v7777_v38  ;;  %v6385_v58 = vld [vmem:[%s14048_s25 + $0x8] sm:$0xff] (!%p12410_p1)  ;;  %v6386_v30 = vld [vmem:[%s14048_s25 + $0x10] sm:$0xff] (!%p12410_p1) }
 0x2f6   : > { %v14508_v47 = vand.u32 (!%p12410_p1), 127, %v5845_v39  ;;  %v6476_v49 = vunpack.c.l.s4 (!%p12410_p1), %v13851_v48  ;;  %v6479_v50 = vshrl.u32 (!%p12410_p1), %v5845_v39, 7  ;;  %v14511_v51 = vld [vmem:[%s14056_s5 + $0x18] sm:$0xff] (!%p12410_p1)  ;;  %v6474_v52 = vcombine.high (!%p12410_p1), %v6384_v41, %v6384_v41  ;;  %v14557_v19 = vld [vmem:[%s14056_s5 + $0x20] sm:$0xff] (!%p12410_p1)  ;;  %v14560_v20 = vld [vmem:[%s14056_s5 + $0x28] sm:$0xff] (!%p12410_p1) }
 0x2f7   : > { %8493 = vmatprep.subr.bf16.mxu0 (!%p12410_p1), %v12412_v42  ;;  %8533 = vmatprep.subr.bf16.mxu1 (!%p12410_p1), %v12414_v44  ;;  %v12416_v53 = vcombine.high (!%p12410_p1), %v14506_v46, %v14506_v46  ;;  %v12418_v60 = vcombine.high (!%p12410_p1), %v14511_v51, %v14511_v51  ;;  %v6491_v5 = vcombine.high (!%p12410_p1), %v6385_v58, %v6385_v58  ;;  %v14618_v48 = vld [vmem:[%s14056_s5 + $0x30] sm:$0xff] (!%p12410_p1) }
 0x2f8   : > { %8494 = vmatpush1.bf16.xpose.msra.mxu0 (!%p12410_p1), %v12411_v43  ;;  %8534 = vmatpush1.bf16.xpose.msra.mxu1 (!%p12410_p1), %v12413_v45  ;;  %v5847_v54 = vadd.s32 (!%p12410_p1), 128, %v14508_v47  ;;  %v6477_v55 = vunpack.c.0.s8 (!%p12410_p1), %v6476_v49  ;;  %v5849_v56 = vadd.s32 (!%p12410_p1), 384, %v14508_v47  ;;  %v6026_v57 = vadd.s32 (!%p12410_p1), %v14502_v40, %v14508_v47 }
 0x2f9   : > { %8573 = vmatprep.subr.bf16.mxu0 (!%p12410_p1), %v12416_v53  ;;  %v5848_v59 = vadd.s32 (!%p12410_p1), 256, %v14508_v47  ;;  %v5851_v61 = vadd.s32 (!%p12410_p1), 640, %v14508_v47  ;;  %v5853_v62 = vadd.s32 (!%p12410_p1), 896, %v14508_v47  ;;  %8613 = vmatprep.subr.bf16.mxu1 (!%p12410_p1), %v12418_v60  ;;  %v12415_v8 = vcombine.low (!%p12410_p1), %v14506_v46, %v14506_v46 }
 0x2fa   : > { %v6027_v63 = vadd.s32 (!%p12410_p1), %v14502_v40, %v5847_v54  ;;  %v14526_v0 = vsub.s32 (!%p12410_p1), %v6477_v55, %v6479_v50  ;;  %v6029_v1 = vadd.s32 (!%p12410_p1), %v14502_v40, %v5849_v56  ;;  %vm6205_vm4 = vcmp.lt.s32.totalorder (!%p12410_p1), %v6026_v57, 91200  ;;  %v14631_v54 = vld [vmem:[%s14056_s5 + $0x38] sm:$0xff] (!%p12410_p1)  ;;  %v6387_v55 = vld [vmem:[%s14048_s25 + $0x18] sm:$0xff] (!%p12410_p1) }
 0x2fb   : > { %v6028_v2 = vadd.s32 (!%p12410_p1), %v14502_v40, %v5848_v59  ;;  %v6031_v3 = vadd.s32 (!%p12410_p1), %v14502_v40, %v5851_v61  ;;  %v6033_v4 = vadd.s32 (!%p12410_p1), %v14502_v40, %v5853_v62  ;;  %vm14536_vm7 = vmpackc.low (!%p12410_p1), %vm6205_vm4, %vm6205_vm4  ;;  %v12417_v24 = vcombine.low (!%p12410_p1), %v14511_v51, %v14511_v51  ;;  %v7787_v50 = vld [vmem:[%s14056_s5 + $0x58] sm:$0xff] (!%p12410_p1) }
 0x2fc   : > { %vm6206_vm5 = vcmp.lt.s32.totalorder %v6027_v63, 91200  ;;  %v6481_v6 = vrot.slane %v6384_v41, %v14526_v0  ;;  %vm6208_vm6 = vcmp.lt.s32.totalorder %v6029_v1, 91200  ;;  %v6488_v7 = vrot.slane %v6474_v52, %v14526_v0 }
 0x2fd   : > { %vm6207_vm8 = vcmp.lt.s32.totalorder %v6028_v2, 91200  ;;  %v14541_v10 = vrot.slane %v6385_v58, %v14526_v0  ;;  %vm14543_vm9 = vmpackc.low %vm6206_vm5, %vm6206_vm5  ;;  %vm6210_vm10 = vcmp.lt.s32.totalorder %v6031_v3, 91200  ;;  %vm6212_vm11 = vcmp.lt.s32.totalorder %v6033_v4, 91200 }
 0x2fe   : > { %v6489_v11 = vcombine.high %v6481_v6, %v6481_v6  ;;  %v6490_v13 = vcombine.high %v6488_v7, %v6488_v7  ;;  %v12594_v14 = vpack.c.bf16 %v6481_v6, %v6481_v6  ;;  %vm14547_vm12 = vmpackc.low %vm6208_vm6, %vm6208_vm6  ;;  %v12600_v16 = vpack.c.bf16 %v6488_v7, %v6488_v7 }
 0x2ff   : > { %v6506_v17 = vcombine.high %v14541_v10, %v14541_v10  ;;  %v14554_v18 = vrot.slane %v6491_v5, %v14526_v0  ;;  %vm14564_vm13 = vmpackc.low %vm6207_vm8, %vm6207_vm8  ;;  %v5850_v25 = vadd.s32 512, %v14508_v47  ;;  %v5852_v29 = vadd.s32 768, %v14508_v47 }
 0x300   : > { %v12591_v21 = vpack.c.bf16 %v6489_v11, %v6489_v11  ;;  %v12597_v22 = vpack.c.bf16 %v6490_v13, %v6490_v13  ;;  %vm14571_vm14 = vmpackc.low %vm6210_vm10, %vm6210_vm10  ;;  %v12420_v32 = vcombine.high %v14557_v19, %v14557_v19  ;;  %v12422_v34 = vcombine.high %v14560_v20, %v14560_v20 }
 0x301   : > { %v12603_v27 = vpack.c.bf16 %v6506_v17, %v6506_v17  ;;  %v6507_v28 = vcombine.high %v14554_v18, %v14554_v18  ;;  %vm14585_vm15 = vmpackc.low %vm6212_vm11, %vm6212_vm11  ;;  %v6030_v33 = vadd.s32 %v14502_v40, %v5850_v25  ;;  %v5855_v35 = vadd.s32 1152, %v14508_v47 }
 0x302   : > { %12592 = vmatprep.mubr.msk.bf16.mxu0 %vm14543_vm9, %v12591_v21  ;;  %12598 = vmatprep.mubr.msk.bf16.mxu1 %vm14547_vm12, %v12597_v22  ;;  %v6032_v37 = vadd.s32 %v14502_v40, %v5852_v29  ;;  %v14601_v38 = vrot.slane %v6386_v30, %v14526_v0  ;;  %v5857_v39 = vadd.s32 1408, %v14508_v47  ;;  %v6508_v42 = vcombine.high %v6386_v30, %v6386_v30  ;;  %v7784_v21 = vld [vmem:[%s14056_s5 + $0x40] sm:$0xff]  ;;  %v7785_v22 = vld [vmem:[%s14056_s5 + $0x48] sm:$0xff] }
 0x303   : > { %12595 = vmatmul.mubr.msk.bf16.vlgmr.msra.gmra.mrb[0].mxu0 %vm14536_vm7, %v12594_v14  ;;  %12601 = vmatmul.mubr.msk.bf16.vlgmr.msra.gmra.mrb[0].mxu1 %vm14564_vm13, %v12600_v16  ;;  %v12609_v36 = vpack.c.bf16 %v6507_v28, %v6507_v28  ;;  %vm6209_vm0 = vcmp.lt.s32.totalorder %v6030_v33, 91200  ;;  %v6035_v41 = vadd.s32 %v14502_v40, %v5855_v35  ;;  %v12419_v45 = vcombine.low %v14557_v19, %v14557_v19  ;;  %v6388_v16 = vld [vmem:[%s14048_s25 + $0x20] sm:$0xff] }
 0x304   : > { %8574 = vmatpush1.bf16.xpose.msra.mxu0 %v12415_v8  ;;  %8614 = vmatpush1.bf16.xpose.msra.mxu1 %v12417_v24  ;;  %vm6211_vm1 = vcmp.lt.s32.totalorder %v6032_v37, 91200  ;;  %v6523_v43 = vcombine.high %v14601_v38, %v14601_v38  ;;  %v6037_v44 = vadd.s32 %v14502_v40, %v5857_v39  ;;  %v14615_v46 = vrot.slane %v6508_v42, %v14526_v0  ;;  %vm14621_vm3 = vmpackc.low %vm6209_vm0, %vm6209_vm0  ;;  %v6389_v37 = vld [vmem:[%s14048_s25 + $0x28] sm:$0xff] }
 0x305   : > { %12604 = vmatprep.mubr.msk.bf16.mxu0 %vm14571_vm14, %v12603_v27  ;;  %12610 = vmatprep.mubr.msk.bf16.mxu1 %vm14585_vm15, %v12609_v36  ;;  %vm6214_vm2 = vcmp.lt.s32.totalorder %v6035_v41, 91200  ;;  %v5854_v49 = vadd.s32 1024, %v14508_v47  ;;  %v12606_v51 = vpack.c.bf16 %v14541_v10, %v14541_v10  ;;  %v12612_v52 = vpack.c.bf16 %v14554_v18, %v14554_v18  ;;  %vm14636_vm5 = vmpackc.low %vm6211_vm1, %vm6211_vm1  ;;  %v6391_v27 = vld [vmem:[%s14048_s25 + $0x38] sm:$0xff] }
 0x306   : > { %8653 = vmatprep.subr.bf16.mxu0 %v12420_v32  ;;  %8693 = vmatprep.subr.bf16.mxu1 %v12422_v34  ;;  %vm6216_vm4 = vcmp.lt.s32.totalorder %v6037_v44, 91200  ;;  %v5856_v53 = vadd.s32 1280, %v14508_v47  ;;  %v12421_v57 = vcombine.low %v14560_v20, %v14560_v20  ;;  %v12615_v58 = vpack.c.bf16 %v6523_v43, %v6523_v43  ;;  %vm14647_vm6 = vmpackc.low %vm6214_vm2, %vm6214_vm2 }
 0x307   : > { %v6524_v59 = vcombine.high %v14615_v46, %v14615_v46  ;;  %v6034_v60 = vadd.s32 %v14502_v40, %v5854_v49  ;;  %v5859_v63 = vadd.s32 1664, %v14508_v47  ;;  %v14654_v1 = vrot.slane %v6387_v55, %v14526_v0  ;;  %vm14657_vm7 = vmpackc.low %vm6216_vm4, %vm6216_vm4  ;;  %v7786_v49 = vld [vmem:[%s14056_s5 + $0x50] sm:$0xff] }
 0x308   : > { %v6036_v62 = vadd.s32 %v14502_v40, %v5856_v53  ;;  %v5861_v2 = vadd.s32 1920, %v14508_v47  ;;  %v12424_v5 = vcombine.high %v14618_v48, %v14618_v48  ;;  %v12426_v6 = vcombine.high %v14631_v54, %v14631_v54 }
 0x309   : > { %v12621_v4 = vpack.c.bf16 %v6524_v59, %v6524_v59  ;;  %v6525_v7 = vcombine.high %v6387_v55, %v6387_v55  ;;  %v6039_v8 = vadd.s32 %v14502_v40, %v5859_v63  ;;  %vm6213_vm8 = vcmp.lt.s32.totalorder %v6034_v60, 91200 }
 0x30a   : > { %v6041_v9 = vadd.s32 %v14502_v40, %v5861_v2  ;;  %v6540_v10 = vcombine.high %v14654_v1, %v14654_v1  ;;  %v5858_v12 = vadd.s32 1536, %v14508_v47  ;;  %vm6215_vm9 = vcmp.lt.s32.totalorder %v6036_v62, 91200  ;;  %vm14688_vm11 = vmpackc.low %vm6213_vm8, %vm6213_vm8 }
 0x30b   : > { %12607 = vmatmul.mubr.msk.bf16.vlgmr.msra.gmra.mrb[4].mxu0 %vm14621_vm3, %v12606_v51  ;;  %12613 = vmatmul.mubr.msk.bf16.vlgmr.msra.gmra.mrb[4].mxu1 %vm14636_vm5, %v12612_v52  ;;  %v14674_v11 = vrot.slane %v6525_v7, %v14526_v0  ;;  %v5860_v13 = vadd.s32 1792, %v14508_v47  ;;  %vm6218_vm10 = vcmp.lt.s32.totalorder %v6039_v8, 91200  ;;  %v5863_v15 = vadd.s32 2176, %v14508_v47  ;;  %vm12623_vm13 = vmpackc.low %vm6215_vm9, %vm6215_vm9 }
 0x30c   : > { %8654 = vmatpush1.bf16.xpose.msra.mxu0 %v12419_v45  ;;  %8694 = vmatpush1.bf16.xpose.msra.mxu1 %v12421_v57  ;;  %v12423_v17 = vcombine.low %v14618_v48, %v14618_v48  ;;  %v12618_v19 = vpack.c.bf16 %v14601_v38, %v14601_v38  ;;  %v12624_v20 = vpack.c.bf16 %v14615_v46, %v14615_v46  ;;  %vm6220_vm12 = vcmp.lt.s32.totalorder %v6041_v9, 91200  ;;  %vm14704_vm14 = vmpackc.low %vm6218_vm10, %vm6218_vm10 }
 0x30d   : > { %12616 = vmatprep.mubr.msk.bf16.mxu0 %vm14647_vm6, %v12615_v58  ;;  %12622 = vmatprep.mubr.msk.bf16.mxu1 %vm14657_vm7, %v12621_v4  ;;  %v6541_v14 = vcombine.high %v14674_v11, %v14674_v11  ;;  %v12425_v23 = vcombine.low %v14631_v54, %v14631_v54  ;;  %v12627_v24 = vpack.c.bf16 %v6540_v10, %v6540_v10  ;;  %v5865_v26 = vadd.s32 2432, %v14508_v47  ;;  %vm12632_vm15 = vmpackc.low %vm6220_vm12, %vm6220_vm12 }
 0x30e   : > { %8733 = vmatprep.subr.bf16.mxu0 %v12424_v5  ;;  %8773 = vmatprep.subr.bf16.mxu1 %v12426_v6  ;;  %v6038_v25 = vadd.s32 %v14502_v40, %v5858_v12  ;;  %v6040_v29 = vadd.s32 %v14502_v40, %v5860_v13  ;;  %v14710_v30 = vrot.slane %v6388_v16, %v14526_v0  ;;  %v5862_v38 = vadd.s32 2048, %v14508_v47  ;;  %v7788_v12 = vld [vmem:[%s14056_s5 + $0x60] sm:$0xff]  ;;  %v7789_v13 = vld [vmem:[%s14056_s5 + $0x68] sm:$0xff] }
 0x30f   : > { %v12633_v28 = vpack.c.bf16 %v6541_v14, %v6541_v14  ;;  %v6542_v31 = vcombine.high %v6388_v16, %v6388_v16  ;;  %v12428_v32 = vcombine.high %v7784_v21, %v7784_v21  ;;  %v12430_v33 = vcombine.high %v7785_v22, %v7785_v22 }
 0x310   : > { %v6043_v34 = vadd.s32 %v14502_v40, %v5863_v15  ;;  %v6045_v35 = vadd.s32 %v14502_v40, %v5865_v26  ;;  %vm6217_vm0 = vcmp.lt.s32.totalorder %v6038_v25, 91200  ;;  %vm6219_vm1 = vcmp.lt.s32.totalorder %v6040_v29, 91200 }
 0x311   : > { %v14717_v36 = vrot.slane %v6542_v31, %v14526_v0  ;;  %v6557_v39 = vcombine.high %v14710_v30, %v14710_v30  ;;  %v5864_v42 = vadd.s32 2304, %v14508_v47  ;;  %v5867_v43 = vadd.s32 2688, %v14508_v47  ;;  %vm14729_vm3 = vmpackc.low %vm6217_vm0, %vm6217_vm0 }
 0x312   : > { %vm6222_vm2 = vcmp.lt.s32.totalorder %v6043_v34, 91200  ;;  %v6559_v44 = vcombine.high %v6389_v37, %v6389_v37  ;;  %v12630_v46 = vpack.c.bf16 %v14654_v1, %v14654_v1  ;;  %v12636_v48 = vpack.c.bf16 %v14674_v11, %v14674_v11  ;;  %vm12635_vm5 = vmpackc.low %vm6219_vm1, %vm6219_vm1  ;;  %v6390_v1 = vld [vmem:[%s14048_s25 + $0x30] sm:$0xff] }
 0x313   : > { %12619 = vmatmul.mubr.msk.bf16.vlgmr.msra.gmra.mrb[8].mxu0 %vm14688_vm11, %v12618_v19  ;;  %12625 = vmatmul.mubr.msk.bf16.vlgmr.msra.gmra.mrb[8].mxu1 %vm12623_vm13, %v12624_v20  ;;  %v6558_v41 = vcombine.high %v14717_v36, %v14717_v36  ;;  %vm6224_vm4 = vcmp.lt.s32.totalorder %v6045_v35, 91200  ;;  %v5869_v51 = vadd.s32 2944, %v14508_v47  ;;  %v12427_v52 = vcombine.low %v7784_v21, %v7784_v21  ;;  %vm14746_vm6 = vmpackc.low %vm6222_vm2, %vm6222_vm2 }
 0x314   : > { %8734 = vmatpush1.bf16.xpose.msra.mxu0 %v12423_v17  ;;  %8774 = vmatpush1.bf16.xpose.msra.mxu1 %v12425_v23  ;;  %v12429_v53 = vcombine.low %v7785_v22, %v7785_v22  ;;  %v6042_v54 = vadd.s32 %v14502_v40, %v5862_v38  ;;  %v14744_v55 = vrot.slane %v6389_v37, %v14526_v0  ;;  %vm12644_vm7 = vmpackc.low %vm6224_vm4, %vm6224_vm4  ;;  %v5866_v4 = vadd.s32 2560, %v14508_v47  ;;  %v7790_v38 = vld [vmem:[%s14056_s5 + $0x70] sm:$0xff] }
 0x315   : > { %12628 = vmatprep.mubr.msk.bf16.mxu0 %vm14704_vm14, %v12627_v24  ;;  %12634 = vmatprep.mubr.msk.bf16.mxu1 %vm12632_vm15, %v12633_v28  ;;  %v12639_v57 = vpack.c.bf16 %v6557_v39, %v6557_v39  ;;  %v12645_v58 = vpack.c.bf16 %v6558_v41, %v6558_v41  ;;  %v6044_v59 = vadd.s32 %v14502_v40, %v5864_v42  ;;  %v5868_v6 = vadd.s32 2816, %v14508_v47  ;;  %v7791_v39 = vld [vmem:[%s14056_s5 + $0x78] sm:$0xff] }
 0x316   : > { %8813 = vmatprep.subr.bf16.mxu0 %v12428_v32  ;;  %8853 = vmatprep.subr.bf16.mxu1 %v12430_v33  ;;  %v14752_v60 = vrot.slane %v6559_v44, %v14526_v0  ;;  %v12432_v61 = vcombine.high %v7786_v49, %v7786_v49  ;;  %v12434_v62 = vcombine.high %v7787_v50, %v7787_v50  ;;  %vm6221_vm8 = vcmp.lt.s32.totalorder %v6042_v54, 91200 }
 0x317   : > { %v6047_v63 = vadd.s32 %v14502_v40, %v5867_v43  ;;  %v6049_v2 = vadd.s32 %v14502_v40, %v5869_v51  ;;  %v6574_v3 = vcombine.high %v14744_v55, %v14744_v55  ;;  %vm6223_vm9 = vcmp.lt.s32.totalorder %v6044_v59, 91200  ;;  %vm14768_vm11 = vmpackc.low %vm6221_vm8, %vm6221_vm8 }
 0x318   : > { %v6575_v5 = vcombine.high %v14752_v60, %v14752_v60  ;;  %v6576_v7 = vcombine.high %v6390_v1, %v6390_v1  ;;  %v5871_v8 = vadd.s32 3200, %v14508_v47  ;;  %v12642_v10 = vpack.c.bf16 %v14710_v30, %v14710_v30  ;;  %vm12647_vm13 = vmpackc.low %vm6223_vm9, %vm6223_vm9 }
 0x319   : > { %vm6226_vm10 = vcmp.lt.s32.totalorder %v6047_v63, 91200  ;;  %v12648_v11 = vpack.c.bf16 %v14717_v36, %v14717_v36  ;;  %vm6228_vm12 = vcmp.lt.s32.totalorder %v6049_v2, 91200  ;;  %v5873_v14 = vadd.s32 3456, %v14508_v47 }
 0x31a   : > { %v12431_v15 = vcombine.low %v7786_v49, %v7786_v49  ;;  %v12433_v16 = vcombine.low %v7787_v50, %v7787_v50  ;;  %v12651_v17 = vpack.c.bf16 %v6574_v3, %v6574_v3  ;;  %v6046_v18 = vadd.s32 %v14502_v40, %v5866_v4  ;;  %vm14782_vm14 = vmpackc.low %vm6226_vm10, %vm6226_vm10  ;;  %v7792_v3 = vld [vmem:[%s14056_s5 + $0x80] sm:$0xff]  ;;  %v7793_v4 = vld [vmem:[%s14056_s5 + $0x88] sm:$0xff] }
 0x31b   : > { %12631 = vmatmul.mubr.msk.bf16.vlgmr.msra.gmra.mrb[12].mxu0 %vm14729_vm3, %v12630_v46  ;;  %12637 = vmatmul.mubr.msk.bf16.vlgmr.msra.gmra.mrb[12].mxu1 %vm12635_vm5, %v12636_v48  ;;  %v12657_v20 = vpack.c.bf16 %v6575_v5, %v6575_v5  ;;  %v6048_v21 = vadd.s32 %v14502_v40, %v5868_v6  ;;  %v14788_v22 = vrot.slane %v6390_v1, %v14526_v0  ;;  %vm12656_vm15 = vmpackc.low %vm6228_vm12, %vm6228_vm12  ;;  %v5870_v29 = vadd.s32 3072, %v14508_v47 }
 0x31c   : > { %8814 = vmatpush1.bf16.xpose.msra.mxu0 %v12427_v52  ;;  %8854 = vmatpush1.bf16.xpose.msra.mxu1 %v12429_v53  ;;  %v14791_v23 = vrot.slane %v6576_v7, %v14526_v0  ;;  %v12436_v24 = vcombine.high %v7788_v12, %v7788_v12  ;;  %v12438_v25 = vcombine.high %v7789_v13, %v7789_v13  ;;  %vm6225_vm0 = vcmp.lt.s32.totalorder %v6046_v18, 91200  ;;  %v6393_v18 = vld [vmem:[%s14048_s25 + $0x48] sm:$0xff] }
 0x31d   : > { %12640 = vmatprep.mubr.msk.bf16.mxu0 %vm14746_vm6, %v12639_v57  ;;  %12646 = vmatprep.mubr.msk.bf16.mxu1 %vm12644_vm7, %v12645_v58  ;;  %v6051_v26 = vadd.s32 %v14502_v40, %v5871_v8  ;;  %v6053_v28 = vadd.s32 %v14502_v40, %v5873_v14  ;;  %v5872_v30 = vadd.s32 3328, %v14508_v47  ;;  %vm6227_vm1 = vcmp.lt.s32.totalorder %v6048_v21, 91200  ;;  %vm14807_vm3 = vmpackc.low %vm6225_vm0, %vm6225_vm0 }
 0x31e   : > { %8893 = vmatprep.subr.bf16.mxu0 %v12432_v61  ;;  %8933 = vmatprep.subr.bf16.mxu1 %v12434_v62  ;;  %v6591_v31 = vcombine.high %v14788_v22, %v14788_v22  ;;  %v6592_v32 = vcombine.high %v14791_v23, %v14791_v23  ;;  %v6593_v33 = vcombine.high %v6391_v27, %v6391_v27  ;;  %v5875_v34 = vadd.s32 3712, %v14508_v47  ;;  %vm12659_vm5 = vmpackc.low %vm6227_vm1, %vm6227_vm1 }
 0x31f   : > { %vm6230_vm2 = vcmp.lt.s32.totalorder %v6051_v26, 91200  ;;  %v12654_v36 = vpack.c.bf16 %v14744_v55, %v14744_v55  ;;  %v12660_v37 = vpack.c.bf16 %v14752_v60, %v14752_v60  ;;  %vm6232_vm4 = vcmp.lt.s32.totalorder %v6053_v28, 91200  ;;  %v6392_v55 = vld [vmem:[%s14048_s25 + $0x40] sm:$0xff] }
 0x320   : > { %v5877_v41 = vadd.s32 3968, %v14508_v47  ;;  %v12435_v42 = vcombine.low %v7788_v12, %v7788_v12  ;;  %v12437_v43 = vcombine.low %v7789_v13, %v7789_v13  ;;  %v6050_v44 = vadd.s32 %v14502_v40, %v5870_v29  ;;  %vm14822_vm6 = vmpackc.low %vm6230_vm2, %vm6230_vm2  ;;  %v7794_v29 = vld [vmem:[%s14056_s5 + $0x90] sm:$0xff] }
 0x321   : > { %v6052_v45 = vadd.s32 %v14502_v40, %v5872_v30  ;;  %v12663_v48 = vpack.c.bf16 %v6591_v31, %v6591_v31  ;;  %v12669_v49 = vpack.c.bf16 %v6592_v32, %v6592_v32  ;;  %v14827_v50 = vrot.slane %v6391_v27, %v14526_v0  ;;  %vm12668_vm7 = vmpackc.low %vm6232_vm4, %vm6232_vm4  ;;  %v7795_v30 = vld [vmem:[%s14056_s5 + $0x98] sm:$0xff] }
 0x322   : > { %v14830_v51 = vrot.slane %v6593_v33, %v14526_v0  ;;  %v12440_v52 = vcombine.high %v7790_v38, %v7790_v38  ;;  %v12442_v53 = vcombine.high %v7791_v39, %v7791_v39  ;;  %v6055_v54 = vadd.s32 %v14502_v40, %v5875_v34 }
 0x323   : > { %12643 = vmatmul.mubr.msk.bf16.vlgmr.msra.gmra.mrb[16].mxu0 %vm14768_vm11, %v12642_v10  ;;  %12649 = vmatmul.mubr.msk.bf16.vlgmr.msra.gmra.mrb[16].mxu1 %vm12647_vm13, %v12648_v11  ;;  %v6057_v56 = vadd.s32 %v14502_v40, %v5877_v41  ;;  %vm6229_vm8 = vcmp.lt.s32.totalorder %v6050_v44, 91200  ;;  %vm6231_vm9 = vcmp.lt.s32.totalorder %v6052_v45, 91200  ;;  %v5874_v57 = vadd.s32 3584, %v14508_v47  ;;  %v6394_v45 = vld [vmem:[%s14048_s25 + $0x50] sm:$0xff] }
 0x324   : > { %8894 = vmatpush1.bf16.xpose.msra.mxu0 %v12431_v15  ;;  %8934 = vmatpush1.bf16.xpose.msra.mxu1 %v12433_v16  ;;  %v6608_v58 = vcombine.high %v14827_v50, %v14827_v50  ;;  %v6609_v59 = vcombine.high %v14830_v51, %v14830_v51  ;;  %v5876_v60 = vadd.s32 3840, %v14508_v47  ;;  %v6610_v61 = vcombine.high %v6392_v55, %v6392_v55  ;;  %vm14846_vm11 = vmpackc.low %vm6229_vm8, %vm6229_vm8 }
 0x325   : > { %12652 = vmatprep.mubr.msk.bf16.mxu0 %vm14782_vm14, %v12651_v17  ;;  %12658 = vmatprep.mubr.msk.bf16.mxu1 %vm12656_vm15, %v12657_v20  ;;  %vm6234_vm10 = vcmp.lt.s32.totalorder %v6055_v54, 91200  ;;  %v5879_v62 = vadd.s32 4224, %v14508_v47  ;;  %v12666_v1 = vpack.c.bf16 %v14788_v22, %v14788_v22  ;;  %v12672_v2 = vpack.c.bf16 %v14791_v23, %v14791_v23  ;;  %vm12671_vm13 = vmpackc.low %vm6231_vm9, %vm6231_vm9 }
 0x326   : > { %8973 = vmatprep.subr.bf16.mxu0 %v12436_v24  ;;  %9013 = vmatprep.subr.bf16.mxu1 %v12438_v25  ;;  %vm6236_vm12 = vcmp.lt.s32.totalorder %v6057_v56, 91200  ;;  %v5881_v5 = vadd.s32 4480, %v14508_v47  ;;  %v12439_v6 = vcombine.low %v7790_v38, %v7790_v38  ;;  %v12441_v7 = vcombine.low %v7791_v39, %v7791_v39  ;;  %vm14863_vm14 = vmpackc.low %vm6234_vm10, %vm6234_vm10 }
 0x327   : > { %v6054_v8 = vadd.s32 %v14502_v40, %v5874_v57  ;;  %v14861_v9 = vrot.slane %v6392_v55, %v14526_v0  ;;  %v12675_v11 = vpack.c.bf16 %v6608_v58, %v6608_v58  ;;  %v12681_v12 = vpack.c.bf16 %v6609_v59, %v6609_v59  ;;  %vm12680_vm15 = vmpackc.low %vm6236_vm12, %vm6236_vm12  ;;  %v7796_v57 = vld [vmem:[%s14056_s5 + $0xa0] sm:$0xff]  ;;  %v7797_v58 = vld [vmem:[%s14056_s5 + $0xa8] sm:$0xff] }
 0x328   : > { %v6056_v13 = vadd.s32 %v14502_v40, %v5876_v60  ;;  %v14869_v14 = vrot.slane %v6610_v61, %v14526_v0  ;;  %v12444_v15 = vcombine.high %v7792_v3, %v7792_v3  ;;  %v12446_v16 = vcombine.high %v7793_v4, %v7793_v4 }
 0x329   : > { %v6059_v17 = vadd.s32 %v14502_v40, %v5879_v62  ;;  %v6061_v19 = vadd.s32 %v14502_v40, %v5881_v5  ;;  %vm6233_vm0 = vcmp.lt.s32.totalorder %v6054_v8, 91200  ;;  %v6625_v20 = vcombine.high %v14861_v9, %v14861_v9 }
 0x32a   : > { %v5878_v21 = vadd.s32 4096, %v14508_v47  ;;  %vm6235_vm1 = vcmp.lt.s32.totalorder %v6056_v13, 91200  ;;  %v6626_v22 = vcombine.high %v14869_v14, %v14869_v14  ;;  %v5880_v23 = vadd.s32 4352, %v14508_v47 }
 0x32b   : > { %12655 = vmatmul.mubr.msk.bf16.vlgmr.msra.gmra.mrb[20].mxu0 %vm14807_vm3, %v12654_v36  ;;  %12661 = vmatmul.mubr.msk.bf16.vlgmr.msra.gmra.mrb[20].mxu1 %vm12659_vm5, %v12660_v37  ;;  %v6627_v24 = vcombine.high %v6393_v18, %v6393_v18  ;;  %vm6238_vm2 = vcmp.lt.s32.totalorder %v6059_v17, 91200  ;;  %v5883_v25 = vadd.s32 4736, %v14508_v47  ;;  %vm14885_vm3 = vmpackc.low %vm6233_vm0, %vm6233_vm0  ;;  %v12678_v27 = vpack.c.bf16 %v14827_v50, %v14827_v50 }
 0x32c   : > { %8974 = vmatpush1.bf16.xpose.msra.mxu0 %v12435_v42  ;;  %9014 = vmatpush1.bf16.xpose.msra.mxu1 %v12437_v43  ;;  %v12684_v28 = vpack.c.bf16 %v14830_v51, %v14830_v51  ;;  %vm6240_vm4 = vcmp.lt.s32.totalorder %v6061_v19, 91200  ;;  %v5885_v31 = vadd.s32 4992, %v14508_v47  ;;  %v12443_v32 = vcombine.low %v7792_v3, %v7792_v3  ;;  %vm12683_vm5 = vmpackc.low %vm6235_vm1, %vm6235_vm1 }
 0x32d   : > { %12664 = vmatprep.mubr.msk.bf16.mxu0 %vm14822_vm6, %v12663_v48  ;;  %12670 = vmatprep.mubr.msk.bf16.mxu1 %vm12668_vm7, %v12669_v49  ;;  %v12445_v33 = vcombine.low %v7793_v4, %v7793_v4  ;;  %v12687_v34 = vpack.c.bf16 %v6625_v20, %v6625_v20  ;;  %v6058_v35 = vadd.s32 %v14502_v40, %v5878_v21  ;;  %vm14899_vm6 = vmpackc.low %vm6238_vm2, %vm6238_vm2  ;;  %v5882_v48 = vadd.s32 4608, %v14508_v47  ;;  %v7798_v20 = vld [vmem:[%s14056_s5 + $0xb0] sm:$0xff]  ;;  %v7799_v21 = vld [vmem:[%s14056_s5 + $0xb8] sm:$0xff] }
 0x32e   : > { %9053 = vmatprep.subr.bf16.mxu0 %v12440_v52  ;;  %9093 = vmatprep.subr.bf16.mxu1 %v12442_v53  ;;  %v12693_v37 = vpack.c.bf16 %v6626_v22, %v6626_v22  ;;  %v6060_v38 = vadd.s32 %v14502_v40, %v5880_v23  ;;  %v14905_v39 = vrot.slane %v6393_v18, %v14526_v0  ;;  %vm12692_vm7 = vmpackc.low %vm6240_vm4, %vm6240_vm4  ;;  %v5884_v49 = vadd.s32 4864, %v14508_v47 }
 0x32f   : > { %v14908_v41 = vrot.slane %v6627_v24, %v14526_v0  ;;  %v12448_v42 = vcombine.high %v7794_v29, %v7794_v29  ;;  %v12450_v43 = vcombine.high %v7795_v30, %v7795_v30  ;;  %v6063_v44 = vadd.s32 %v14502_v40, %v5883_v25 }
 0x330   : > { %v6065_v46 = vadd.s32 %v14502_v40, %v5885_v31  ;;  %vm6237_vm8 = vcmp.lt.s32.totalorder %v6058_v35, 91200  ;;  %vm6239_vm9 = vcmp.lt.s32.totalorder %v6060_v38, 91200  ;;  %v6642_v50 = vcombine.high %v14905_v39, %v14905_v39  ;;  %v6396_v35 = vld [vmem:[%s14048_s25 + $0x60] sm:$0xff] }
 0x331   : > { %v6643_v51 = vcombine.high %v14908_v41, %v14908_v41  ;;  %v6644_v52 = vcombine.high %v6394_v45, %v6394_v45  ;;  %vm6242_vm10 = vcmp.lt.s32.totalorder %v6063_v44, 91200  ;;  %v5887_v53 = vadd.s32 5248, %v14508_v47 }
 0x332   : > { %v12690_v55 = vpack.c.bf16 %v14861_v9, %v14861_v9  ;;  %v12696_v56 = vpack.c.bf16 %v14869_v14, %v14869_v14  ;;  %vm6244_vm12 = vcmp.lt.s32.totalorder %v6065_v46, 91200  ;;  %v5889_v59 = vadd.s32 5504, %v14508_v47  ;;  %v6395_v9 = vld [vmem:[%s14048_s25 + $0x58] sm:$0xff] }
 0x333   : > { %12667 = vmatmul.mubr.msk.bf16.vlgmr.msra.gmra.mrb[24].mxu0 %vm14846_vm11, %v12666_v1  ;;  %12673 = vmatmul.mubr.msk.bf16.vlgmr.msra.gmra.mrb[24].mxu1 %vm12671_vm13, %v12672_v2  ;;  %vm14924_vm11 = vmpackc.low %vm6237_vm8, %vm6237_vm8  ;;  %v12447_v60 = vcombine.low %v7794_v29, %v7794_v29  ;;  %v12449_v61 = vcombine.low %v7795_v30, %v7795_v30  ;;  %v6062_v62 = vadd.s32 %v14502_v40, %v5882_v48  ;;  %v5888_v14 = vadd.s32 5376, %v14508_v47  ;;  %v7800_v48 = vld [vmem:[%s14056_s5 + $0xc0] sm:$0xff] }
 0x334   : > { %9054 = vmatpush1.bf16.xpose.msra.mxu0 %v12439_v6  ;;  %9094 = vmatpush1.bf16.xpose.msra.mxu1 %v12441_v7  ;;  %vm12695_vm13 = vmpackc.low %vm6239_vm9, %vm6239_vm9  ;;  %v6064_v63 = vadd.s32 %v14502_v40, %v5884_v49  ;;  %v12699_v2 = vpack.c.bf16 %v6642_v50, %v6642_v50  ;;  %v12705_v3 = vpack.c.bf16 %v6643_v51, %v6643_v51  ;;  %v5893_v22 = vadd.s32 6016, %v14508_v47  ;;  %v7801_v49 = vld [vmem:[%s14056_s5 + $0xc8] sm:$0xff] }
 0x335   : > { %12676 = vmatprep.mubr.msk.bf16.mxu0 %vm14863_vm14, %v12675_v11  ;;  %12682 = vmatprep.mubr.msk.bf16.mxu1 %vm12680_vm15, %v12681_v12  ;;  %vm14939_vm14 = vmpackc.low %vm6242_vm10, %vm6242_vm10  ;;  %v14944_v4 = vrot.slane %v6394_v45, %v14526_v0  ;;  %v14947_v5 = vrot.slane %v6644_v52, %v14526_v0  ;;  %v12452_v6 = vcombine.high %v7796_v57, %v7796_v57  ;;  %vm6241_vm0 = vcmp.lt.s32.totalorder %v6062_v62, 91200 }
 0x336   : > { %9133 = vmatprep.subr.bf16.mxu0 %v12444_v15  ;;  %9173 = vmatprep.subr.bf16.mxu1 %v12446_v16  ;;  %vm12704_vm15 = vmpackc.low %vm6244_vm12, %vm6244_vm12  ;;  %v12454_v7 = vcombine.high %v7797_v58, %v7797_v58  ;;  %v6067_v8 = vadd.s32 %v14502_v40, %v5887_v53  ;;  %v6069_v10 = vadd.s32 %v14502_v40, %v5889_v59  ;;  %vm6243_vm1 = vcmp.lt.s32.totalorder %v6064_v63, 91200  ;;  %v6397_v63 = vld [vmem:[%s14048_s25 + $0x68] sm:$0xff] }
 0x337   : > { %v5886_v11 = vadd.s32 5120, %v14508_v47  ;;  %v6659_v12 = vcombine.high %v14944_v4, %v14944_v4  ;;  %v6660_v13 = vcombine.high %v14947_v5, %v14947_v5  ;;  %v6661_v15 = vcombine.high %v6395_v9, %v6395_v9 }
 0x338   : > { %vm6246_vm2 = vcmp.lt.s32.totalorder %v6067_v8, 91200  ;;  %v5891_v16 = vadd.s32 5760, %v14508_v47  ;;  %v12702_v18 = vpack.c.bf16 %v14905_v39, %v14905_v39  ;;  %v12708_v19 = vpack.c.bf16 %v14908_v41, %v14908_v41 }
 0x339   : > { %vm6248_vm4 = vcmp.lt.s32.totalorder %v6069_v10, 91200  ;;  %v12451_v23 = vcombine.low %v7796_v57, %v7796_v57  ;;  %v12453_v24 = vcombine.low %v7797_v58, %v7797_v58  ;;  %v6066_v25 = vadd.s32 %v14502_v40, %v5886_v11  ;;  %v7802_v11 = vld [vmem:[%s14056_s5 + $0xd0] sm:$0xff] }
 0x33a   : > { %v14978_v26 = vrot.slane %v6395_v9, %v14526_v0  ;;  %v12717_v29 = vpack.c.bf16 %v6660_v13, %v6660_v13  ;;  %v6068_v30 = vadd.s32 %v14502_v40, %v5888_v14  ;;  %v14986_v31 = vrot.slane %v6661_v15, %v14526_v0 }
 0x33b   : > { %12679 = vmatmul.mubr.msk.bf16.vlgmr.msra.gmra.mrb[28].mxu0 %vm14885_vm3, %v12678_v27  ;;  %12685 = vmatmul.mubr.msk.bf16.vlgmr.msra.gmra.mrb[28].mxu1 %vm12683_vm5, %v12684_v28  ;;  %vm14963_vm3 = vmpackc.low %vm6241_vm0, %vm6241_vm0  ;;  %v12711_v28 = vpack.c.bf16 %v6659_v12, %v6659_v12  ;;  %v6073_v36 = vadd.s32 %v14502_v40, %v5893_v22  ;;  %vm6245_vm8 = vcmp.lt.s32.totalorder %v6066_v25, 91200  ;;  %v5890_v38 = vadd.s32 5632, %v14508_v47  ;;  %v7803_v12 = vld [vmem:[%s14056_s5 + $0xd8] sm:$0xff] }
 0x33c   : > { %9134 = vmatpush1.bf16.xpose.msra.mxu0 %v12443_v32  ;;  %9174 = vmatpush1.bf16.xpose.msra.mxu1 %v12445_v33  ;;  %vm12707_vm5 = vmpackc.low %vm6243_vm1, %vm6243_vm1  ;;  %v12456_v32 = vcombine.high %v7798_v20, %v7798_v20  ;;  %v12458_v33 = vcombine.high %v7799_v21, %v7799_v21  ;;  %vm6247_vm9 = vcmp.lt.s32.totalorder %v6068_v30, 91200  ;;  %v6677_v39 = vcombine.high %v14986_v31, %v14986_v31 }
 0x33d   : > { %12688 = vmatprep.mubr.msk.bf16.mxu0 %vm14899_vm6, %v12687_v34  ;;  %12694 = vmatprep.mubr.msk.bf16.mxu1 %vm12692_vm7, %v12693_v37  ;;  %vm14980_vm6 = vmpackc.low %vm6246_vm2, %vm6246_vm2  ;;  %v6071_v34 = vadd.s32 %v14502_v40, %v5891_v16  ;;  %v6676_v37 = vcombine.high %v14978_v26, %v14978_v26  ;;  %v5892_v41 = vadd.s32 5888, %v14508_v47  ;;  %v12714_v45 = vpack.c.bf16 %v14944_v4, %v14944_v4 }
 0x33e   : > { %9213 = vmatprep.subr.bf16.mxu0 %v12448_v42  ;;  %9253 = vmatprep.subr.bf16.mxu1 %v12450_v43  ;;  %vm12716_vm7 = vmpackc.low %vm6248_vm4, %vm6248_vm4  ;;  %v6678_v42 = vcombine.high %v6396_v35, %v6396_v35  ;;  %v5895_v43 = vadd.s32 6272, %v14508_v47  ;;  %v12720_v46 = vpack.c.bf16 %v14947_v5, %v14947_v5  ;;  %vm6252_vm12 = vcmp.lt.s32.totalorder %v6073_v36, 91200 }
 0x33f   : > { %vm6250_vm10 = vcmp.lt.s32.totalorder %v6071_v34, 91200  ;;  %v5897_v50 = vadd.s32 6528, %v14508_v47  ;;  %v12455_v51 = vcombine.low %v7798_v20, %v7798_v20  ;;  %v12457_v52 = vcombine.low %v7799_v21, %v7799_v21 }
 0x340   : > { %v12723_v53 = vpack.c.bf16 %v6676_v37, %v6676_v37  ;;  %v6070_v54 = vadd.s32 %v14502_v40, %v5890_v38  ;;  %v6072_v57 = vadd.s32 %v14502_v40, %v5892_v41  ;;  %v15022_v58 = vrot.slane %v6396_v35, %v14526_v0  ;;  %v7804_v37 = vld [vmem:[%s14056_s5 + $0xe0] sm:$0xff]  ;;  %v7805_v38 = vld [vmem:[%s14056_s5 + $0xe8] sm:$0xff] }
 0x341   : > { %v15025_v59 = vrot.slane %v6678_v42, %v14526_v0  ;;  %v6075_v62 = vadd.s32 %v14502_v40, %v5895_v43  ;;  %v6077_v1 = vadd.s32 %v14502_v40, %v5897_v50  ;;  %v12726_v9 = vpack.c.bf16 %v14978_v26, %v14978_v26  ;;  %v6398_v26 = vld [vmem:[%s14048_s25 + $0x70] sm:$0xff] }
 0x342   : > { %vm6249_vm0 = vcmp.lt.s32.totalorder %v6070_v54, 91200  ;;  %vm6251_vm1 = vcmp.lt.s32.totalorder %v6072_v57, 91200  ;;  %v6693_v4 = vcombine.high %v15022_v58, %v15022_v58  ;;  %v12732_v10 = vpack.c.bf16 %v14986_v31, %v14986_v31  ;;  %v6399_v54 = vld [vmem:[%s14048_s25 + $0x78] sm:$0xff] }
 0x343   : > { %12691 = vmatmul.mubr.msk.bf16.vlgmr.msra.gmra.mrb[32].mxu0 %vm14924_vm11, %v12690_v55  ;;  %12697 = vmatmul.mubr.msk.bf16.vlgmr.msra.gmra.mrb[32].mxu1 %vm12695_vm13, %v12696_v56  ;;  %vm15002_vm11 = vmpackc.low %vm6245_vm8, %vm6245_vm8  ;;  %v12729_v56 = vpack.c.bf16 %v6677_v39, %v6677_v39  ;;  %v6694_v5 = vcombine.high %v15025_v59, %v15025_v59  ;;  %vm6254_vm2 = vcmp.lt.s32.totalorder %v6075_v62, 91200  ;;  %vm6256_vm4 = vcmp.lt.s32.totalorder %v6077_v1, 91200 }
 0x344   : > { %9214 = vmatpush1.bf16.xpose.msra.mxu0 %v12447_v60  ;;  %9254 = vmatpush1.bf16.xpose.msra.mxu1 %v12449_v61  ;;  %vm12719_vm13 = vmpackc.low %vm6247_vm9, %vm6247_vm9  ;;  %v12460_v60 = vcombine.high %v7800_v48, %v7800_v48  ;;  %v12462_v61 = vcombine.high %v7801_v49, %v7801_v49  ;;  %v5901_v13 = vadd.s32 7040, %v14508_v47  ;;  %v12459_v14 = vcombine.low %v7800_v48, %v7800_v48 }
 0x345   : > { %12700 = vmatprep.mubr.msk.bf16.mxu0 %vm14939_vm14, %v12699_v2  ;;  %12706 = vmatprep.mubr.msk.bf16.mxu1 %vm12704_vm15, %v12705_v3  ;;  %vm15016_vm14 = vmpackc.low %vm6250_vm10, %vm6250_vm10  ;;  %v5894_v2 = vadd.s32 6144, %v14508_v47  ;;  %v5896_v3 = vadd.s32 6400, %v14508_v47  ;;  %v12461_v15 = vcombine.low %v7801_v49, %v7801_v49  ;;  %v12741_v20 = vpack.c.bf16 %v6694_v5, %v6694_v5 }
 0x346   : > { %9293 = vmatprep.subr.bf16.mxu0 %v12452_v6  ;;  %9333 = vmatprep.subr.bf16.mxu1 %v12454_v7  ;;  %vm12728_vm15 = vmpackc.low %vm6252_vm12, %vm6252_vm12  ;;  %v6695_v6 = vcombine.high %v6397_v63, %v6397_v63  ;;  %v5899_v7 = vadd.s32 6784, %v14508_v47  ;;  %v15061_v21 = vrot.slane %v6397_v63, %v14526_v0  ;;  %v6081_v27 = vadd.s32 %v14502_v40, %v5901_v13 }
 0x347   : > { %v6074_v16 = vadd.s32 %v14502_v40, %v5894_v2  ;;  %v6076_v17 = vadd.s32 %v14502_v40, %v5896_v3  ;;  %v5900_v31 = vadd.s32 6912, %v14508_v47  ;;  %v12738_v35 = vpack.c.bf16 %v15022_v58, %v15022_v58  ;;  %v7806_v2 = vld [vmem:[%s14056_s5 + $0xf0] sm:$0xff]  ;;  %v7807_v3 = vld [vmem:[%s14056_s5 + $0xf8] sm:$0xff] }
 0x348   : > { %v15064_v22 = vrot.slane %v6695_v6, %v14526_v0  ;;  %v6079_v25 = vadd.s32 %v14502_v40, %v5899_v7  ;;  %v12744_v36 = vpack.c.bf16 %v15025_v59, %v15025_v59  ;;  %vm6260_vm12 = vcmp.lt.s32.totalorder %v6081_v27, 91200 }
 0x349   : > { %vm6253_vm8 = vcmp.lt.s32.totalorder %v6074_v16, 91200  ;;  %vm6255_vm9 = vcmp.lt.s32.totalorder %v6076_v17, 91200  ;;  %v5905_v39 = vadd.s32 7552, %v14508_v47  ;;  %v12463_v41 = vcombine.low %v7802_v11, %v7802_v11  ;;  %v6400_v17 = vld [vmem:[%s14048_s25 + $0x80] sm:$0xff] }
 0x34a   : > { %v6711_v30 = vcombine.high %v15064_v22, %v15064_v22  ;;  %vm6258_vm10 = vcmp.lt.s32.totalorder %v6079_v25, 91200  ;;  %v12465_v42 = vcombine.low %v7803_v12, %v7803_v12  ;;  %v15095_v44 = vrot.slane %v6398_v26, %v14526_v0 }
 0x34b   : > { %12703 = vmatmul.mubr.msk.bf16.vlgmr.msra.gmra.mrb[36].mxu0 %vm14963_vm3, %v12702_v18  ;;  %12709 = vmatmul.mubr.msk.bf16.vlgmr.msra.gmra.mrb[36].mxu1 %vm12707_vm5, %v12708_v19  ;;  %vm15041_vm3 = vmpackc.low %vm6249_vm0, %vm6249_vm0  ;;  %v12735_v19 = vpack.c.bf16 %v6693_v4, %v6693_v4  ;;  %v6080_v49 = vadd.s32 %v14502_v40, %v5900_v31  ;;  %v6085_v55 = vadd.s32 %v14502_v40, %v5905_v39  ;;  %v5902_v57 = vadd.s32 7168, %v14508_v47 }
 0x34c   : > { %9294 = vmatpush1.bf16.xpose.msra.mxu0 %v12451_v23  ;;  %9334 = vmatpush1.bf16.xpose.msra.mxu1 %v12453_v24  ;;  %vm12731_vm5 = vmpackc.low %vm6251_vm1, %vm6251_vm1  ;;  %v12464_v23 = vcombine.high %v7802_v11, %v7802_v11  ;;  %v12466_v24 = vcombine.high %v7803_v12, %v7803_v12  ;;  %v12753_v48 = vpack.c.bf16 %v6711_v30, %v6711_v30  ;;  %v5904_v59 = vadd.s32 7424, %v14508_v47 }
 0x34d   : > { %12712 = vmatprep.mubr.msk.bf16.mxu0 %vm14980_vm6, %v12711_v28  ;;  %12718 = vmatprep.mubr.msk.bf16.mxu1 %vm12716_vm7, %v12717_v29  ;;  %vm15056_vm6 = vmpackc.low %vm6254_vm2, %vm6254_vm2  ;;  %v5898_v28 = vadd.s32 6656, %v14508_v47  ;;  %v6710_v29 = vcombine.high %v15061_v21, %v15061_v21  ;;  %vm6259_vm1 = vcmp.lt.s32.totalorder %v6080_v49, 91200  ;;  %v12750_v63 = vpack.c.bf16 %v15061_v21, %v15061_v21 }
 0x34e   : > { %9373 = vmatprep.subr.bf16.mxu0 %v12456_v32  ;;  %9413 = vmatprep.subr.bf16.mxu1 %v12458_v33  ;;  %vm12740_vm7 = vmpackc.low %vm6256_vm4, %vm6256_vm4  ;;  %v6712_v32 = vcombine.high %v6398_v26, %v6398_v26  ;;  %v5903_v33 = vadd.s32 7296, %v14508_v47  ;;  %v12756_v1 = vpack.c.bf16 %v15064_v22, %v15064_v22  ;;  %vm6264_vm4 = vcmp.lt.s32.totalorder %v6085_v55, 91200 }
 0x34f   : > { %v6078_v43 = vadd.s32 %v14502_v40, %v5898_v28  ;;  %v5909_v4 = vadd.s32 8064, %v14508_v47  ;;  %v12467_v5 = vcombine.low %v7804_v37, %v7804_v37  ;;  %v12469_v6 = vcombine.low %v7805_v38, %v7805_v38  ;;  %v7808_v28 = vld [vmem:[%s14056_s5 + $0x100] sm:$0xff] }
 0x350   : > { %v15103_v50 = vrot.slane %v6712_v32, %v14526_v0  ;;  %v6082_v8 = vadd.s32 %v14502_v40, %v5902_v57  ;;  %v6084_v11 = vadd.s32 %v14502_v40, %v5904_v59  ;;  %v15139_v12 = vrot.slane %v6399_v54, %v14526_v0  ;;  %v7811_v57 = vld [vmem:[%s14056_s5 + $0x118] sm:$0xff] }
 0x351   : > { %vm6257_vm0 = vcmp.lt.s32.totalorder %v6078_v43, 91200  ;;  %v6089_v18 = vadd.s32 %v14502_v40, %v5909_v4  ;;  %v12762_v26 = vpack.c.bf16 %v15095_v44, %v15095_v44  ;;  %v5913_v30 = vadd.s32 8576, %v14508_v47 }
 0x352   : > { %v6728_v58 = vcombine.high %v15103_v50, %v15103_v50  ;;  %v6744_v21 = vcombine.high %v15139_v12, %v15139_v12  ;;  %v12768_v27 = vpack.c.bf16 %v15103_v50, %v15103_v50  ;;  %v12471_v31 = vcombine.low %v7806_v2, %v7806_v2 }
 0x353   : > { %12715 = vmatmul.mubr.msk.bf16.vlgmr.msra.gmra.mrb[40].mxu0 %vm15002_vm11, %v12714_v45  ;;  %12721 = vmatmul.mubr.msk.bf16.vlgmr.msra.gmra.mrb[40].mxu1 %vm12719_vm13, %v12720_v46  ;;  %vm15080_vm11 = vmpackc.low %vm6253_vm8, %vm6253_vm8  ;;  %v12747_v46 = vpack.c.bf16 %v6710_v29, %v6710_v29  ;;  %vm6261_vm8 = vcmp.lt.s32.totalorder %v6082_v8, 91200  ;;  %v7809_v29 = vld [vmem:[%s14056_s5 + $0x108] sm:$0xff]  ;;  %v12473_v32 = vcombine.low %v7807_v3, %v7807_v3  ;;  %v6093_v45 = vadd.s32 %v14502_v40, %v5913_v30 }
 0x354   : > { %9374 = vmatpush1.bf16.xpose.msra.mxu0 %v12455_v51  ;;  %9414 = vmatpush1.bf16.xpose.msra.mxu1 %v12457_v52  ;;  %vm12743_vm13 = vmpackc.low %vm6255_vm9, %vm6255_vm9  ;;  %v12468_v51 = vcombine.high %v7804_v37, %v7804_v37  ;;  %v12470_v52 = vcombine.high %v7805_v38, %v7805_v38  ;;  %vm6263_vm9 = vcmp.lt.s32.totalorder %v6084_v11, 91200  ;;  %v15178_v38 = vrot.slane %v6400_v17, %v14526_v0  ;;  %v6402_v8 = vld [vmem:[%s14048_s25 + $0x90] sm:$0xff] }
 0x355   : > { %12724 = vmatprep.mubr.msk.bf16.mxu0 %vm15016_vm14, %v12723_v53  ;;  %12730 = vmatprep.mubr.msk.bf16.mxu1 %vm12728_vm15, %v12729_v56  ;;  %vm15097_vm14 = vmpackc.low %vm6258_vm10, %vm6258_vm10  ;;  %v6083_v53 = vadd.s32 %v14502_v40, %v5903_v33  ;;  %v6727_v56 = vcombine.high %v15095_v44, %v15095_v44  ;;  %v6401_v44 = vld [vmem:[%s14048_s25 + $0x88] sm:$0xff]  ;;  %v5912_v50 = vadd.s32 8448, %v14508_v47  ;;  %v12475_v59 = vcombine.low %v7808_v28, %v7808_v28 }
 0x356   : > { %9453 = vmatprep.subr.bf16.mxu0 %v12460_v60  ;;  %9493 = vmatprep.subr.bf16.mxu1 %v12462_v61  ;;  %vm12752_vm15 = vmpackc.low %vm6260_vm12, %vm6260_vm12  ;;  %v6729_v60 = vcombine.high %v6399_v54, %v6399_v54  ;;  %v5907_v61 = vadd.s32 7808, %v14508_v47  ;;  %vm6268_vm12 = vcmp.lt.s32.totalorder %v6089_v18, 91200  ;;  %v12774_v54 = vpack.c.bf16 %v15139_v12, %v15139_v12 }
 0x357   : > { %vm6262_vm2 = vcmp.lt.s32.totalorder %v6083_v53, 91200  ;;  %v12759_v7 = vpack.c.bf16 %v6727_v56, %v6727_v56  ;;  %v7810_v56 = vld [vmem:[%s14056_s5 + $0x110] sm:$0xff]  ;;  %v15212_v62 = vrot.slane %v6401_v44, %v14526_v0  ;;  %v5914_v11 = vadd.s32 8704, %v14508_v47 }
 0x358   : > { %v15142_v13 = vrot.slane %v6729_v60, %v14526_v0  ;;  %v6087_v16 = vadd.s32 %v14502_v40, %v5907_v61  ;;  %v12477_v60 = vcombine.low %v7809_v29, %v7809_v29 }
 0x359   : > { %v6094_v25 = vadd.s32 %v14502_v40, %v5914_v11  ;;  %v7817_v11 = vld [vmem:[%s14056_s5 + $0x148] sm:$0xff] }
 0x35a   : > { %v6745_v22 = vcombine.high %v15142_v13, %v15142_v13  ;;  %vm6266_vm10 = vcmp.lt.s32.totalorder %v6087_v16, 91200  ;;  %v12780_v55 = vpack.c.bf16 %v15142_v13, %v15142_v13  ;;  %v5916_v13 = vadd.s32 8960, %v14508_v47 }
 0x35b   : > { %12727 = vmatmul.mubr.msk.bf16.vlgmr.msra.gmra.mrb[44].mxu0 %vm15041_vm3, %v12726_v9  ;;  %12733 = vmatmul.mubr.msk.bf16.vlgmr.msra.gmra.mrb[44].mxu1 %vm12731_vm5, %v12732_v10  ;;  %vm15119_vm3 = vmpackc.low %vm6257_vm0, %vm6257_vm0  ;;  %v12765_v10 = vpack.c.bf16 %v6728_v58, %v6728_v58  ;;  %v5917_v58 = vadd.s32 9088, %v14508_v47 }
 0x35c   : > { %9454 = vmatpush1.bf16.xpose.msra.mxu0 %v12459_v14  ;;  %9494 = vmatpush1.bf16.xpose.msra.mxu1 %v12461_v15  ;;  %vm12755_vm5 = vmpackc.low %vm6259_vm1, %vm6259_vm1  ;;  %v12472_v14 = vcombine.high %v7806_v2, %v7806_v2  ;;  %v12474_v15 = vcombine.high %v7807_v3, %v7807_v3  ;;  %v12777_v37 = vpack.c.bf16 %v6745_v22, %v6745_v22 }
 0x35d   : > { %12736 = vmatprep.mubr.msk.bf16.mxu0 %vm15056_vm6, %v12735_v19  ;;  %12742 = vmatprep.mubr.msk.bf16.mxu1 %vm12740_vm7, %v12741_v20  ;;  %vm15133_vm6 = vmpackc.low %vm6262_vm2, %vm6262_vm2  ;;  %v5906_v19 = vadd.s32 7680, %v14508_v47  ;;  %v5908_v20 = vadd.s32 7936, %v14508_v47  ;;  %v6092_v3 = vadd.s32 %v14502_v40, %v5912_v50  ;;  %v6097_v9 = vadd.s32 %v14502_v40, %v5917_v58 }
 0x35e   : > { %9533 = vmatprep.subr.bf16.mxu0 %v12464_v23  ;;  %9573 = vmatprep.subr.bf16.mxu1 %v12466_v24  ;;  %vm12764_vm7 = vmpackc.low %vm6264_vm4, %vm6264_vm4  ;;  %v6746_v23 = vcombine.high %v6400_v17, %v6400_v17  ;;  %v5911_v24 = vadd.s32 8320, %v14508_v47  ;;  %vm6272_vm4 = vcmp.lt.s32.totalorder %v6093_v45, 91200  ;;  %v12786_v17 = vpack.c.bf16 %v15178_v38, %v15178_v38 }
 0x35f   : > { %v6086_v33 = vadd.s32 %v14502_v40, %v5906_v19  ;;  %v6088_v34 = vadd.s32 %v14502_v40, %v5908_v20  ;;  %v7812_v19 = vld [vmem:[%s14056_s5 + $0x120] sm:$0xff]  ;;  %v7813_v20 = vld [vmem:[%s14056_s5 + $0x128] sm:$0xff]  ;;  %v12479_v22 = vcombine.low %v7810_v56, %v7810_v56 }
 0x360   : > { %v15181_v39 = vrot.slane %v6746_v23, %v14526_v0  ;;  %v6091_v43 = vadd.s32 %v14502_v40, %v5911_v24  ;;  %v12481_v23 = vcombine.low %v7811_v57, %v7811_v57  ;;  %v12483_v50 = vcombine.low %v7812_v19, %v7812_v19 }
 0x361   : > { %vm6265_vm0 = vcmp.lt.s32.totalorder %v6086_v33, 91200  ;;  %vm6267_vm1 = vcmp.lt.s32.totalorder %v6088_v34, 91200  ;;  %v6403_v34 = vld [vmem:[%s14048_s25 + $0x98] sm:$0xff] }
 0x362   : > { %v6762_v49 = vcombine.high %v15181_v39, %v15181_v39  ;;  %vm6270_vm2 = vcmp.lt.s32.totalorder %v6091_v43, 91200  ;;  %v12792_v18 = vpack.c.bf16 %v15181_v39, %v15181_v39 }
 0x363   : > { %12739 = vmatmul.mubr.msk.bf16.vlgmr.msra.gmra.mrb[48].mxu0 %vm15080_vm11, %v12738_v35  ;;  %12745 = vmatmul.mubr.msk.bf16.vlgmr.msra.gmra.mrb[48].mxu1 %vm12743_vm13, %v12744_v36  ;;  %vm15158_vm11 = vmpackc.low %vm6261_vm8, %vm6261_vm8  ;;  %v12771_v36 = vpack.c.bf16 %v6744_v21, %v6744_v21  ;;  %v5921_v21 = vadd.s32 9600, %v14508_v47 }
 0x364   : > { %9534 = vmatpush1.bf16.xpose.msra.mxu0 %v12463_v41  ;;  %9574 = vmatpush1.bf16.xpose.msra.mxu1 %v12465_v42  ;;  %vm12767_vm13 = vmpackc.low %vm6263_vm9, %vm6263_vm9  ;;  %v12476_v41 = vcombine.high %v7808_v28, %v7808_v28  ;;  %v12478_v42 = vcombine.high %v7809_v29, %v7809_v29  ;;  %v12789_v2 = vpack.c.bf16 %v6762_v49, %v6762_v49  ;;  %vm6271_vm9 = vcmp.lt.s32.totalorder %v6092_v3, 91200 }
 0x365   : > { %12748 = vmatprep.mubr.msk.bf16.mxu0 %vm15097_vm14, %v12747_v46  ;;  %12754 = vmatprep.mubr.msk.bf16.mxu1 %vm12752_vm15, %v12753_v48  ;;  %vm15173_vm14 = vmpackc.low %vm6266_vm10, %vm6266_vm10  ;;  %v5910_v46 = vadd.s32 8192, %v14508_v47  ;;  %v6761_v48 = vcombine.high %v15178_v38, %v15178_v38  ;;  %v6096_v28 = vadd.s32 %v14502_v40, %v5916_v13  ;;  %v15256_v29 = vrot.slane %v6402_v8, %v14526_v0 }
 0x366   : > { %9613 = vmatprep.subr.bf16.mxu0 %v12468_v51  ;;  %9653 = vmatprep.subr.bf16.mxu1 %v12470_v52  ;;  %vm12776_vm15 = vmpackc.low %vm6268_vm12, %vm6268_vm12  ;;  %v6763_v51 = vcombine.high %v6401_v44, %v6401_v44  ;;  %v5915_v52 = vadd.s32 8832, %v14508_v47  ;;  %vm6276_vm12 = vcmp.lt.s32.totalorder %v6097_v9, 91200  ;;  %v6101_v35 = vadd.s32 %v14502_v40, %v5921_v21 }
 0x367   : > { %v6090_v61 = vadd.s32 %v14502_v40, %v5910_v46  ;;  %v6795_v38 = vcombine.high %v15256_v29, %v15256_v29  ;;  %v12798_v44 = vpack.c.bf16 %v15212_v62, %v15212_v62  ;;  %v7814_v46 = vld [vmem:[%s14056_s5 + $0x130] sm:$0xff]  ;;  %v5925_v49 = vadd.s32 10112, %v14508_v47 }
 0x368   : > { %v15220_v4 = vrot.slane %v6763_v51, %v14526_v0  ;;  %v12485_v51 = vcombine.low %v7813_v20, %v7813_v20  ;;  %v12487_v13 = vcombine.low %v7814_v46, %v7814_v46 }
 0x369   : > { %vm6269_vm8 = vcmp.lt.s32.totalorder %v6090_v61, 91200 }
 0x36a   : > { %v6779_v12 = vcombine.high %v15220_v4, %v15220_v4  ;;  %v12804_v45 = vpack.c.bf16 %v15220_v4, %v15220_v4  ;;  %v5924_v4 = vadd.s32 9984, %v14508_v47 }
 0x36b   : > { %12751 = vmatmul.mubr.msk.bf16.vlgmr.msra.gmra.mrb[52].mxu0 %vm15119_vm3, %v12750_v63  ;;  %12757 = vmatmul.mubr.msk.bf16.vlgmr.msra.gmra.mrb[52].mxu1 %vm12755_vm5, %v12756_v1  ;;  %vm15197_vm3 = vmpackc.low %vm6265_vm0, %vm6265_vm0  ;;  %v12783_v1 = vpack.c.bf16 %v6761_v48, %v6761_v48  ;;  %vm6273_vm0 = vcmp.lt.s32.totalorder %v6094_v25, 91200  ;;  %v7815_v48 = vld [vmem:[%s14056_s5 + $0x138] sm:$0xff]  ;;  %v6105_v63 = vadd.s32 %v14502_v40, %v5925_v49 }
 0x36c   : > { %9614 = vmatpush1.bf16.xpose.msra.mxu0 %v12467_v5  ;;  %9654 = vmatpush1.bf16.xpose.msra.mxu1 %v12469_v6  ;;  %vm12779_vm5 = vmpackc.low %vm6267_vm1, %vm6267_vm1  ;;  %v12480_v5 = vcombine.high %v7810_v56, %v7810_v56  ;;  %v12482_v6 = vcombine.high %v7811_v57, %v7811_v57  ;;  %vm6275_vm1 = vcmp.lt.s32.totalorder %v6096_v28, 91200  ;;  %v15295_v57 = vrot.slane %v6403_v34, %v14526_v0  ;;  %v6405_v25 = vld [vmem:[%s14048_s25 + $0xa8] sm:$0xff] }
 0x36d   : > { %12760 = vmatprep.mubr.msk.bf16.mxu0 %vm15133_vm6, %v12759_v7  ;;  %12766 = vmatprep.mubr.msk.bf16.mxu1 %vm12764_vm7, %v12765_v10  ;;  %vm15214_vm6 = vmpackc.low %vm6270_vm2, %vm6270_vm2  ;;  %v6095_v7 = vadd.s32 %v14502_v40, %v5915_v52  ;;  %v6778_v10 = vcombine.high %v15212_v62, %v15212_v62  ;;  %v6404_v62 = vld [vmem:[%s14048_s25 + $0xa0] sm:$0xff]  ;;  %v5926_v28 = vadd.s32 10240, %v14508_v47 }
 0x36e   : > { %9693 = vmatprep.subr.bf16.mxu0 %v12472_v14  ;;  %9733 = vmatprep.subr.bf16.mxu1 %v12474_v15  ;;  %vm12788_vm7 = vmpackc.low %vm6272_vm4, %vm6272_vm4  ;;  %v6780_v14 = vcombine.high %v6402_v8, %v6402_v8  ;;  %v5919_v15 = vadd.s32 9344, %v14508_v47  ;;  %vm6280_vm4 = vcmp.lt.s32.totalorder %v6101_v35, 91200  ;;  %v12810_v8 = vpack.c.bf16 %v15256_v29, %v15256_v29 }
 0x36f   : > { %vm6274_vm10 = vcmp.lt.s32.totalorder %v6095_v7, 91200  ;;  %v12795_v24 = vpack.c.bf16 %v6778_v10, %v6778_v10  ;;  %v7816_v10 = vld [vmem:[%s14056_s5 + $0x140] sm:$0xff]  ;;  %v15329_v16 = vrot.slane %v6404_v62, %v14526_v0  ;;  %v6106_v43 = vadd.s32 %v14502_v40, %v5926_v28  ;;  %v7823_v28 = vld [vmem:[%s14056_s5 + $0x178] sm:$0xff] }
 0x370   : > { %v15259_v30 = vrot.slane %v6780_v14, %v14526_v0  ;;  %v6099_v33 = vadd.s32 %v14502_v40, %v5919_v15  ;;  %v12489_v14 = vcombine.low %v7815_v48, %v7815_v48 }
 0x372   : > { %v6796_v39 = vcombine.high %v15259_v30, %v15259_v30  ;;  %vm6278_vm2 = vcmp.lt.s32.totalorder %v6099_v33, 91200  ;;  %v12816_v9 = vpack.c.bf16 %v15259_v30, %v15259_v30  ;;  %v5928_v30 = vadd.s32 10496, %v14508_v47 }
 0x373   : > { %12763 = vmatmul.mubr.msk.bf16.vlgmr.msra.gmra.mrb[56].mxu0 %vm15158_vm11, %v12762_v26  ;;  %12769 = vmatmul.mubr.msk.bf16.vlgmr.msra.gmra.mrb[56].mxu1 %vm12767_vm13, %v12768_v27  ;;  %vm15236_vm11 = vmpackc.low %vm6269_vm8, %vm6269_vm8  ;;  %v12801_v27 = vpack.c.bf16 %v6779_v12, %v6779_v12  ;;  %v5929_v12 = vadd.s32 10624, %v14508_v47 }
 0x374   : > { %9694 = vmatpush1.bf16.xpose.msra.mxu0 %v12471_v31  ;;  %9734 = vmatpush1.bf16.xpose.msra.mxu1 %v12473_v32  ;;  %vm12791_vm13 = vmpackc.low %vm6271_vm9, %vm6271_vm9  ;;  %v12484_v31 = vcombine.high %v7812_v19, %v7812_v19  ;;  %v12486_v32 = vcombine.high %v7813_v20, %v7813_v20  ;;  %v12813_v56 = vpack.c.bf16 %v6796_v39, %v6796_v39 }
 0x375   : > { %12772 = vmatprep.mubr.msk.bf16.mxu0 %vm15173_vm14, %v12771_v36  ;;  %12778 = vmatprep.mubr.msk.bf16.mxu1 %vm12776_vm15, %v12777_v37  ;;  %vm15250_vm14 = vmpackc.low %vm6274_vm10, %vm6274_vm10  ;;  %v5918_v36 = vadd.s32 9216, %v14508_v47  ;;  %v5920_v37 = vadd.s32 9472, %v14508_v47  ;;  %v6104_v20 = vadd.s32 %v14502_v40, %v5924_v4  ;;  %v6109_v26 = vadd.s32 %v14502_v40, %v5929_v12 }
 0x376   : > { %9773 = vmatprep.subr.bf16.mxu0 %v12476_v41  ;;  %9813 = vmatprep.subr.bf16.mxu1 %v12478_v42  ;;  %vm12800_vm15 = vmpackc.low %vm6276_vm12, %vm6276_vm12  ;;  %v6797_v41 = vcombine.high %v6403_v34, %v6403_v34  ;;  %v5923_v42 = vadd.s32 9856, %v14508_v47  ;;  %vm6284_vm12 = vcmp.lt.s32.totalorder %v6105_v63, 91200  ;;  %v12822_v34 = vpack.c.bf16 %v15295_v57, %v15295_v57 }
 0x377   : > { %v6098_v52 = vadd.s32 %v14502_v40, %v5918_v36  ;;  %v6100_v53 = vadd.s32 %v14502_v40, %v5920_v37  ;;  %v7818_v36 = vld [vmem:[%s14056_s5 + $0x150] sm:$0xff]  ;;  %v7819_v37 = vld [vmem:[%s14056_s5 + $0x158] sm:$0xff]  ;;  %v12491_v39 = vcombine.low %v7816_v10, %v7816_v10 }
 0x378   : > { %v15298_v58 = vrot.slane %v6797_v41, %v14526_v0  ;;  %v6103_v61 = vadd.s32 %v14502_v40, %v5923_v42  ;;  %v12493_v41 = vcombine.low %v7817_v11, %v7817_v11  ;;  %v12495_v4 = vcombine.low %v7818_v36, %v7818_v36 }
 0x379   : > { %vm6277_vm8 = vcmp.lt.s32.totalorder %v6098_v52, 91200  ;;  %vm6279_vm9 = vcmp.lt.s32.totalorder %v6100_v53, 91200  ;;  %v6406_v53 = vld [vmem:[%s14048_s25 + $0xb0] sm:$0xff] }
 0x37a   : > { %v6813_v3 = vcombine.high %v15298_v58, %v15298_v58  ;;  %vm6282_vm10 = vcmp.lt.s32.totalorder %v6103_v61, 91200  ;;  %v12828_v35 = vpack.c.bf16 %v15298_v58, %v15298_v58 }
 0x37b   : > { %12775 = vmatmul.mubr.msk.bf16.vlgmr.msra.gmra.mrb[60].mxu0 %vm15197_vm3, %v12774_v54  ;;  %12781 = vmatmul.mubr.msk.bf16.vlgmr.msra.gmra.mrb[60].mxu1 %vm12779_vm5, %v12780_v55  ;;  %vm15275_vm3 = vmpackc.low %vm6273_vm0, %vm6273_vm0  ;;  %v12807_v55 = vpack.c.bf16 %v6795_v38, %v6795_v38  ;;  %v5933_v38 = vadd.s32 11136, %v14508_v47 }
 0x37c   : > { %9774 = vmatpush1.bf16.xpose.msra.mxu0 %v12475_v59  ;;  %9814 = vmatpush1.bf16.xpose.msra.mxu1 %v12477_v60  ;;  %vm12803_vm5 = vmpackc.low %vm6275_vm1, %vm6275_vm1  ;;  %v12488_v59 = vcombine.high %v7814_v46, %v7814_v46  ;;  %v12490_v60 = vcombine.high %v7815_v48, %v7815_v48  ;;  %v12825_v19 = vpack.c.bf16 %v6813_v3, %v6813_v3  ;;  %vm6283_vm1 = vcmp.lt.s32.totalorder %v6104_v20, 91200 }
 0x37d   : > { %12784 = vmatprep.mubr.msk.bf16.mxu0 %vm15214_vm6, %v12783_v1  ;;  %12790 = vmatprep.mubr.msk.bf16.mxu1 %vm12788_vm7, %v12789_v2  ;;  %vm15290_vm6 = vmpackc.low %vm6278_vm2, %vm6278_vm2  ;;  %v5922_v1 = vadd.s32 9728, %v14508_v47  ;;  %v6812_v2 = vcombine.high %v15295_v57, %v15295_v57  ;;  %v6108_v46 = vadd.s32 %v14502_v40, %v5928_v30  ;;  %v15373_v48 = vrot.slane %v6405_v25, %v14526_v0 }
 0x37e   : > { %9853 = vmatprep.subr.bf16.mxu0 %v12480_v5  ;;  %9893 = vmatprep.subr.bf16.mxu1 %v12482_v6  ;;  %vm12812_vm7 = vmpackc.low %vm6280_vm4, %vm6280_vm4  ;;  %v6814_v5 = vcombine.high %v6404_v62, %v6404_v62  ;;  %v5927_v6 = vadd.s32 10368, %v14508_v47  ;;  %vm6288_vm4 = vcmp.lt.s32.totalorder %v6109_v26, 91200  ;;  %v6113_v54 = vadd.s32 %v14502_v40, %v5933_v38 }
 0x37f   : > { %v6102_v15 = vadd.s32 %v14502_v40, %v5922_v1  ;;  %v6846_v57 = vcombine.high %v15373_v48, %v15373_v48  ;;  %v12834_v62 = vpack.c.bf16 %v15329_v16, %v15329_v16  ;;  %v7820_v1 = vld [vmem:[%s14056_s5 + $0x160] sm:$0xff]  ;;  %v5937_v3 = vadd.s32 11648, %v14508_v47 }
 0x380   : > { %v15337_v21 = vrot.slane %v6814_v5, %v14526_v0  ;;  %v12497_v5 = vcombine.low %v7819_v37, %v7819_v37  ;;  %v12499_v30 = vcombine.low %v7820_v1, %v7820_v1 }
 0x381   : > { %vm6281_vm0 = vcmp.lt.s32.totalorder %v6102_v15, 91200 }
 0x382   : > { %v6830_v29 = vcombine.high %v15337_v21, %v15337_v21  ;;  %v12840_v63 = vpack.c.bf16 %v15337_v21, %v15337_v21  ;;  %v5936_v21 = vadd.s32 11520, %v14508_v47 }
 0x383   : > { %12787 = vmatmul.mubr.msk.bf16.vlgmr.msra.gmra.mrb[64].mxu0 %vm15236_vm11, %v12786_v17  ;;  %12793 = vmatmul.mubr.msk.bf16.vlgmr.msra.gmra.mrb[64].mxu1 %vm12791_vm13, %v12792_v18  ;;  %vm15314_vm11 = vmpackc.low %vm6277_vm8, %vm6277_vm8  ;;  %v12819_v18 = vpack.c.bf16 %v6812_v2, %v6812_v2  ;;  %vm6285_vm8 = vcmp.lt.s32.totalorder %v6106_v43, 91200  ;;  %v7821_v2 = vld [vmem:[%s14056_s5 + $0x168] sm:$0xff]  ;;  %v6117_v17 = vadd.s32 %v14502_v40, %v5937_v3 }
 0x384   : > { %9854 = vmatpush1.bf16.xpose.msra.mxu0 %v12479_v22  ;;  %9894 = vmatpush1.bf16.xpose.msra.mxu1 %v12481_v23  ;;  %vm12815_vm13 = vmpackc.low %vm6279_vm9, %vm6279_vm9  ;;  %v12492_v22 = vcombine.high %v7816_v10, %v7816_v10  ;;  %v12494_v23 = vcombine.high %v7817_v11, %v7817_v11  ;;  %vm6287_vm9 = vcmp.lt.s32.totalorder %v6108_v46, 91200  ;;  %v15412_v11 = vrot.slane %v6406_v53, %v14526_v0  ;;  %v6408_v43 = vld [vmem:[%s14048_s25 + $0xc0] sm:$0xff] }
 0x385   : > { %12796 = vmatprep.mubr.msk.bf16.mxu0 %vm15250_vm14, %v12795_v24  ;;  %12802 = vmatprep.mubr.msk.bf16.mxu1 %vm12800_vm15, %v12801_v27  ;;  %vm15331_vm14 = vmpackc.low %vm6282_vm10, %vm6282_vm10  ;;  %v6107_v24 = vadd.s32 %v14502_v40, %v5927_v6  ;;  %v6829_v27 = vcombine.high %v15329_v16, %v15329_v16  ;;  %v6407_v16 = vld [vmem:[%s14048_s25 + $0xb8] sm:$0xff]  ;;  %v5938_v46 = vadd.s32 11776, %v14508_v47 }
 0x386   : > { %9933 = vmatprep.subr.bf16.mxu0 %v12484_v31  ;;  %9973 = vmatprep.subr.bf16.mxu1 %v12486_v32  ;;  %vm12824_vm15 = vmpackc.low %vm6284_vm12, %vm6284_vm12  ;;  %v6831_v31 = vcombine.high %v6405_v25, %v6405_v25  ;;  %v5931_v32 = vadd.s32 10880, %v14508_v47  ;;  %vm6292_vm12 = vcmp.lt.s32.totalorder %v6113_v54, 91200  ;;  %v12846_v25 = vpack.c.bf16 %v15373_v48, %v15373_v48 }
 0x387   : > { %vm6286_vm2 = vcmp.lt.s32.totalorder %v6107_v24, 91200  ;;  %v12831_v42 = vpack.c.bf16 %v6829_v27, %v6829_v27  ;;  %v7822_v27 = vld [vmem:[%s14056_s5 + $0x170] sm:$0xff]  ;;  %v15446_v33 = vrot.slane %v6407_v16, %v14526_v0  ;;  %v6118_v61 = vadd.s32 %v14502_v40, %v5938_v46  ;;  %v7829_v46 = vld [vmem:[%s14056_s5 + $0x1a8] sm:$0xff] }
 0x388   : > { %v15376_v49 = vrot.slane %v6831_v31, %v14526_v0  ;;  %v6111_v52 = vadd.s32 %v14502_v40, %v5931_v32  ;;  %v12501_v31 = vcombine.low %v7821_v2, %v7821_v2 }
 0x38a   : > { %v6847_v58 = vcombine.high %v15376_v49, %v15376_v49  ;;  %vm6290_vm10 = vcmp.lt.s32.totalorder %v6111_v52, 91200  ;;  %v12852_v26 = vpack.c.bf16 %v15376_v49, %v15376_v49  ;;  %v5940_v49 = vadd.s32 12032, %v14508_v47 }
 0x38b   : > { %12799 = vmatmul.mubr.msk.bf16.vlgmr.msra.gmra.mrb[68].mxu0 %vm15275_vm3, %v12798_v44  ;;  %12805 = vmatmul.mubr.msk.bf16.vlgmr.msra.gmra.mrb[68].mxu1 %vm12803_vm5, %v12804_v45  ;;  %vm15353_vm3 = vmpackc.low %vm6281_vm0, %vm6281_vm0  ;;  %v12837_v45 = vpack.c.bf16 %v6830_v29, %v6830_v29  ;;  %v5941_v29 = vadd.s32 12160, %v14508_v47 }
 0x38c   : > { %9934 = vmatpush1.bf16.xpose.msra.mxu0 %v12483_v50  ;;  %9974 = vmatpush1.bf16.xpose.msra.mxu1 %v12485_v51  ;;  %vm12827_vm5 = vmpackc.low %vm6283_vm1, %vm6283_vm1  ;;  %v12496_v50 = vcombine.high %v7818_v36, %v7818_v36  ;;  %v12498_v51 = vcombine.high %v7819_v37, %v7819_v37  ;;  %v12849_v10 = vpack.c.bf16 %v6847_v58, %v6847_v58 }
 0x38d   : > { %12808 = vmatprep.mubr.msk.bf16.mxu0 %vm15290_vm6, %v12807_v55  ;;  %12814 = vmatprep.mubr.msk.bf16.mxu1 %vm12812_vm7, %v12813_v56  ;;  %vm15367_vm6 = vmpackc.low %vm6286_vm2, %vm6286_vm2  ;;  %v5930_v55 = vadd.s32 10752, %v14508_v47  ;;  %v5932_v56 = vadd.s32 11008, %v14508_v47  ;;  %v6116_v37 = vadd.s32 %v14502_v40, %v5936_v21  ;;  %v6121_v44 = vadd.s32 %v14502_v40, %v5941_v29 }
 0x38e   : > { %10013 = vmatprep.subr.bf16.mxu0 %v12488_v59  ;;  %10053 = vmatprep.subr.bf16.mxu1 %v12490_v60  ;;  %vm12836_vm7 = vmpackc.low %vm6288_vm4, %vm6288_vm4  ;;  %v6848_v59 = vcombine.high %v6406_v53, %v6406_v53  ;;  %v5935_v60 = vadd.s32 11392, %v14508_v47  ;;  %vm6296_vm4 = vcmp.lt.s32.totalorder %v6117_v17, 91200  ;;  %v12858_v53 = vpack.c.bf16 %v15412_v11, %v15412_v11 }
 0x38f   : > { %v6110_v6 = vadd.s32 %v14502_v40, %v5930_v55  ;;  %v6112_v7 = vadd.s32 %v14502_v40, %v5932_v56  ;;  %v7824_v55 = vld [vmem:[%s14056_s5 + $0x180] sm:$0xff]  ;;  %v7825_v56 = vld [vmem:[%s14056_s5 + $0x188] sm:$0xff]  ;;  %v12503_v58 = vcombine.low %v7822_v27, %v7822_v27 }
 0x390   : > { %v15415_v12 = vrot.slane %v6848_v59, %v14526_v0  ;;  %v6115_v15 = vadd.s32 %v14502_v40, %v5935_v60  ;;  %v12505_v59 = vcombine.low %v7823_v28, %v7823_v28  ;;  %v12507_v21 = vcombine.low %v7824_v55, %v7824_v55 }
 0x391   : > { %vm6289_vm0 = vcmp.lt.s32.totalorder %v6110_v6, 91200  ;;  %vm6291_vm1 = vcmp.lt.s32.totalorder %v6112_v7, 91200  ;;  %v6409_v7 = vld [vmem:[%s14048_s25 + $0xc8] sm:$0xff] }
 0x392   : > { %v6864_v20 = vcombine.high %v15415_v12, %v15415_v12  ;;  %vm6294_vm2 = vcmp.lt.s32.totalorder %v6115_v15, 91200  ;;  %v12864_v54 = vpack.c.bf16 %v15415_v12, %v15415_v12 }
 0x393   : > { %12811 = vmatmul.mubr.msk.bf16.vlgmr.msra.gmra.mrb[72].mxu0 %vm15314_vm11, %v12810_v8  ;;  %12817 = vmatmul.mubr.msk.bf16.vlgmr.msra.gmra.mrb[72].mxu1 %vm12815_vm13, %v12816_v9  ;;  %vm15392_vm11 = vmpackc.low %vm6285_vm8, %vm6285_vm8  ;;  %v12843_v9 = vpack.c.bf16 %v6846_v57, %v6846_v57  ;;  %v5945_v57 = vadd.s32 12672, %v14508_v47 }
 0x394   : > { %10014 = vmatpush1.bf16.xpose.msra.mxu0 %v12487_v13  ;;  %10054 = vmatpush1.bf16.xpose.msra.mxu1 %v12489_v14  ;;  %vm12839_vm13 = vmpackc.low %vm6287_vm9, %vm6287_vm9  ;;  %v12500_v13 = vcombine.high %v7820_v1, %v7820_v1  ;;  %v12502_v14 = vcombine.high %v7821_v2, %v7821_v2  ;;  %v12861_v36 = vpack.c.bf16 %v6864_v20, %v6864_v20  ;;  %vm6295_vm9 = vcmp.lt.s32.totalorder %v6116_v37, 91200 }
 0x395   : > { %12820 = vmatprep.mubr.msk.bf16.mxu0 %vm15331_vm14, %v12819_v18  ;;  %12826 = vmatprep.mubr.msk.bf16.mxu1 %vm12824_vm15, %v12825_v19  ;;  %vm15407_vm14 = vmpackc.low %vm6290_vm10, %vm6290_vm10  ;;  %v5934_v18 = vadd.s32 11264, %v14508_v47  ;;  %v6863_v19 = vcombine.high %v15412_v11, %v15412_v11  ;;  %v6120_v1 = vadd.s32 %v14502_v40, %v5940_v49  ;;  %v15490_v2 = vrot.slane %v6408_v43, %v14526_v0 }
 0x396   : > { %10093 = vmatprep.subr.bf16.mxu0 %v12492_v22  ;;  %10133 = vmatprep.subr.bf16.mxu1 %v12494_v23  ;;  %vm12848_vm15 = vmpackc.low %vm6292_vm12, %vm6292_vm12  ;;  %v6865_v22 = vcombine.high %v6407_v16, %v6407_v16  ;;  %v5939_v23 = vadd.s32 11904, %v14508_v47  ;;  %vm6300_vm12 = vcmp.lt.s32.totalorder %v6121_v44, 91200  ;;  %v6125_v8 = vadd.s32 %v14502_v40, %v5945_v57 }
 0x397   : > { %v6114_v32 = vadd.s32 %v14502_v40, %v5934_v18  ;;  %v6897_v11 = vcombine.high %v15490_v2, %v15490_v2  ;;  %v12870_v16 = vpack.c.bf16 %v15446_v33, %v15446_v33  ;;  %v7826_v18 = vld [vmem:[%s14056_s5 + $0x190] sm:$0xff]  ;;  %v5949_v20 = vadd.s32 13184, %v14508_v47 }
 0x398   : > { %v15454_v38 = vrot.slane %v6865_v22, %v14526_v0  ;;  %v12509_v22 = vcombine.low %v7825_v56, %v7825_v56  ;;  %v12511_v49 = vcombine.low %v7826_v18, %v7826_v18 }
 0x399   : > { %vm6293_vm8 = vcmp.lt.s32.totalorder %v6114_v32, 91200 }
 0x39a   : > { %v6881_v48 = vcombine.high %v15454_v38, %v15454_v38  ;;  %v12876_v17 = vpack.c.bf16 %v15454_v38, %v15454_v38  ;;  %v5948_v38 = vadd.s32 13056, %v14508_v47 }
 0x39b   : > { %12823 = vmatmul.mubr.msk.bf16.vlgmr.msra.gmra.mrb[76].mxu0 %vm15353_vm3, %v12822_v34  ;;  %12829 = vmatmul.mubr.msk.bf16.vlgmr.msra.gmra.mrb[76].mxu1 %vm12827_vm5, %v12828_v35  ;;  %vm15431_vm3 = vmpackc.low %vm6289_vm0, %vm6289_vm0  ;;  %v12855_v35 = vpack.c.bf16 %v6863_v19, %v6863_v19  ;;  %vm6297_vm0 = vcmp.lt.s32.totalorder %v6118_v61, 91200  ;;  %v7827_v19 = vld [vmem:[%s14056_s5 + $0x198] sm:$0xff]  ;;  %v6129_v34 = vadd.s32 %v14502_v40, %v5949_v20  ;;  %v6411_v61 = vld [vmem:[%s14048_s25 + $0xd8] sm:$0xff] }
 0x39c   : > { %10094 = vmatpush1.bf16.xpose.msra.mxu0 %v12491_v39  ;;  %10134 = vmatpush1.bf16.xpose.msra.mxu1 %v12493_v41  ;;  %vm12851_vm5 = vmpackc.low %vm6291_vm1, %vm6291_vm1  ;;  %v12504_v39 = vcombine.high %v7822_v27, %v7822_v27  ;;  %v12506_v41 = vcombine.high %v7823_v28, %v7823_v28  ;;  %vm6299_vm1 = vcmp.lt.s32.totalorder %v6120_v1, 91200  ;;  %v15529_v28 = vrot.slane %v6409_v7, %v14526_v0 }
 0x39d   : > { %12832 = vmatprep.mubr.msk.bf16.mxu0 %vm15367_vm6, %v12831_v42  ;;  %12838 = vmatprep.mubr.msk.bf16.mxu1 %vm12836_vm7, %v12837_v45  ;;  %vm15448_vm6 = vmpackc.low %vm6294_vm2, %vm6294_vm2  ;;  %v6119_v42 = vadd.s32 %v14502_v40, %v5939_v23  ;;  %v6880_v45 = vcombine.high %v15446_v33, %v15446_v33  ;;  %v6410_v33 = vld [vmem:[%s14048_s25 + $0xd0] sm:$0xff]  ;;  %v5950_v1 = vadd.s32 13312, %v14508_v47 }
 0x39e   : > { %10173 = vmatprep.subr.bf16.mxu0 %v12496_v50  ;;  %10213 = vmatprep.subr.bf16.mxu1 %v12498_v51  ;;  %vm12860_vm7 = vmpackc.low %vm6296_vm4, %vm6296_vm4  ;;  %v6882_v50 = vcombine.high %v6408_v43, %v6408_v43  ;;  %v5943_v51 = vadd.s32 12416, %v14508_v47  ;;  %vm6304_vm4 = vcmp.lt.s32.totalorder %v6125_v8, 91200  ;;  %v12882_v43 = vpack.c.bf16 %v15490_v2, %v15490_v2 }
 0x39f   : > { %vm6298_vm10 = vcmp.lt.s32.totalorder %v6119_v42, 91200  ;;  %v12867_v60 = vpack.c.bf16 %v6880_v45, %v6880_v45  ;;  %v7828_v45 = vld [vmem:[%s14056_s5 + $0x1a0] sm:$0xff]  ;;  %v15563_v52 = vrot.slane %v6410_v33, %v14526_v0  ;;  %v6130_v15 = vadd.s32 %v14502_v40, %v5950_v1 }
 0x3a0   : > { %v15493_v3 = vrot.slane %v6882_v50, %v14526_v0  ;;  %v6123_v6 = vadd.s32 %v14502_v40, %v5943_v51  ;;  %v12513_v50 = vcombine.low %v7827_v19, %v7827_v19 }
 0x3a2   : > { %v6898_v12 = vcombine.high %v15493_v3, %v15493_v3  ;;  %vm6302_vm2 = vcmp.lt.s32.totalorder %v6123_v6, 91200  ;;  %v12888_v44 = vpack.c.bf16 %v15493_v3, %v15493_v3  ;;  %v5952_v3 = vadd.s32 13568, %v14508_v47  ;;  %v15687_v6 = vld [vmem:[%s14056_s5 + $0x1d8] sm:$0xff] }
 0x3a3   : > { %12835 = vmatmul.mubr.msk.bf16.vlgmr.msra.gmra.mrb[80].mxu0 %vm15392_vm11, %v12834_v62  ;;  %12841 = vmatmul.mubr.msk.bf16.vlgmr.msra.gmra.mrb[80].mxu1 %vm12839_vm13, %v12840_v63  ;;  %vm15470_vm11 = vmpackc.low %vm6293_vm8, %vm6293_vm8  ;;  %v12873_v63 = vpack.c.bf16 %v6881_v48, %v6881_v48  ;;  %v5953_v48 = vadd.s32 13696, %v14508_v47 }
 0x3a4   : > { %10174 = vmatpush1.bf16.xpose.msra.mxu0 %v12495_v4  ;;  %10214 = vmatpush1.bf16.xpose.msra.mxu1 %v12497_v5  ;;  %vm12863_vm13 = vmpackc.low %vm6295_vm9, %vm6295_vm9  ;;  %v12508_v4 = vcombine.high %v7824_v55, %v7824_v55  ;;  %v12510_v5 = vcombine.high %v7825_v56, %v7825_v56  ;;  %v12885_v27 = vpack.c.bf16 %v6898_v12, %v6898_v12 }
 0x3a5   : > { %12844 = vmatprep.mubr.msk.bf16.mxu0 %vm15407_vm14, %v12843_v9  ;;  %12850 = vmatprep.mubr.msk.bf16.mxu1 %vm12848_vm15, %v12849_v10  ;;  %vm15484_vm14 = vmpackc.low %vm6298_vm10, %vm6298_vm10  ;;  %v5942_v9 = vadd.s32 12288, %v14508_v47  ;;  %v5944_v10 = vadd.s32 12544, %v14508_v47  ;;  %v6128_v56 = vadd.s32 %v14502_v40, %v5948_v38  ;;  %v6133_v62 = vadd.s32 %v14502_v40, %v5953_v48 }
 0x3a6   : > { %10253 = vmatprep.subr.bf16.mxu0 %v12500_v13  ;;  %10293 = vmatprep.subr.bf16.mxu1 %v12502_v14  ;;  %vm12872_vm15 = vmpackc.low %vm6300_vm12, %vm6300_vm12  ;;  %v6899_v13 = vcombine.high %v6409_v7, %v6409_v7  ;;  %v5947_v14 = vadd.s32 12928, %v14508_v47  ;;  %vm6308_vm12 = vcmp.lt.s32.totalorder %v6129_v34, 91200  ;;  %v12894_v7 = vpack.c.bf16 %v15529_v28, %v15529_v28 }
 0x3a7   : > { %v6122_v23 = vadd.s32 %v14502_v40, %v5942_v9  ;;  %v6124_v24 = vadd.s32 %v14502_v40, %v5944_v10  ;;  %v7830_v9 = vld [vmem:[%s14056_s5 + $0x1b0] sm:$0xff]  ;;  %v7831_v10 = vld [vmem:[%s14056_s5 + $0x1b8] sm:$0xff]  ;;  %v12515_v12 = vcombine.low %v7828_v45, %v7828_v45 }
 0x3a8   : > { %v15532_v29 = vrot.slane %v6899_v13, %v14526_v0  ;;  %v6127_v32 = vadd.s32 %v14502_v40, %v5947_v14  ;;  %v12517_v13 = vcombine.low %v7829_v46, %v7829_v46  ;;  %v12519_v38 = vcombine.low %v7830_v9, %v7830_v9 }
 0x3a9   : > { %vm6301_vm8 = vcmp.lt.s32.totalorder %v6122_v23, 91200  ;;  %vm6303_vm9 = vcmp.lt.s32.totalorder %v6124_v24, 91200  ;;  %v6412_v24 = vld [vmem:[%s14048_s25 + $0xe0] sm:$0xff] }
 0x3aa   : > { %v6915_v37 = vcombine.high %v15532_v29, %v15532_v29  ;;  %vm6306_vm10 = vcmp.lt.s32.totalorder %v6127_v32, 91200  ;;  %v12900_v8 = vpack.c.bf16 %v15532_v29, %v15532_v29 }
 0x3ab   : > { %12847 = vmatmul.mubr.msk.bf16.vlgmr.msra.gmra.mrb[84].mxu0 %vm15431_vm3, %v12846_v25  ;;  %12853 = vmatmul.mubr.msk.bf16.vlgmr.msra.gmra.mrb[84].mxu1 %vm12851_vm5, %v12852_v26  ;;  %vm15509_vm3 = vmpackc.low %vm6297_vm0, %vm6297_vm0  ;;  %v12879_v26 = vpack.c.bf16 %v6897_v11, %v6897_v11  ;;  %v5957_v11 = vadd.s32 14208, %v14508_v47 }
 0x3ac   : > { %10254 = vmatpush1.bf16.xpose.msra.mxu0 %v12499_v30  ;;  %10294 = vmatpush1.bf16.xpose.msra.mxu1 %v12501_v31  ;;  %vm12875_vm5 = vmpackc.low %vm6299_vm1, %vm6299_vm1  ;;  %v12512_v30 = vcombine.high %v7826_v18, %v7826_v18  ;;  %v12514_v31 = vcombine.high %v7827_v19, %v7827_v19  ;;  %v12897_v55 = vpack.c.bf16 %v6915_v37, %v6915_v37  ;;  %vm6307_vm1 = vcmp.lt.s32.totalorder %v6128_v56, 91200 }
 0x3ad   : > { %12856 = vmatprep.mubr.msk.bf16.mxu0 %vm15448_vm6, %v12855_v35  ;;  %12862 = vmatprep.mubr.msk.bf16.mxu1 %vm12860_vm7, %v12861_v36  ;;  %vm15524_vm6 = vmpackc.low %vm6302_vm2, %vm6302_vm2  ;;  %v5946_v35 = vadd.s32 12800, %v14508_v47  ;;  %v6914_v36 = vcombine.high %v15529_v28, %v15529_v28  ;;  %v6132_v18 = vadd.s32 %v14502_v40, %v5952_v3  ;;  %v15607_v19 = vrot.slane %v6411_v61, %v14526_v0 }
 0x3ae   : > { %10333 = vmatprep.subr.bf16.mxu0 %v12504_v39  ;;  %10373 = vmatprep.subr.bf16.mxu1 %v12506_v41  ;;  %vm12884_vm7 = vmpackc.low %vm6304_vm4, %vm6304_vm4  ;;  %v6916_v39 = vcombine.high %v6410_v33, %v6410_v33  ;;  %v5951_v41 = vadd.s32 13440, %v14508_v47  ;;  %vm6312_vm4 = vcmp.lt.s32.totalorder %v6133_v62, 91200  ;;  %v6137_v25 = vadd.s32 %v14502_v40, %v5957_v11 }
 0x3af   : > { %v6126_v51 = vadd.s32 %v14502_v40, %v5946_v35  ;;  %v6948_v28 = vcombine.high %v15607_v19, %v15607_v19  ;;  %v12906_v33 = vpack.c.bf16 %v15563_v52, %v15563_v52  ;;  %v15635_v35 = vld [vmem:[%s14056_s5 + $0x1c0] sm:$0xff]  ;;  %v5961_v37 = vadd.s32 14720, %v14508_v47 }
 0x3b0   : > { %v15571_v57 = vrot.slane %v6916_v39, %v14526_v0  ;;  %v12521_v39 = vcombine.low %v7831_v10, %v7831_v10  ;;  %v5963_v62 = vadd.s32 14976, %v14508_v47 }
 0x3b1   : > { %vm6305_vm0 = vcmp.lt.s32.totalorder %v6126_v51, 91200 }
 0x3b2   : > { %v6932_v2 = vcombine.high %v15571_v57, %v15571_v57  ;;  %v12912_v34 = vpack.c.bf16 %v15571_v57, %v15571_v57  ;;  %v5960_v57 = vadd.s32 14592, %v14508_v47 }
 0x3b3   : > { %12859 = vmatmul.mubr.msk.bf16.vlgmr.msra.gmra.mrb[88].mxu0 %vm15470_vm11, %v12858_v53  ;;  %12865 = vmatmul.mubr.msk.bf16.vlgmr.msra.gmra.mrb[88].mxu1 %vm12863_vm13, %v12864_v54  ;;  %vm15548_vm11 = vmpackc.low %vm6301_vm8, %vm6301_vm8  ;;  %v12891_v54 = vpack.c.bf16 %v6914_v36, %v6914_v36  ;;  %vm6309_vm8 = vcmp.lt.s32.totalorder %v6130_v15, 91200  ;;  %v15638_v36 = vld [vmem:[%s14056_s5 + $0x1c8] sm:$0xff]  ;;  %v6141_v53 = vadd.s32 %v14502_v40, %v5961_v37 }
 0x3b4   : > { %10334 = vmatpush1.bf16.xpose.msra.mxu0 %v12503_v58  ;;  %10374 = vmatpush1.bf16.xpose.msra.mxu1 %v12505_v59  ;;  %vm12887_vm13 = vmpackc.low %vm6303_vm9, %vm6303_vm9  ;;  %v12516_v58 = vcombine.high %v7828_v45, %v7828_v45  ;;  %v12518_v59 = vcombine.high %v7829_v46, %v7829_v46  ;;  %vm6311_vm9 = vcmp.lt.s32.totalorder %v6132_v18, 91200  ;;  %v15650_v46 = vrot.slane %v6412_v24, %v14526_v0 }
 0x3b5   : > { %12868 = vmatprep.mubr.msk.bf16.mxu0 %vm15484_vm14, %v12867_v60  ;;  %12874 = vmatprep.mubr.msk.bf16.mxu1 %vm12872_vm15, %v12873_v63  ;;  %vm15565_vm14 = vmpackc.low %vm6306_vm10, %vm6306_vm10  ;;  %v6131_v60 = vadd.s32 %v14502_v40, %v5951_v41  ;;  %v6931_v63 = vcombine.high %v15563_v52, %v15563_v52  ;;  %v6413_v52 = vld [vmem:[%s14048_s25 + $0xe8] sm:$0xff] }
 0x3b6   : > { %10413 = vmatprep.subr.bf16.mxu0 %v12508_v4  ;;  %10453 = vmatprep.subr.bf16.mxu1 %v12510_v5  ;;  %vm12896_vm15 = vmpackc.low %vm6308_vm12, %vm6308_vm12  ;;  %v6933_v4 = vcombine.high %v6411_v61, %v6411_v61  ;;  %v5955_v5 = vadd.s32 13952, %v14508_v47  ;;  %vm6316_vm12 = vcmp.lt.s32.totalorder %v6137_v25, 91200  ;;  %v12918_v61 = vpack.c.bf16 %v15607_v19, %v15607_v19  ;;  %v6414_v25 = vld [vmem:[%s14048_s25 + $0xf0] sm:$0xff] }
 0x3b7   : > { %vm6310_vm2 = vcmp.lt.s32.totalorder %v6131_v60, 91200  ;;  %v12903_v14 = vpack.c.bf16 %v6931_v63, %v6931_v63 }
 0x3b8   : > { %v15610_v20 = vrot.slane %v6933_v4, %v14526_v0  ;;  %v6135_v23 = vadd.s32 %v14502_v40, %v5955_v5  ;;  %v15684_v5 = vld [vmem:[%s14056_s5 + $0x1d0] sm:$0xff] }
 0x3ba   : > { %v6949_v29 = vcombine.high %v15610_v20, %v15610_v20  ;;  %vm6314_vm10 = vcmp.lt.s32.totalorder %v6135_v23, 91200  ;;  %v12924_v4 = vpack.c.bf16 %v15610_v20, %v15610_v20  ;;  %v6140_v20 = vadd.s32 %v14502_v40, %v5960_v57 }
 0x3bb   : > { %12871 = vmatmul.mubr.msk.bf16.vlgmr.msra.gmra.mrb[92].mxu0 %vm15509_vm3, %v12870_v16  ;;  %12877 = vmatmul.mubr.msk.bf16.vlgmr.msra.gmra.mrb[92].mxu1 %vm12875_vm5, %v12876_v17  ;;  %vm15587_vm3 = vmpackc.low %vm6305_vm0, %vm6305_vm0  ;;  %v12909_v17 = vpack.c.bf16 %v6932_v2, %v6932_v2  ;;  %v12530_v23 = vcombine.high %v15687_v6, %v15687_v6 }
 0x3bc   : > { %10414 = vmatpush1.bf16.xpose.msra.mxu0 %v12507_v21  ;;  %10454 = vmatpush1.bf16.xpose.msra.mxu1 %v12509_v22  ;;  %vm12899_vm5 = vmpackc.low %vm6307_vm1, %vm6307_vm1  ;;  %v12520_v21 = vcombine.high %v7830_v9, %v7830_v9  ;;  %v12522_v22 = vcombine.high %v7831_v10, %v7831_v10  ;;  %v12921_v45 = vpack.c.bf16 %v6949_v29, %v6949_v29 }
 0x3bd   : > { %12880 = vmatprep.mubr.msk.bf16.mxu0 %vm15524_vm6, %v12879_v26  ;;  %12886 = vmatprep.mubr.msk.bf16.mxu1 %vm12884_vm7, %v12885_v27  ;;  %vm15601_vm6 = vmpackc.low %vm6310_vm2, %vm6310_vm2  ;;  %v5954_v26 = vadd.s32 13824, %v14508_v47  ;;  %v5956_v27 = vadd.s32 14080, %v14508_v47  ;;  %v12523_v10 = vcombine.low %v15635_v35, %v15635_v35 }
 0x3be   : > { %10493 = vmatprep.subr.bf16.mxu0 %v12512_v30  ;;  %10533 = vmatprep.subr.bf16.mxu1 %v12514_v31  ;;  %vm12908_vm7 = vmpackc.low %vm6312_vm4, %vm6312_vm4  ;;  %v6950_v30 = vcombine.high %v6412_v24, %v6412_v24  ;;  %v5959_v31 = vadd.s32 14464, %v14508_v47  ;;  %vm6320_vm4 = vcmp.lt.s32.totalorder %v6141_v53, 91200  ;;  %v6143_v24 = vadd.s32 %v14502_v40, %v5963_v62 }
 0x3bf   : > { %v6134_v41 = vadd.s32 %v14502_v40, %v5954_v26  ;;  %v6136_v42 = vadd.s32 %v14502_v40, %v5956_v27  ;;  %v15765_v53 = vrot.slane %v6414_v25, %v14526_v0 }
 0x3c0   : > { %v15653_v48 = vrot.slane %v6950_v30, %v14526_v0  ;;  %v6139_v51 = vadd.s32 %v14502_v40, %v5959_v31  ;;  %v5964_v30 = vadd.s32 15104, %v14508_v47  ;;  %v6984_v31 = vcombine.high %v6414_v25, %v6414_v25 }
 0x3c1   : > { %vm6313_vm0 = vcmp.lt.s32.totalorder %v6134_v41, 91200  ;;  %vm6315_vm1 = vcmp.lt.s32.totalorder %v6136_v42, 91200  ;;  %v6999_v3 = vcombine.high %v15765_v53, %v15765_v53 }
 0x3c2   : > { %v6966_v56 = vcombine.high %v15653_v48, %v15653_v48  ;;  %vm6318_vm2 = vcmp.lt.s32.totalorder %v6139_v51, 91200  ;;  %v12936_v42 = vpack.c.bf16 %v15653_v48, %v15653_v48  ;;  %v12529_v51 = vcombine.low %v15687_v6, %v15687_v6 }
 0x3c3   : > { %12883 = vmatmul.mubr.msk.bf16.vlgmr.msra.gmra.mrb[96].mxu0 %vm15548_vm11, %v12882_v43  ;;  %12889 = vmatmul.mubr.msk.bf16.vlgmr.msra.gmra.mrb[96].mxu1 %vm12887_vm13, %v12888_v44  ;;  %vm15626_vm11 = vmpackc.low %vm6309_vm8, %vm6309_vm8  ;;  %v12915_v44 = vpack.c.bf16 %v6948_v28, %v6948_v28  ;;  %v5962_v28 = vadd.s32 14848, %v14508_v47  ;;  %v15749_v43 = vld [vmem:[%s14056_s5 + $0x1e0] sm:$0xff]  ;;  %v5968_v6 = vadd.s32 15616, %v14508_v47 }
 0x3c4   : > { %10494 = vmatpush1.bf16.xpose.msra.mxu0 %v12511_v49  ;;  %10534 = vmatpush1.bf16.xpose.msra.mxu1 %v12513_v50  ;;  %vm12911_vm13 = vmpackc.low %vm6311_vm9, %vm6311_vm9  ;;  %v12524_v49 = vcombine.high %v15635_v35, %v15635_v35  ;;  %v12526_v50 = vcombine.high %v15638_v36, %v15638_v36  ;;  %v12933_v19 = vpack.c.bf16 %v6966_v56, %v6966_v56  ;;  %vm6319_vm9 = vcmp.lt.s32.totalorder %v6140_v20, 91200 }
 0x3c5   : > { %12892 = vmatprep.mubr.msk.bf16.mxu0 %vm15565_vm14, %v12891_v54  ;;  %12898 = vmatprep.mubr.msk.bf16.mxu1 %vm12896_vm15, %v12897_v55  ;;  %vm15645_vm14 = vmpackc.low %vm6314_vm10, %vm6314_vm10  ;;  %v5958_v54 = vadd.s32 14336, %v14508_v47  ;;  %v6965_v55 = vcombine.high %v15650_v46, %v15650_v46  ;;  %v12930_v35 = vpack.c.bf16 %v15650_v46, %v15650_v46  ;;  %vm6322_vm10 = vcmp.lt.s32.totalorder %v6143_v24, 91200 }
 0x3c6   : > { %10573 = vmatprep.subr.bf16.mxu0 %v12516_v58  ;;  %10613 = vmatprep.subr.bf16.mxu1 %v12518_v59  ;;  %vm12920_vm15 = vmpackc.low %vm6316_vm12, %vm6316_vm12  ;;  %v6967_v58 = vcombine.high %v6413_v52, %v6413_v52  ;;  %v5973_v20 = vadd.s32 16256, %v14508_v47 }
 0x3c7   : > { %v12927_v18 = vpack.c.bf16 %v6965_v55, %v6965_v55 }
 0x3cb   : > { %12895 = vmatmul.mubr.msk.bf16.vlgmr.msra.gmra.mrb[100].mxu0 %vm15587_vm3, %v12894_v7  ;;  %12901 = vmatmul.mubr.msk.bf16.vlgmr.msra.gmra.mrb[100].mxu1 %vm12899_vm5, %v12900_v8  ;;  %vm15677_vm3 = vmpackc.low %vm6313_vm0, %vm6313_vm0  ;;  %v5965_v7 = vadd.s32 15232, %v14508_v47 }
 0x3cc   : > { %10574 = vmatpush1.bf16.xpose.msra.mxu0 %v12515_v12  ;;  %10614 = vmatpush1.bf16.xpose.msra.mxu1 %v12517_v13  ;;  %vm15694_vm5 = vmpackc.low %vm6315_vm1, %vm6315_vm1  ;;  %v12525_v12 = vcombine.low %v15638_v36, %v15638_v36  ;;  %v6138_v13 = vadd.s32 %v14502_v40, %v5958_v54  ;;  %v5967_v36 = vadd.s32 15488, %v14508_v47 }
 0x3cd   : > { %12904 = vmatprep.mubr.msk.bf16.mxu0 %vm15601_vm6, %v12903_v14  ;;  %12910 = vmatprep.mubr.msk.bf16.mxu1 %vm12908_vm7, %v12909_v17  ;;  %v15702_v14 = vrot.slane %v6413_v52, %v14526_v0  ;;  %vm15706_vm6 = vmpackc.low %vm6318_vm2, %vm6318_vm2  ;;  %v6145_v26 = vadd.s32 %v14502_v40, %v5965_v7  ;;  %v6142_v52 = vadd.s32 %v14502_v40, %v5962_v28 }
 0x3ce   : > { %10653 = vmatprep.subr.bf16.mxu0 %v12520_v21  ;;  %10693 = vmatprep.subr.bf16.mxu1 %v12522_v22  ;;  %v15712_v21 = vrot.slane %v6967_v58, %v14526_v0  ;;  %vm12932_vm7 = vmpackc.low %vm6320_vm4, %vm6320_vm4  ;;  %v12528_v22 = vcombine.high %v15684_v5, %v15684_v5  ;;  %vm6317_vm8 = vcmp.lt.s32.totalorder %v6138_v13, 91200 }
 0x3cf   : > { %v6982_v27 = vcombine.high %v15702_v14, %v15702_v14  ;;  %vm6324_vm12 = vcmp.lt.s32.totalorder %v6145_v26, 91200  ;;  %vm6321_vm0 = vcmp.lt.s32.totalorder %v6142_v52, 91200  ;;  %v12942_v11 = vpack.c.bf16 %v15702_v14, %v15702_v14  ;;  %v15815_v14 = vld [vmem:[%s14056_s5 + $0x1f8] sm:$0xff] }
 0x3d0   : > { %v6983_v29 = vcombine.high %v15712_v21, %v15712_v21 }
 0x3d1   : > { %v12939_v48 = vpack.c.bf16 %v6982_v27, %v6982_v27 }
 0x3d2   : > { %v12945_v58 = vpack.c.bf16 %v6983_v29, %v6983_v29 }
 0x3d3   : > { %12907 = vmatmul.mubr.msk.bf16.vlgmr.msra.gmra.mrb[104].mxu0 %vm15626_vm11, %v12906_v33  ;;  %12913 = vmatmul.mubr.msk.bf16.vlgmr.msra.gmra.mrb[104].mxu1 %vm12911_vm13, %v12912_v34  ;;  %v12527_v34 = vcombine.low %v15684_v5, %v15684_v5  ;;  %vm15742_vm11 = vmpackc.low %vm6317_vm8, %vm6317_vm8 }
 0x3d4   : > { %10654 = vmatpush1.bf16.xpose.msra.mxu0 %v12519_v38  ;;  %10694 = vmatpush1.bf16.xpose.msra.mxu1 %v12521_v39  ;;  %vm15757_vm13 = vmpackc.low %vm6319_vm9, %vm6319_vm9 }
 0x3d5   : > { %12916 = vmatprep.mubr.msk.bf16.mxu0 %vm15645_vm14, %v12915_v44  ;;  %12922 = vmatprep.mubr.msk.bf16.mxu1 %vm12920_vm15, %v12921_v45  ;;  %v15752_v44 = vld [vmem:[%s14056_s5 + $0x1e8] sm:$0xff]  ;;  %v5969_v45 = vadd.s32 15744, %v14508_v47  ;;  %vm15769_vm14 = vmpackc.low %vm6322_vm10, %vm6322_vm10 }
 0x3d6   : > { %v8527_v59 = vpop.f32.mrb[0].mxu0  ;;  %v8567_v60 = vpop.f32.mrb[0].mxu1  ;;  %10733 = vmatprep.subr.bf16.mxu0 %v12524_v49  ;;  %10773 = vmatprep.subr.bf16.mxu1 %v12526_v50  ;;  %vm12944_vm15 = vmpackc.low %vm6324_vm12, %vm6324_vm12  ;;  %v12534_v62 = vcombine.high %v15752_v44, %v15752_v44  ;;  %v12533_v25 = vcombine.low %v15752_v44, %v15752_v44  ;;  %v5972_v44 = vadd.s32 16128, %v14508_v47 }
 0x3d7   : > { %v8568_v63 = vadd.f32 %v8567_v60, %v8527_v59  ;;  %v8529_v1 = vpop.f32.mrb[1].mxu0  ;;  %v8569_v2 = vpop.f32.mrb[1].mxu1  ;;  %v6144_v59 = vadd.s32 %v14502_v40, %v5964_v30  ;;  %v15775_v60 = vrot.slane %v6984_v31, %v14526_v0 }
 0x3d8   : > { %v8530_v8 = vpop.f32.mrb[2].mxu0  ;;  %v8570_v9 = vpop.f32.mrb[2].mxu1  ;;  %v6415_v1 = vld [vmem:[%s14048_s25 + $0xf8] sm:$0xff]  ;;  %v6149_v2 = vadd.s32 %v14502_v40, %v5969_v45 }
 0x3d9   : > { %v8531_v15 = vpop.f32.mrb[3].mxu0  ;;  %v8571_v16 = vpop.f32.mrb[3].mxu1  ;;  %vm6323_vm1 = vcmp.lt.s32.totalorder %v6144_v59, 91200  ;;  %v7000_v5 = vcombine.high %v15775_v60, %v15775_v60  ;;  %v7001_v7 = vcombine.high %v6415_v1, %v6415_v1  ;;  %v15828_v27 = vrot.slane %v6415_v1, %v14526_v0 }
 0x3da   : > { %vm6328_vm4 = vcmp.lt.s32.totalorder %v6149_v2, 91200  ;;  %v12960_v57 = vpack.c.bf16 %v15775_v60, %v15775_v60  ;;  %v5977_v59 = vadd.s32 16768, %v14508_v47  ;;  %v12537_v1 = vcombine.low %v15815_v14, %v15815_v14 }
 0x3db   : > { %12919 = vmatmul.mubr.msk.bf16.vlgmr.msra.gmra.mrb[108].mxu0 %vm15677_vm3, %v12918_v61  ;;  %12925 = vmatmul.mubr.msk.bf16.vlgmr.msra.gmra.mrb[108].mxu1 %vm15694_vm5, %v12924_v4  ;;  %v12532_v61 = vcombine.high %v15749_v43, %v15749_v43  ;;  %v5966_v4 = vadd.s32 15360, %v14508_v47  ;;  %vm15805_vm3 = vmpackc.low %vm6321_vm0, %vm6321_vm0  ;;  %v7016_v41 = vcombine.high %v15828_v27, %v15828_v27 }
 0x3dc   : > { %10734 = vmatpush1.bf16.xpose.msra.mxu0 %v12523_v10  ;;  %10774 = vmatpush1.bf16.xpose.msra.mxu1 %v12525_v12  ;;  %v12531_v10 = vcombine.low %v15749_v43, %v15749_v43  ;;  %v5971_v12 = vadd.s32 16000, %v14508_v47  ;;  %vm15820_vm5 = vmpackc.low %vm6323_vm1, %vm6323_vm1 }
 0x3dd   : > { %12928 = vmatprep.mubr.msk.bf16.mxu0 %vm15706_vm6, %v12927_v18  ;;  %12934 = vmatprep.mubr.msk.bf16.mxu1 %vm12932_vm7, %v12933_v19  ;;  %v12948_v18 = vpack.c.bf16 %v15712_v21, %v15712_v21  ;;  %v15812_v19 = vld [vmem:[%s14056_s5 + $0x1f0] sm:$0xff]  ;;  %v12951_v21 = vpack.c.bf16 %v6999_v3, %v6999_v3  ;;  %v6146_v26 = vadd.s32 %v14502_v40, %v5966_v4  ;;  %vm12956_vm7 = vmpackc.low %vm6328_vm4, %vm6328_vm4 }
 0x3de   : > { %v8607_v32 = vpop.f32.mrb[4].mxu0  ;;  %v8647_v33 = vpop.f32.mrb[4].mxu1  ;;  %10813 = vmatprep.subr.bf16.mxu0 %v12528_v22  ;;  %10853 = vmatprep.subr.bf16.mxu1 %v12530_v23  ;;  %v12535_v50 = vcombine.low %v15812_v19, %v15812_v19  ;;  %v12963_v60 = vpack.c.bf16 %v7016_v41, %v7016_v41 }
 0x3df   : > { %v8608_v37 = vadd.f32 %v8607_v32, %v8568_v63  ;;  %v8609_v38 = vpop.f32.mrb[5].mxu0  ;;  %v8649_v39 = vpop.f32.mrb[5].mxu1  ;;  %v6147_v63 = vadd.s32 %v14502_v40, %v5967_v36  ;;  %v12957_v32 = vpack.c.bf16 %v7000_v5, %v7000_v5  ;;  %v12538_v36 = vcombine.high %v15815_v14, %v15815_v14 }
 0x3e0   : > { %v8610_v46 = vpop.f32.mrb[6].mxu0  ;;  %v8650_v49 = vpop.f32.mrb[6].mxu1  ;;  %v6416_v38 = vld [vmem:[%s14048_s25 + $0x100] sm:$0xff]  ;;  %v6153_v39 = vadd.s32 %v14502_v40, %v5973_v20  ;;  %vm6325_vm8 = vcmp.lt.s32.totalorder %v6146_v26, 91200  ;;  %v5976_v14 = vadd.s32 16640, %v14508_v47 }
 0x3e1   : > { %v8648_v54 = vadd.f32 %v8647_v33, %v8608_v37  ;;  %v8611_v55 = vpop.f32.mrb[7].mxu0  ;;  %v8651_v56 = vpop.f32.mrb[7].mxu1  ;;  %vm6326_vm2 = vcmp.lt.s32.totalorder %v6147_v63, 91200  ;;  %v6148_v33 = vadd.s32 %v14502_v40, %v5968_v6  ;;  %v6151_v37 = vadd.s32 %v14502_v40, %v5971_v12 }
 0x3e2   : > { %vm15832_vm6 = vmpackc.low %vm6326_vm2, %vm6326_vm2  ;;  %v7018_v45 = vcombine.high %v6416_v38, %v6416_v38  ;;  %vm6332_vm12 = vcmp.lt.s32.totalorder %v6153_v39, 91200  ;;  %v15891_v3 = vrot.slane %v6416_v38, %v14526_v0 }
 0x3e3   : > { %12931 = vmatmul.mubr.msk.bf16.vlgmr.msra.gmra.mrb[112].mxu0 %vm15742_vm11, %v12930_v35  ;;  %12937 = vmatmul.mubr.msk.bf16.vlgmr.msra.gmra.mrb[112].mxu1 %vm15757_vm13, %v12936_v42  ;;  %v12536_v35 = vcombine.high %v15812_v19, %v15812_v19  ;;  %v5970_v42 = vadd.s32 15872, %v14508_v47  ;;  %vm6327_vm9 = vcmp.lt.s32.totalorder %v6148_v33, 91200  ;;  %vm6330_vm10 = vcmp.lt.s32.totalorder %v6151_v37, 91200  ;;  %vm15868_vm11 = vmpackc.low %vm6325_vm8, %vm6325_vm8 }
 0x3e4   : > { %10814 = vmatpush1.bf16.xpose.msra.mxu0 %v12527_v34  ;;  %10854 = vmatpush1.bf16.xpose.msra.mxu1 %v12529_v51  ;;  %v15838_v34 = vrot.slane %v7001_v7, %v14526_v0  ;;  %v12954_v51 = vpack.c.bf16 %v15765_v53, %v15765_v53  ;;  %v15878_v53 = vld [vmem:[%s14056_s5 + $0x208] sm:$0xff]  ;;  %vm15883_vm13 = vmpackc.low %vm6327_vm9, %vm6327_vm9  ;;  %v7033_v17 = vcombine.high %v15891_v3, %v15891_v3  ;;  %v5981_v33 = vadd.s32 17280, %v14508_v47 }
 0x3e5   : > { %12940 = vmatprep.mubr.msk.bf16.mxu0 %vm15769_vm14, %v12939_v48  ;;  %12946 = vmatprep.mubr.msk.bf16.mxu1 %vm12944_vm15, %v12945_v58  ;;  %v5975_v48 = vadd.s32 16512, %v14508_v47  ;;  %v15875_v58 = vld [vmem:[%s14056_s5 + $0x200] sm:$0xff]  ;;  %v6150_v2 = vadd.s32 %v14502_v40, %v5970_v42  ;;  %vm15895_vm14 = vmpackc.low %vm6330_vm10, %vm6330_vm10  ;;  %v12542_v12 = vcombine.high %v15878_v53, %v15878_v53  ;;  %v12541_v38 = vcombine.low %v15878_v53, %v15878_v53 }
 0x3e6   : > { %v8687_v8 = vpop.f32.mrb[8].mxu0  ;;  %v8727_v9 = vpop.f32.mrb[8].mxu1  ;;  %10893 = vmatprep.subr.bf16.mxu0 %v12532_v61  ;;  %10933 = vmatprep.subr.bf16.mxu1 %v12534_v62  ;;  %v7017_v43 = vcombine.high %v15838_v34, %v15838_v34  ;;  %vm12968_vm15 = vmpackc.low %vm6332_vm12, %vm6332_vm12  ;;  %v12539_v24 = vcombine.low %v15875_v58, %v15875_v58  ;;  %v12972_v31 = vpack.c.bf16 %v15838_v34, %v15838_v34  ;;  %v5980_v53 = vadd.s32 17152, %v14508_v47 }
 0x3e7   : > { %v8688_v13 = vadd.f32 %v8687_v8, %v8648_v54  ;;  %v8689_v15 = vpop.f32.mrb[9].mxu0  ;;  %v8729_v16 = vpop.f32.mrb[9].mxu1  ;;  %vm6329_vm0 = vcmp.lt.s32.totalorder %v6150_v2, 91200  ;;  %v12975_v34 = vpack.c.bf16 %v7033_v17, %v7033_v17 }
 0x3e8   : > { %v8690_v22 = vpop.f32.mrb[10].mxu0  ;;  %v8730_v23 = vpop.f32.mrb[10].mxu1  ;;  %v12969_v8 = vpack.c.bf16 %v7017_v43, %v7017_v43  ;;  %v6417_v15 = vld [vmem:[%s14048_s25 + $0x108] sm:$0xff]  ;;  %v6157_v16 = vadd.s32 %v14502_v40, %v5977_v59 }
 0x3e9   : > { %v8728_v28 = vadd.f32 %v8727_v9, %v8688_v13  ;;  %v8691_v29 = vpop.f32.mrb[11].mxu0  ;;  %v8731_v30 = vpop.f32.mrb[11].mxu1  ;;  %v6152_v9 = vadd.s32 %v14502_v40, %v5972_v44  ;;  %v6155_v13 = vadd.s32 %v14502_v40, %v5975_v48  ;;  %v7035_v20 = vcombine.high %v6417_v15, %v6417_v15 }
 0x3ea   : > { %vm6336_vm4 = vcmp.lt.s32.totalorder %v6157_v16, 91200  ;;  %v15954_v41 = vrot.slane %v6417_v15, %v14526_v0 }
 0x3eb   : > { %12943 = vmatmul.mubr.msk.bf16.vlgmr.msra.gmra.mrb[116].mxu0 %vm15805_vm3, %v12942_v11  ;;  %12949 = vmatmul.mubr.msk.bf16.vlgmr.msra.gmra.mrb[116].mxu1 %vm15820_vm5, %v12948_v18  ;;  %v12540_v11 = vcombine.high %v15875_v58, %v15875_v58  ;;  %v5974_v18 = vadd.s32 16384, %v14508_v47  ;;  %vm6331_vm1 = vcmp.lt.s32.totalorder %v6152_v9, 91200  ;;  %vm6334_vm2 = vcmp.lt.s32.totalorder %v6155_v13, 91200  ;;  %vm15931_vm3 = vmpackc.low %vm6329_vm0, %vm6329_vm0 }
 0x3ec   : > { %10894 = vmatpush1.bf16.xpose.msra.mxu0 %v12531_v10  ;;  %10934 = vmatpush1.bf16.xpose.msra.mxu1 %v12533_v25  ;;  %v15901_v10 = vrot.slane %v7018_v45, %v14526_v0  ;;  %v12966_v25 = vpack.c.bf16 %v15828_v27, %v15828_v27  ;;  %v15941_v27 = vld [vmem:[%s14056_s5 + $0x218] sm:$0xff]  ;;  %vm15946_vm5 = vmpackc.low %vm6331_vm1, %vm6331_vm1  ;;  %v7050_v56 = vcombine.high %v15954_v41, %v15954_v41  ;;  %v5985_v9 = vadd.s32 17792, %v14508_v47 }
 0x3ed   : > { %12952 = vmatprep.mubr.msk.bf16.mxu0 %vm15832_vm6, %v12951_v21  ;;  %12958 = vmatprep.mubr.msk.bf16.mxu1 %vm12956_vm7, %v12957_v32  ;;  %v5979_v21 = vadd.s32 17024, %v14508_v47  ;;  %v15938_v32 = vld [vmem:[%s14056_s5 + $0x210] sm:$0xff]  ;;  %v6154_v39 = vadd.s32 %v14502_v40, %v5974_v18  ;;  %vm15958_vm6 = vmpackc.low %vm6334_vm2, %vm6334_vm2  ;;  %v12546_v48 = vcombine.high %v15941_v27, %v15941_v27  ;;  %v12545_v15 = vcombine.low %v15941_v27, %v15941_v27 }
 0x3ee   : > { %v8767_v46 = vpop.f32.mrb[12].mxu0  ;;  %v8807_v49 = vpop.f32.mrb[12].mxu1  ;;  %10973 = vmatprep.subr.bf16.mxu0 %v12536_v35  ;;  %11013 = vmatprep.subr.bf16.mxu1 %v12538_v36  ;;  %v7034_v19 = vcombine.high %v15901_v10, %v15901_v10  ;;  %vm12980_vm7 = vmpackc.low %vm6336_vm4, %vm6336_vm4  ;;  %v12543_v63 = vcombine.low %v15938_v32, %v15938_v32  ;;  %v12984_v7 = vpack.c.bf16 %v15901_v10, %v15901_v10  ;;  %v5984_v27 = vadd.s32 17664, %v14508_v47 }
 0x3ef   : > { %v8768_v52 = vadd.f32 %v8767_v46, %v8728_v28  ;;  %v8769_v54 = vpop.f32.mrb[13].mxu0  ;;  %v8809_v55 = vpop.f32.mrb[13].mxu1  ;;  %vm6333_vm8 = vcmp.lt.s32.totalorder %v6154_v39, 91200  ;;  %v12987_v10 = vpack.c.bf16 %v7050_v56, %v7050_v56 }
 0x3f0   : > { %v8770_v61 = vpop.f32.mrb[14].mxu0  ;;  %v8810_v62 = vpop.f32.mrb[14].mxu1  ;;  %v12981_v46 = vpack.c.bf16 %v7034_v19, %v7034_v19  ;;  %v6418_v54 = vld [vmem:[%s14048_s25 + $0x110] sm:$0xff]  ;;  %v6161_v55 = vadd.s32 %v14502_v40, %v5981_v33 }
 0x3f1   : > { %v8808_v4 = vadd.f32 %v8807_v49, %v8768_v52  ;;  %v8771_v5 = vpop.f32.mrb[15].mxu0  ;;  %v8811_v6 = vpop.f32.mrb[15].mxu1  ;;  %v6156_v49 = vadd.s32 %v14502_v40, %v5976_v14  ;;  %v6159_v52 = vadd.s32 %v14502_v40, %v5979_v21  ;;  %v7052_v59 = vcombine.high %v6418_v54, %v6418_v54 }
 0x3f2   : > { %vm6340_vm12 = vcmp.lt.s32.totalorder %v6161_v55, 91200  ;;  %v16017_v17 = vrot.slane %v6418_v54, %v14526_v0 }
 0x3f3   : > { %12955 = vmatmul.mubr.msk.bf16.vlgmr.msra.gmra.mrb[120].mxu0 %vm15868_vm11, %v12954_v51  ;;  %12961 = vmatmul.mubr.msk.bf16.vlgmr.msra.gmra.mrb[120].mxu1 %vm15883_vm13, %v12960_v57  ;;  %v12544_v51 = vcombine.high %v15938_v32, %v15938_v32  ;;  %v5978_v57 = vadd.s32 16896, %v14508_v47  ;;  %vm6335_vm9 = vcmp.lt.s32.totalorder %v6156_v49, 91200  ;;  %vm6338_vm10 = vcmp.lt.s32.totalorder %v6159_v52, 91200  ;;  %vm15994_vm11 = vmpackc.low %vm6333_vm8, %vm6333_vm8 }
 0x3f4   : > { %10974 = vmatpush1.bf16.xpose.msra.mxu0 %v12535_v50  ;;  %11014 = vmatpush1.bf16.xpose.msra.mxu1 %v12537_v1  ;;  %v15964_v50 = vrot.slane %v7035_v20, %v14526_v0  ;;  %v12978_v1 = vpack.c.bf16 %v15891_v3, %v15891_v3  ;;  %v16004_v3 = vld [vmem:[%s14056_s5 + $0x228] sm:$0xff]  ;;  %vm16009_vm13 = vmpackc.low %vm6335_vm9, %vm6335_vm9  ;;  %v7067_v30 = vcombine.high %v16017_v17, %v16017_v17  ;;  %v5989_v49 = vadd.s32 18304, %v14508_v47 }
 0x3f5   : > { %12964 = vmatprep.mubr.msk.bf16.mxu0 %vm15895_vm14, %v12963_v60  ;;  %12970 = vmatprep.mubr.msk.bf16.mxu1 %vm12968_vm15, %v12969_v8  ;;  %v5983_v60 = vadd.s32 17536, %v14508_v47  ;;  %v16001_v8 = vld [vmem:[%s14056_s5 + $0x220] sm:$0xff]  ;;  %v6158_v16 = vadd.s32 %v14502_v40, %v5978_v57  ;;  %vm16021_vm14 = vmpackc.low %vm6338_vm10, %vm6338_vm10  ;;  %v12550_v21 = vcombine.high %v16004_v3, %v16004_v3  ;;  %v12549_v54 = vcombine.low %v16004_v3, %v16004_v3 }
 0x3f6   : > { %v8847_v22 = vpop.f32.mrb[16].mxu0  ;;  %v8887_v23 = vpop.f32.mrb[16].mxu1  ;;  %11053 = vmatprep.subr.bf16.mxu0 %v12540_v11  ;;  %11093 = vmatprep.subr.bf16.mxu1 %v12542_v12  ;;  %v7051_v58 = vcombine.high %v15964_v50, %v15964_v50  ;;  %vm12992_vm15 = vmpackc.low %vm6340_vm12, %vm6340_vm12  ;;  %v12547_v37 = vcombine.low %v16001_v8, %v16001_v8  ;;  %v12996_v45 = vpack.c.bf16 %v15964_v50, %v15964_v50  ;;  %v5988_v3 = vadd.s32 18176, %v14508_v47 }
 0x3f7   : > { %v8848_v26 = vadd.f32 %v8847_v22, %v8808_v4  ;;  %v8849_v28 = vpop.f32.mrb[17].mxu0  ;;  %v8889_v29 = vpop.f32.mrb[17].mxu1  ;;  %vm6337_vm0 = vcmp.lt.s32.totalorder %v6158_v16, 91200  ;;  %v12999_v50 = vpack.c.bf16 %v7067_v30, %v7067_v30 }
 0x3f8   : > { %v8850_v35 = vpop.f32.mrb[18].mxu0  ;;  %v8890_v36 = vpop.f32.mrb[18].mxu1  ;;  %v12993_v22 = vpack.c.bf16 %v7051_v58, %v7051_v58  ;;  %v6419_v28 = vld [vmem:[%s14048_s25 + $0x118] sm:$0xff]  ;;  %v6165_v29 = vadd.s32 %v14502_v40, %v5985_v9 }
 0x3f9   : > { %v8888_v42 = vadd.f32 %v8887_v23, %v8848_v26  ;;  %v8851_v43 = vpop.f32.mrb[19].mxu0  ;;  %v8891_v44 = vpop.f32.mrb[19].mxu1  ;;  %v6160_v23 = vadd.s32 %v14502_v40, %v5980_v53  ;;  %v6163_v26 = vadd.s32 %v14502_v40, %v5983_v60  ;;  %v7069_v33 = vcombine.high %v6419_v28, %v6419_v28 }
 0x3fa   : > { %vm6344_vm4 = vcmp.lt.s32.totalorder %v6165_v29, 91200  ;;  %v16080_v56 = vrot.slane %v6419_v28, %v14526_v0 }
 0x3fb   : > { %12967 = vmatmul.mubr.msk.bf16.vlgmr.msra.gmra.mrb[124].mxu0 %vm15931_vm3, %v12966_v25  ;;  %12973 = vmatmul.mubr.msk.bf16.vlgmr.msra.gmra.mrb[124].mxu1 %vm15946_vm5, %v12972_v31  ;;  %v12548_v25 = vcombine.high %v16001_v8, %v16001_v8  ;;  %v5982_v31 = vadd.s32 17408, %v14508_v47  ;;  %vm6339_vm1 = vcmp.lt.s32.totalorder %v6160_v23, 91200  ;;  %vm6342_vm2 = vcmp.lt.s32.totalorder %v6163_v26, 91200  ;;  %vm16057_vm3 = vmpackc.low %vm6337_vm0, %vm6337_vm0 }
 0x3fc   : > { %11054 = vmatpush1.bf16.xpose.msra.mxu0 %v12539_v24  ;;  %11094 = vmatpush1.bf16.xpose.msra.mxu1 %v12541_v38  ;;  %v16027_v24 = vrot.slane %v7052_v59, %v14526_v0  ;;  %v12990_v38 = vpack.c.bf16 %v15954_v41, %v15954_v41  ;;  %v16067_v41 = vld [vmem:[%s14056_s5 + $0x238] sm:$0xff]  ;;  %vm16072_vm5 = vmpackc.low %vm6339_vm1, %vm6339_vm1  ;;  %v7084_v6 = vcombine.high %v16080_v56, %v16080_v56  ;;  %v5993_v23 = vadd.s32 18816, %v14508_v47 }
 0x3fd   : > { %12976 = vmatprep.mubr.msk.bf16.mxu0 %vm15958_vm6, %v12975_v34  ;;  %12982 = vmatprep.mubr.msk.bf16.mxu1 %vm12980_vm7, %v12981_v46  ;;  %v5987_v34 = vadd.s32 18048, %v14508_v47  ;;  %v16064_v46 = vld [vmem:[%s14056_s5 + $0x230] sm:$0xff]  ;;  %v6162_v55 = vadd.s32 %v14502_v40, %v5982_v31  ;;  %vm16084_vm6 = vmpackc.low %vm6342_vm2, %vm6342_vm2  ;;  %v12554_v60 = vcombine.high %v16067_v41, %v16067_v41  ;;  %v12553_v28 = vcombine.low %v16067_v41, %v16067_v41 }
 0x3fe   : > { %v8927_v61 = vpop.f32.mrb[20].mxu0  ;;  %v8967_v62 = vpop.f32.mrb[20].mxu1  ;;  %11133 = vmatprep.subr.bf16.mxu0 %v12544_v51  ;;  %11173 = vmatprep.subr.bf16.mxu1 %v12546_v48  ;;  %v7068_v32 = vcombine.high %v16027_v24, %v16027_v24  ;;  %vm13004_vm7 = vmpackc.low %vm6344_vm4, %vm6344_vm4  ;;  %v12551_v13 = vcombine.low %v16064_v46, %v16064_v46  ;;  %v13008_v20 = vpack.c.bf16 %v16027_v24, %v16027_v24  ;;  %v5992_v41 = vadd.s32 18688, %v14508_v47 }
 0x3ff   : > { %v8928_v2 = vadd.f32 %v8927_v61, %v8888_v42  ;;  %v8929_v4 = vpop.f32.mrb[21].mxu0  ;;  %v8969_v5 = vpop.f32.mrb[21].mxu1  ;;  %vm6341_vm8 = vcmp.lt.s32.totalorder %v6162_v55, 91200  ;;  %v13011_v24 = vpack.c.bf16 %v7084_v6, %v7084_v6 }
 0x400   : > { %v8930_v11 = vpop.f32.mrb[22].mxu0  ;;  %v8970_v12 = vpop.f32.mrb[22].mxu1  ;;  %v13005_v61 = vpack.c.bf16 %v7068_v32, %v7068_v32  ;;  %v6420_v4 = vld [vmem:[%s14048_s25 + $0x120] sm:$0xff]  ;;  %v6169_v5 = vadd.s32 %v14502_v40, %v5989_v49 }
 0x401   : > { %v8968_v18 = vadd.f32 %v8967_v62, %v8928_v2  ;;  %v8931_v19 = vpop.f32.mrb[23].mxu0  ;;  %v8971_v14 = vpop.f32.mrb[23].mxu1  ;;  %v6164_v62 = vadd.s32 %v14502_v40, %v5984_v27  ;;  %v6167_v2 = vadd.s32 %v14502_v40, %v5987_v34  ;;  %v7086_v9 = vcombine.high %v6420_v4, %v6420_v4 }
 0x402   : > { %vm6348_vm12 = vcmp.lt.s32.totalorder %v6169_v5, 91200  ;;  %v16143_v30 = vrot.slane %v6420_v4, %v14526_v0 }
 0x403   : > { %12979 = vmatmul.mubr.msk.bf16.vlgmr.msra.gmra.mrb[128].mxu0 %vm15994_vm11, %v12978_v1  ;;  %12985 = vmatmul.mubr.msk.bf16.vlgmr.msra.gmra.mrb[128].mxu1 %vm16009_vm13, %v12984_v7  ;;  %v12552_v1 = vcombine.high %v16064_v46, %v16064_v46  ;;  %v5986_v7 = vadd.s32 17920, %v14508_v47  ;;  %vm6343_vm9 = vcmp.lt.s32.totalorder %v6164_v62, 91200  ;;  %vm6346_vm10 = vcmp.lt.s32.totalorder %v6167_v2, 91200  ;;  %vm16120_vm11 = vmpackc.low %vm6341_vm8, %vm6341_vm8 }
 0x404   : > { %11134 = vmatpush1.bf16.xpose.msra.mxu0 %v12543_v63  ;;  %11174 = vmatpush1.bf16.xpose.msra.mxu1 %v12545_v15  ;;  %v16090_v63 = vrot.slane %v7069_v33, %v14526_v0  ;;  %v13002_v15 = vpack.c.bf16 %v16017_v17, %v16017_v17  ;;  %v16130_v17 = vld [vmem:[%s14056_s5 + $0x248] sm:$0xff]  ;;  %vm16135_vm13 = vmpackc.low %vm6343_vm9, %vm6343_vm9  ;;  %v7101_v44 = vcombine.high %v16143_v30, %v16143_v30  ;;  %v5997_v62 = vadd.s32 19328, %v14508_v47 }
 0x405   : > { %12988 = vmatprep.mubr.msk.bf16.mxu0 %vm16021_vm14, %v12987_v10  ;;  %12994 = vmatprep.mubr.msk.bf16.mxu1 %vm12992_vm15, %v12993_v22  ;;  %v5991_v10 = vadd.s32 18560, %v14508_v47  ;;  %v16127_v22 = vld [vmem:[%s14056_s5 + $0x240] sm:$0xff]  ;;  %v6166_v29 = vadd.s32 %v14502_v40, %v5986_v7  ;;  %vm16147_vm14 = vmpackc.low %vm6346_vm10, %vm6346_vm10  ;;  %v12558_v34 = vcombine.high %v16130_v17, %v16130_v17  ;;  %v12557_v4 = vcombine.low %v16130_v17, %v16130_v17 }
 0x406   : > { %v9007_v35 = vpop.f32.mrb[24].mxu0  ;;  %v9047_v36 = vpop.f32.mrb[24].mxu1  ;;  %11213 = vmatprep.subr.bf16.mxu0 %v12548_v25  ;;  %11253 = vmatprep.subr.bf16.mxu1 %v12550_v21  ;;  %v7085_v8 = vcombine.high %v16090_v63, %v16090_v63  ;;  %vm13016_vm15 = vmpackc.low %vm6348_vm12, %vm6348_vm12  ;;  %v12555_v52 = vcombine.low %v16127_v22, %v16127_v22  ;;  %v13020_v59 = vpack.c.bf16 %v16090_v63, %v16090_v63  ;;  %v5996_v17 = vadd.s32 19200, %v14508_v47 }
 0x407   : > { %v9008_v39 = vadd.f32 %v9007_v35, %v8968_v18  ;;  %v9009_v42 = vpop.f32.mrb[25].mxu0  ;;  %v9049_v43 = vpop.f32.mrb[25].mxu1  ;;  %vm6345_vm0 = vcmp.lt.s32.totalorder %v6166_v29, 91200  ;;  %v13023_v63 = vpack.c.bf16 %v7101_v44, %v7101_v44 }
 0x408   : > { %v9010_v51 = vpop.f32.mrb[26].mxu0  ;;  %v9050_v48 = vpop.f32.mrb[26].mxu1  ;;  %v13017_v35 = vpack.c.bf16 %v7085_v8, %v7085_v8  ;;  %v6421_v42 = vld [vmem:[%s14048_s25 + $0x128] sm:$0xff]  ;;  %v6173_v43 = vadd.s32 %v14502_v40, %v5993_v23 }
 0x409   : > { %v9048_v57 = vadd.f32 %v9047_v36, %v9008_v39  ;;  %v9011_v58 = vpop.f32.mrb[27].mxu0  ;;  %v9051_v53 = vpop.f32.mrb[27].mxu1  ;;  %v6168_v36 = vadd.s32 %v14502_v40, %v5988_v3  ;;  %v6171_v39 = vadd.s32 %v14502_v40, %v5991_v10  ;;  %v7103_v49 = vcombine.high %v6421_v42, %v6421_v42 }
 0x40a   : > { %vm6352_vm4 = vcmp.lt.s32.totalorder %v6173_v43, 91200  ;;  %v16206_v6 = vrot.slane %v6421_v42, %v14526_v0 }
 0x40b   : > { %12991 = vmatmul.mubr.msk.bf16.vlgmr.msra.gmra.mrb[132].mxu0 %vm16057_vm3, %v12990_v38  ;;  %12997 = vmatmul.mubr.msk.bf16.vlgmr.msra.gmra.mrb[132].mxu1 %vm16072_vm5, %v12996_v45  ;;  %v12556_v38 = vcombine.high %v16127_v22, %v16127_v22  ;;  %v5990_v45 = vadd.s32 18432, %v14508_v47  ;;  %vm6347_vm1 = vcmp.lt.s32.totalorder %v6168_v36, 91200  ;;  %vm6350_vm2 = vcmp.lt.s32.totalorder %v6171_v39, 91200  ;;  %vm16183_vm3 = vmpackc.low %vm6345_vm0, %vm6345_vm0 }
 0x40c   : > { %11214 = vmatpush1.bf16.xpose.msra.mxu0 %v12547_v37  ;;  %11254 = vmatpush1.bf16.xpose.msra.mxu1 %v12549_v54  ;;  %v16153_v37 = vrot.slane %v7086_v9, %v14526_v0  ;;  %v13014_v54 = vpack.c.bf16 %v16080_v56, %v16080_v56  ;;  %v16193_v56 = vld [vmem:[%s14056_s5 + $0x258] sm:$0xff]  ;;  %vm16198_vm5 = vmpackc.low %vm6347_vm1, %vm6347_vm1  ;;  %v7118_v14 = vcombine.high %v16206_v6, %v16206_v6  ;;  %v6001_v36 = vadd.s32 19840, %v14508_v47 }
 0x40d   : > { %13000 = vmatprep.mubr.msk.bf16.mxu0 %vm16084_vm6, %v12999_v50  ;;  %13006 = vmatprep.mubr.msk.bf16.mxu1 %vm13004_vm7, %v13005_v61  ;;  %v5995_v50 = vadd.s32 19072, %v14508_v47  ;;  %v16190_v61 = vld [vmem:[%s14056_s5 + $0x250] sm:$0xff]  ;;  %v6170_v5 = vadd.s32 %v14502_v40, %v5990_v45  ;;  %vm16210_vm6 = vmpackc.low %vm6350_vm2, %vm6350_vm2  ;;  %v12562_v10 = vcombine.high %v16193_v56, %v16193_v56  ;;  %v12561_v42 = vcombine.low %v16193_v56, %v16193_v56 }
 0x40e   : > { %v9087_v11 = vpop.f32.mrb[28].mxu0  ;;  %v9127_v12 = vpop.f32.mrb[28].mxu1  ;;  %11293 = vmatprep.subr.bf16.mxu0 %v12552_v1  ;;  %11333 = vmatprep.subr.bf16.mxu1 %v12554_v60  ;;  %v7102_v46 = vcombine.high %v16153_v37, %v16153_v37  ;;  %vm13028_vm7 = vmpackc.low %vm6352_vm4, %vm6352_vm4  ;;  %v12559_v26 = vcombine.low %v16190_v61, %v16190_v61  ;;  %v13032_v33 = vpack.c.bf16 %v16153_v37, %v16153_v37  ;;  %v6000_v56 = vadd.s32 19712, %v14508_v47 }
 0x40f   : > { %v9088_v16 = vadd.f32 %v9087_v11, %v9048_v57  ;;  %v9089_v18 = vpop.f32.mrb[29].mxu0  ;;  %v9129_v19 = vpop.f32.mrb[29].mxu1  ;;  %vm6349_vm8 = vcmp.lt.s32.totalorder %v6170_v5, 91200  ;;  %v13035_v37 = vpack.c.bf16 %v7118_v14, %v7118_v14 }
 0x410   : > { %v9090_v25 = vpop.f32.mrb[30].mxu0  ;;  %v9130_v21 = vpop.f32.mrb[30].mxu1  ;;  %v13029_v11 = vpack.c.bf16 %v7102_v46, %v7102_v46  ;;  %v6422_v18 = vld [vmem:[%s14048_s25 + $0x130] sm:$0xff]  ;;  %v6177_v19 = vadd.s32 %v14502_v40, %v5997_v62 }
 0x411   : > { %v9128_v31 = vadd.f32 %v9127_v12, %v9088_v16  ;;  %v9091_v32 = vpop.f32.mrb[31].mxu0  ;;  %v9131_v27 = vpop.f32.mrb[31].mxu1  ;;  %v6172_v12 = vadd.s32 %v14502_v40, %v5992_v41  ;;  %v6175_v16 = vadd.s32 %v14502_v40, %v5995_v50  ;;  %v7120_v23 = vcombine.high %v6422_v18, %v6422_v18 }
 0x412   : > { %vm6356_vm12 = vcmp.lt.s32.totalorder %v6177_v19, 91200  ;;  %v16269_v44 = vrot.slane %v6422_v18, %v14526_v0 }
 0x413   : > { %13003 = vmatmul.mubr.msk.bf16.vlgmr.msra.gmra.mrb[136].mxu0 %vm16120_vm11, %v13002_v15  ;;  %13009 = vmatmul.mubr.msk.bf16.vlgmr.msra.gmra.mrb[136].mxu1 %vm16135_vm13, %v13008_v20  ;;  %v12560_v15 = vcombine.high %v16190_v61, %v16190_v61  ;;  %v5994_v20 = vadd.s32 18944, %v14508_v47  ;;  %vm6351_vm9 = vcmp.lt.s32.totalorder %v6172_v12, 91200  ;;  %vm6354_vm10 = vcmp.lt.s32.totalorder %v6175_v16, 91200  ;;  %vm16246_vm11 = vmpackc.low %vm6349_vm8, %vm6349_vm8 }
 0x414   : > { %11294 = vmatpush1.bf16.xpose.msra.mxu0 %v12551_v13  ;;  %11334 = vmatpush1.bf16.xpose.msra.mxu1 %v12553_v28  ;;  %v16216_v13 = vrot.slane %v7103_v49, %v14526_v0  ;;  %v13026_v28 = vpack.c.bf16 %v16143_v30, %v16143_v30  ;;  %v16256_v30 = vld [vmem:[%s14056_s5 + $0x268] sm:$0xff]  ;;  %vm16261_vm13 = vmpackc.low %vm6351_vm9, %vm6351_vm9  ;;  %v7135_v53 = vcombine.high %v16269_v44, %v16269_v44  ;;  %v6005_v12 = vadd.s32 20352, %v14508_v47 }
 0x415   : > { %13012 = vmatprep.mubr.msk.bf16.mxu0 %vm16147_vm14, %v13011_v24  ;;  %13018 = vmatprep.mubr.msk.bf16.mxu1 %vm13016_vm15, %v13017_v35  ;;  %v5999_v24 = vadd.s32 19584, %v14508_v47  ;;  %v16253_v35 = vld [vmem:[%s14056_s5 + $0x260] sm:$0xff]  ;;  %v6174_v43 = vadd.s32 %v14502_v40, %v5994_v20  ;;  %vm16273_vm14 = vmpackc.low %vm6354_vm10, %vm6354_vm10  ;;  %v12566_v50 = vcombine.high %v16256_v30, %v16256_v30  ;;  %v12565_v18 = vcombine.low %v16256_v30, %v16256_v30 }
 0x416   : > { %v9167_v51 = vpop.f32.mrb[32].mxu0  ;;  %v9207_v48 = vpop.f32.mrb[32].mxu1  ;;  %11373 = vmatprep.subr.bf16.mxu0 %v12556_v38  ;;  %11413 = vmatprep.subr.bf16.mxu1 %v12558_v34  ;;  %v7119_v22 = vcombine.high %v16216_v13, %v16216_v13  ;;  %vm13040_vm15 = vmpackc.low %vm6356_vm12, %vm6356_vm12  ;;  %v12563_v2 = vcombine.low %v16253_v35, %v16253_v35  ;;  %v13044_v9 = vpack.c.bf16 %v16216_v13, %v16216_v13  ;;  %v6004_v30 = vadd.s32 20224, %v14508_v47 }
 0x417   : > { %v9168_v55 = vadd.f32 %v9167_v51, %v9128_v31  ;;  %v9169_v57 = vpop.f32.mrb[33].mxu0  ;;  %v9209_v58 = vpop.f32.mrb[33].mxu1  ;;  %vm6353_vm0 = vcmp.lt.s32.totalorder %v6174_v43, 91200  ;;  %v13047_v13 = vpack.c.bf16 %v7135_v53, %v7135_v53 }
 0x418   : > { %v9170_v1 = vpop.f32.mrb[34].mxu0  ;;  %v9210_v60 = vpop.f32.mrb[34].mxu1  ;;  %v13041_v51 = vpack.c.bf16 %v7119_v22, %v7119_v22  ;;  %v6423_v57 = vld [vmem:[%s14048_s25 + $0x138] sm:$0xff]  ;;  %v6181_v58 = vadd.s32 %v14502_v40, %v6001_v36 }
 0x419   : > { %v9208_v7 = vadd.f32 %v9207_v48, %v9168_v55  ;;  %v9171_v8 = vpop.f32.mrb[35].mxu0  ;;  %v9211_v3 = vpop.f32.mrb[35].mxu1  ;;  %v6176_v48 = vadd.s32 %v14502_v40, %v5996_v17  ;;  %v6179_v55 = vadd.s32 %v14502_v40, %v5999_v24  ;;  %v7137_v62 = vcombine.high %v6423_v57, %v6423_v57 }
 0x41a   : > { %vm6360_vm4 = vcmp.lt.s32.totalorder %v6181_v58, 91200  ;;  %v16332_v14 = vrot.slane %v6423_v57, %v14526_v0 }
 0x41b   : > { %13015 = vmatmul.mubr.msk.bf16.vlgmr.msra.gmra.mrb[140].mxu0 %vm16183_vm3, %v13014_v54  ;;  %13021 = vmatmul.mubr.msk.bf16.vlgmr.msra.gmra.mrb[140].mxu1 %vm16198_vm5, %v13020_v59  ;;  %v12564_v54 = vcombine.high %v16253_v35, %v16253_v35  ;;  %v5998_v59 = vadd.s32 19456, %v14508_v47  ;;  %vm6355_vm1 = vcmp.lt.s32.totalorder %v6176_v48, 91200  ;;  %vm6358_vm2 = vcmp.lt.s32.totalorder %v6179_v55, 91200  ;;  %vm16309_vm3 = vmpackc.low %vm6353_vm0, %vm6353_vm0 }
 0x41c   : > { %11374 = vmatpush1.bf16.xpose.msra.mxu0 %v12555_v52  ;;  %11414 = vmatpush1.bf16.xpose.msra.mxu1 %v12557_v4  ;;  %v16279_v52 = vrot.slane %v7120_v23, %v14526_v0  ;;  %v13038_v4 = vpack.c.bf16 %v16206_v6, %v16206_v6  ;;  %v16319_v6 = vld [vmem:[%s14056_s5 + $0x278] sm:$0xff]  ;;  %vm16324_vm5 = vmpackc.low %vm6355_vm1, %vm6355_vm1  ;;  %v7152_v27 = vcombine.high %v16332_v14, %v16332_v14  ;;  %v6009_v48 = vadd.s32 20864, %v14508_v47 }
 0x41d   : > { %13024 = vmatprep.mubr.msk.bf16.mxu0 %vm16210_vm6, %v13023_v63  ;;  %13030 = vmatprep.mubr.msk.bf16.mxu1 %vm13028_vm7, %v13029_v11  ;;  %v6003_v63 = vadd.s32 20096, %v14508_v47  ;;  %v16316_v11 = vld [vmem:[%s14056_s5 + $0x270] sm:$0xff]  ;;  %v6178_v19 = vadd.s32 %v14502_v40, %v5998_v59  ;;  %vm16336_vm6 = vmpackc.low %vm6358_vm2, %vm6358_vm2  ;;  %v12570_v24 = vcombine.high %v16319_v6, %v16319_v6  ;;  %v12569_v57 = vcombine.low %v16319_v6, %v16319_v6 }
 0x41e   : > { %v9247_v25 = vpop.f32.mrb[36].mxu0  ;;  %v9287_v21 = vpop.f32.mrb[36].mxu1  ;;  %11453 = vmatprep.subr.bf16.mxu0 %v12560_v15  ;;  %11493 = vmatprep.subr.bf16.mxu1 %v12562_v10  ;;  %v7136_v61 = vcombine.high %v16279_v52, %v16279_v52  ;;  %vm13052_vm7 = vmpackc.low %vm6360_vm4, %vm6360_vm4  ;;  %v12567_v39 = vcombine.low %v16316_v11, %v16316_v11  ;;  %v13056_v49 = vpack.c.bf16 %v16279_v52, %v16279_v52  ;;  %v6008_v6 = vadd.s32 20736, %v14508_v47 }
 0x41f   : > { %v9248_v29 = vadd.f32 %v9247_v25, %v9208_v7  ;;  %v9249_v31 = vpop.f32.mrb[37].mxu0  ;;  %v9289_v32 = vpop.f32.mrb[37].mxu1  ;;  %vm6357_vm8 = vcmp.lt.s32.totalorder %v6178_v19, 91200  ;;  %v13059_v52 = vpack.c.bf16 %v7152_v27, %v7152_v27 }
 0x420   : > { %v9250_v38 = vpop.f32.mrb[38].mxu0  ;;  %v9290_v34 = vpop.f32.mrb[38].mxu1  ;;  %v13053_v25 = vpack.c.bf16 %v7136_v61, %v7136_v61  ;;  %v6424_v31 = vld [vmem:[%s14048_s25 + $0x140] sm:$0xff]  ;;  %v6185_v32 = vadd.s32 %v14502_v40, %v6005_v12 }
 0x421   : > { %v9288_v45 = vadd.f32 %v9287_v21, %v9248_v29  ;;  %v9251_v46 = vpop.f32.mrb[39].mxu0  ;;  %v9291_v41 = vpop.f32.mrb[39].mxu1  ;;  %v6180_v21 = vadd.s32 %v14502_v40, %v6000_v56  ;;  %v6183_v29 = vadd.s32 %v14502_v40, %v6003_v63  ;;  %v7154_v36 = vcombine.high %v6424_v31, %v6424_v31 }
 0x422   : > { %vm6364_vm12 = vcmp.lt.s32.totalorder %v6185_v32, 91200  ;;  %v16395_v53 = vrot.slane %v6424_v31, %v14526_v0 }
 0x423   : > { %13027 = vmatmul.mubr.msk.bf16.vlgmr.msra.gmra.mrb[144].mxu0 %vm16246_vm11, %v13026_v28  ;;  %13033 = vmatmul.mubr.msk.bf16.vlgmr.msra.gmra.mrb[144].mxu1 %vm16261_vm13, %v13032_v33  ;;  %v12568_v28 = vcombine.high %v16316_v11, %v16316_v11  ;;  %v6002_v33 = vadd.s32 19968, %v14508_v47  ;;  %vm6359_vm9 = vcmp.lt.s32.totalorder %v6180_v21, 91200  ;;  %vm6362_vm10 = vcmp.lt.s32.totalorder %v6183_v29, 91200  ;;  %vm16372_vm11 = vmpackc.low %vm6357_vm8, %vm6357_vm8 }
 0x424   : > { %11454 = vmatpush1.bf16.xpose.msra.mxu0 %v12559_v26  ;;  %11494 = vmatpush1.bf16.xpose.msra.mxu1 %v12561_v42  ;;  %v16342_v26 = vrot.slane %v7137_v62, %v14526_v0  ;;  %v13050_v42 = vpack.c.bf16 %v16269_v44, %v16269_v44  ;;  %v16382_v44 = vld [vmem:[%s14056_s5 + $0x288] sm:$0xff]  ;;  %vm16387_vm13 = vmpackc.low %vm6359_vm9, %vm6359_vm9  ;;  %v7169_v3 = vcombine.high %v16395_v53, %v16395_v53  ;;  %v6013_v21 = vadd.s32 21376, %v14508_v47 }
 0x425   : > { %13036 = vmatprep.mubr.msk.bf16.mxu0 %vm16273_vm14, %v13035_v37  ;;  %13042 = vmatprep.mubr.msk.bf16.mxu1 %vm13040_vm15, %v13041_v51  ;;  %v6007_v37 = vadd.s32 20608, %v14508_v47  ;;  %v16379_v51 = vld [vmem:[%s14056_s5 + $0x280] sm:$0xff]  ;;  %v6182_v58 = vadd.s32 %v14502_v40, %v6002_v33  ;;  %vm16399_vm14 = vmpackc.low %vm6362_vm10, %vm6362_vm10  ;;  %v12574_v63 = vcombine.high %v16382_v44, %v16382_v44  ;;  %v12573_v31 = vcombine.low %v16382_v44, %v16382_v44 }
 0x426   : > { %v9327_v1 = vpop.f32.mrb[40].mxu0  ;;  %v9367_v60 = vpop.f32.mrb[40].mxu1  ;;  %11533 = vmatprep.subr.bf16.mxu0 %v12564_v54  ;;  %11573 = vmatprep.subr.bf16.mxu1 %v12566_v50  ;;  %v7153_v35 = vcombine.high %v16342_v26, %v16342_v26  ;;  %vm13064_vm15 = vmpackc.low %vm6364_vm12, %vm6364_vm12  ;;  %v12571_v16 = vcombine.low %v16379_v51, %v16379_v51  ;;  %v13068_v23 = vpack.c.bf16 %v16342_v26, %v16342_v26  ;;  %v6012_v44 = vadd.s32 21248, %v14508_v47 }
 0x427   : > { %v9328_v5 = vadd.f32 %v9327_v1, %v9288_v45  ;;  %v9329_v7 = vpop.f32.mrb[41].mxu0  ;;  %v9369_v8 = vpop.f32.mrb[41].mxu1  ;;  %vm6361_vm0 = vcmp.lt.s32.totalorder %v6182_v58, 91200  ;;  %v13071_v26 = vpack.c.bf16 %v7169_v3, %v7169_v3 }
 0x428   : > { %v9330_v15 = vpop.f32.mrb[42].mxu0  ;;  %v9370_v10 = vpop.f32.mrb[42].mxu1  ;;  %v13065_v1 = vpack.c.bf16 %v7153_v35, %v7153_v35  ;;  %v6425_v7 = vld [vmem:[%s14048_s25 + $0x148] sm:$0xff]  ;;  %v6189_v8 = vadd.s32 %v14502_v40, %v6009_v48 }
 0x429   : > { %v9368_v20 = vadd.f32 %v9367_v60, %v9328_v5  ;;  %v9331_v22 = vpop.f32.mrb[43].mxu0  ;;  %v9371_v17 = vpop.f32.mrb[43].mxu1  ;;  %v6184_v60 = vadd.s32 %v14502_v40, %v6004_v30  ;;  %v6187_v5 = vadd.s32 %v14502_v40, %v6007_v37  ;;  %v7171_v12 = vcombine.high %v6425_v7, %v6425_v7 }
 0x42a   : > { %vm6368_vm4 = vcmp.lt.s32.totalorder %v6189_v8, 91200  ;;  %v16458_v27 = vrot.slane %v6425_v7, %v14526_v0 }
 0x42b   : > { %13039 = vmatmul.mubr.msk.bf16.vlgmr.msra.gmra.mrb[148].mxu0 %vm16309_vm3, %v13038_v4  ;;  %13045 = vmatmul.mubr.msk.bf16.vlgmr.msra.gmra.mrb[148].mxu1 %vm16324_vm5, %v13044_v9  ;;  %v12572_v4 = vcombine.high %v16379_v51, %v16379_v51  ;;  %v6006_v9 = vadd.s32 20480, %v14508_v47  ;;  %vm6363_vm1 = vcmp.lt.s32.totalorder %v6184_v60, 91200  ;;  %vm6366_vm2 = vcmp.lt.s32.totalorder %v6187_v5, 91200  ;;  %vm16435_vm3 = vmpackc.low %vm6361_vm0, %vm6361_vm0 }
 0x42c   : > { %11534 = vmatpush1.bf16.xpose.msra.mxu0 %v12563_v2  ;;  %11574 = vmatpush1.bf16.xpose.msra.mxu1 %v12565_v18  ;;  %v16405_v2 = vrot.slane %v7154_v36, %v14526_v0  ;;  %v13062_v18 = vpack.c.bf16 %v16332_v14, %v16332_v14  ;;  %v16445_v14 = vld [vmem:[%s14056_s5 + $0x298] sm:$0xff]  ;;  %vm16450_vm5 = vmpackc.low %vm6363_vm1, %vm6363_vm1  ;;  %v7186_v41 = vcombine.high %v16458_v27, %v16458_v27  ;;  %v6017_v60 = vadd.s32 21888, %v14508_v47 }
 0x42d   : > { %13048 = vmatprep.mubr.msk.bf16.mxu0 %vm16336_vm6, %v13047_v13  ;;  %13054 = vmatprep.mubr.msk.bf16.mxu1 %vm13052_vm7, %v13053_v25  ;;  %v6011_v13 = vadd.s32 21120, %v14508_v47  ;;  %v16442_v25 = vld [vmem:[%s14056_s5 + $0x290] sm:$0xff]  ;;  %v6186_v32 = vadd.s32 %v14502_v40, %v6006_v9  ;;  %vm16462_vm6 = vmpackc.low %vm6366_vm2, %vm6366_vm2  ;;  %v12578_v37 = vcombine.high %v16445_v14, %v16445_v14  ;;  %v12577_v7 = vcombine.low %v16445_v14, %v16445_v14 }
 0x42e   : > { %v9407_v38 = vpop.f32.mrb[44].mxu0  ;;  %v9447_v34 = vpop.f32.mrb[44].mxu1  ;;  %11613 = vmatprep.subr.bf16.mxu0 %v12568_v28  ;;  %11653 = vmatprep.subr.bf16.mxu1 %v12570_v24  ;;  %v7170_v11 = vcombine.high %v16405_v2, %v16405_v2  ;;  %vm13076_vm7 = vmpackc.low %vm6368_vm4, %vm6368_vm4  ;;  %v12575_v55 = vcombine.low %v16442_v25, %v16442_v25  ;;  %v13080_v62 = vpack.c.bf16 %v16405_v2, %v16405_v2  ;;  %v6016_v14 = vadd.s32 21760, %v14508_v47 }
 0x42f   : > { %v9408_v43 = vadd.f32 %v9407_v38, %v9368_v20  ;;  %v9409_v45 = vpop.f32.mrb[45].mxu0  ;;  %v9449_v46 = vpop.f32.mrb[45].mxu1  ;;  %vm6365_vm8 = vcmp.lt.s32.totalorder %v6186_v32, 91200  ;;  %v13083_v2 = vpack.c.bf16 %v7186_v41, %v7186_v41 }
 0x430   : > { %v9410_v54 = vpop.f32.mrb[46].mxu0  ;;  %v9450_v50 = vpop.f32.mrb[46].mxu1  ;;  %v13077_v38 = vpack.c.bf16 %v7170_v11, %v7170_v11  ;;  %v6426_v45 = vld [vmem:[%s14048_s25 + $0x150] sm:$0xff]  ;;  %v6193_v46 = vadd.s32 %v14502_v40, %v6013_v21 }
 0x431   : > { %v9448_v59 = vadd.f32 %v9447_v34, %v9408_v43  ;;  %v9411_v61 = vpop.f32.mrb[47].mxu0  ;;  %v9451_v56 = vpop.f32.mrb[47].mxu1  ;;  %v6188_v34 = vadd.s32 %v14502_v40, %v6008_v6  ;;  %v6191_v43 = vadd.s32 %v14502_v40, %v6011_v13  ;;  %v7188_v48 = vcombine.high %v6426_v45, %v6426_v45 }
 0x432   : > { %vm6372_vm12 = vcmp.lt.s32.totalorder %v6193_v46, 91200  ;;  %v16521_v3 = vrot.slane %v6426_v45, %v14526_v0  ;;  %v6018_v56 = vadd.s32 22016, %v14508_v47 }
 0x433   : > { %13051 = vmatmul.mubr.msk.bf16.vlgmr.msra.gmra.mrb[152].mxu0 %vm16372_vm11, %v13050_v42  ;;  %13057 = vmatmul.mubr.msk.bf16.vlgmr.msra.gmra.mrb[152].mxu1 %vm16387_vm13, %v13056_v49  ;;  %v12576_v42 = vcombine.high %v16442_v25, %v16442_v25  ;;  %v6010_v49 = vadd.s32 20992, %v14508_v47  ;;  %vm6367_vm9 = vcmp.lt.s32.totalorder %v6188_v34, 91200  ;;  %vm6370_vm10 = vcmp.lt.s32.totalorder %v6191_v43, 91200  ;;  %vm16498_vm11 = vmpackc.low %vm6365_vm8, %vm6365_vm8 }
 0x434   : > { %11614 = vmatpush1.bf16.xpose.msra.mxu0 %v12567_v39  ;;  %11654 = vmatpush1.bf16.xpose.msra.mxu1 %v12569_v57  ;;  %v16468_v39 = vrot.slane %v7171_v12, %v14526_v0  ;;  %v13074_v57 = vpack.c.bf16 %v16395_v53, %v16395_v53  ;;  %v16508_v53 = vld [vmem:[%s14056_s5 + $0x2a8] sm:$0xff]  ;;  %vm16513_vm13 = vmpackc.low %vm6367_vm9, %vm6367_vm9  ;;  %v7203_v17 = vcombine.high %v16521_v3, %v16521_v3  ;;  %v6021_v34 = vadd.s32 22400, %v14508_v47 }
 0x435   : > { %13060 = vmatprep.mubr.msk.bf16.mxu0 %vm16399_vm14, %v13059_v52  ;;  %13066 = vmatprep.mubr.msk.bf16.mxu1 %vm13064_vm15, %v13065_v1  ;;  %v6015_v52 = vadd.s32 21632, %v14508_v47  ;;  %v16505_v1 = vld [vmem:[%s14056_s5 + $0x2a0] sm:$0xff]  ;;  %v6190_v8 = vadd.s32 %v14502_v40, %v6010_v49  ;;  %vm16525_vm14 = vmpackc.low %vm6370_vm10, %vm6370_vm10  ;;  %v12582_v13 = vcombine.high %v16508_v53, %v16508_v53  ;;  %v12581_v45 = vcombine.low %v16508_v53, %v16508_v53 }
 0x436   : > { %v9487_v15 = vpop.f32.mrb[48].mxu0  ;;  %v9527_v10 = vpop.f32.mrb[48].mxu1  ;;  %11693 = vmatprep.subr.bf16.mxu0 %v12572_v4  ;;  %11733 = vmatprep.subr.bf16.mxu1 %v12574_v63  ;;  %v7187_v51 = vcombine.high %v16468_v39, %v16468_v39  ;;  %vm13088_vm15 = vmpackc.low %vm6372_vm12, %vm6372_vm12  ;;  %v12579_v29 = vcombine.low %v16505_v1, %v16505_v1  ;;  %v13092_v36 = vpack.c.bf16 %v16468_v39, %v16468_v39 }
 0x437   : > { %v9488_v19 = vadd.f32 %v9487_v15, %v9448_v59  ;;  %v9489_v20 = vpop.f32.mrb[49].mxu0  ;;  %v9529_v22 = vpop.f32.mrb[49].mxu1  ;;  %vm6369_vm0 = vcmp.lt.s32.totalorder %v6190_v8, 91200  ;;  %v13095_v46 = vpack.c.bf16 %v7203_v17, %v7203_v17 }
 0x438   : > { %v9490_v28 = vpop.f32.mrb[50].mxu0  ;;  %v9530_v24 = vpop.f32.mrb[50].mxu1  ;;  %v13089_v15 = vpack.c.bf16 %v7187_v51, %v7187_v51  ;;  %v6427_v20 = vld [vmem:[%s14048_s25 + $0x158] sm:$0xff]  ;;  %v6197_v22 = vadd.s32 %v14502_v40, %v6017_v60 }
 0x439   : > { %v9528_v33 = vadd.f32 %v9527_v10, %v9488_v19  ;;  %v9491_v35 = vpop.f32.mrb[51].mxu0  ;;  %v9531_v30 = vpop.f32.mrb[51].mxu1  ;;  %v6192_v10 = vadd.s32 %v14502_v40, %v6012_v44  ;;  %v6195_v19 = vadd.s32 %v14502_v40, %v6015_v52  ;;  %v7205_v21 = vcombine.high %v6427_v20, %v6427_v20 }
 0x43a   : > { %vm6376_vm4 = vcmp.lt.s32.totalorder %v6197_v22, 91200  ;;  %v16584_v41 = vrot.slane %v6427_v20, %v14526_v0 }
 0x43b   : > { %13063 = vmatmul.mubr.msk.bf16.vlgmr.msra.gmra.mrb[156].mxu0 %vm16435_vm3, %v13062_v18  ;;  %13069 = vmatmul.mubr.msk.bf16.vlgmr.msra.gmra.mrb[156].mxu1 %vm16450_vm5, %v13068_v23  ;;  %v12580_v18 = vcombine.high %v16505_v1, %v16505_v1  ;;  %v6014_v23 = vadd.s32 21504, %v14508_v47  ;;  %vm6371_vm1 = vcmp.lt.s32.totalorder %v6192_v10, 91200  ;;  %vm6374_vm2 = vcmp.lt.s32.totalorder %v6195_v19, 91200  ;;  %vm16561_vm3 = vmpackc.low %vm6369_vm0, %vm6369_vm0 }
 0x43c   : > { %11694 = vmatpush1.bf16.xpose.msra.mxu0 %v12571_v16  ;;  %11734 = vmatpush1.bf16.xpose.msra.mxu1 %v12573_v31  ;;  %v16531_v16 = vrot.slane %v7188_v48, %v14526_v0  ;;  %v13086_v31 = vpack.c.bf16 %v16458_v27, %v16458_v27  ;;  %v16571_v27 = vld [vmem:[%s14056_s5 + $0x2b8] sm:$0xff]  ;;  %vm16576_vm5 = vmpackc.low %vm6371_vm1, %vm6371_vm1  ;;  %v6020_v1 = vadd.s32 22272, %v14508_v47 }
 0x43d   : > { %13072 = vmatprep.mubr.msk.bf16.mxu0 %vm16462_vm6, %v13071_v26  ;;  %13078 = vmatprep.mubr.msk.bf16.mxu1 %vm13076_vm7, %v13077_v38  ;;  %v6019_v26 = vadd.s32 22144, %v14508_v47  ;;  %v16568_v38 = vld [vmem:[%s14056_s5 + $0x2b0] sm:$0xff]  ;;  %v6194_v39 = vadd.s32 %v14502_v40, %v6014_v23  ;;  %vm16588_vm6 = vmpackc.low %vm6374_vm2, %vm6374_vm2  ;;  %v12586_v52 = vcombine.high %v16571_v27, %v16571_v27  ;;  %v12585_v10 = vcombine.low %v16571_v27, %v16571_v27 }
 0x43e   : > { %v9567_v54 = vpop.f32.mrb[52].mxu0  ;;  %v9607_v50 = vpop.f32.mrb[52].mxu1  ;;  %11773 = vmatprep.subr.bf16.mxu0 %v12576_v42  ;;  %11813 = vmatprep.subr.bf16.mxu1 %v12578_v37  ;;  %v7204_v25 = vcombine.high %v16531_v16, %v16531_v16  ;;  %vm13100_vm7 = vmpackc.low %vm6376_vm4, %vm6376_vm4  ;;  %v6200_v17 = vadd.s32 %v14502_v40, %v6020_v1 }
 0x43f   : > { %v9568_v58 = vadd.f32 %v9567_v54, %v9528_v33  ;;  %v9569_v59 = vpop.f32.mrb[53].mxu0  ;;  %v9609_v61 = vpop.f32.mrb[53].mxu1  ;;  %vm6373_vm8 = vcmp.lt.s32.totalorder %v6194_v39, 91200 }
 0x440   : > { %v9570_v4 = vpop.f32.mrb[54].mxu0  ;;  %v9610_v63 = vpop.f32.mrb[54].mxu1  ;;  %v13101_v54 = vpack.c.bf16 %v7204_v25, %v7204_v25  ;;  %v6201_v59 = vadd.s32 %v14502_v40, %v6021_v34  ;;  %v7220_v61 = vcombine.high %v16584_v41, %v16584_v41  ;;  %vm6379_vm1 = vcmp.lt.s32.totalorder %v6200_v17, 91200 }
 0x441   : > { %v9608_v9 = vadd.f32 %v9607_v50, %v9568_v58  ;;  %v9571_v11 = vpop.f32.mrb[55].mxu0  ;;  %v9611_v6 = vpop.f32.mrb[55].mxu1  ;;  %v6196_v50 = vadd.s32 %v14502_v40, %v6016_v14  ;;  %v6199_v58 = vadd.s32 %v14502_v40, %v6019_v26  ;;  %v13098_v4 = vpack.c.bf16 %v16521_v3, %v16521_v3  ;;  %v16619_v63 = vld [vmem:[%s14048_s25 + $0x160] sm:$0x3f]  ;;  %vm13115_vm4 = vmpackc.low %vm6379_vm1, %vm6379_vm1 }
 0x442   : > { %vm6380_vm12 = vcmp.lt.s32.totalorder %v6201_v59, 91200  ;;  %v7864_v11 = vld [vmem:[%s14056_s5 + $0x2c0] sm:$0xff]  ;;  %v6023_v3 = vadd.s32 22656, %v14508_v47  ;;  %v16643_v23 = vrot.slane %v16619_v63, %v14526_v0  ;;  %v13110_v26 = vpack.c.bf16 %v16584_v41, %v16584_v41 }
 0x443   : > { %13075 = vmatmul.mubr.msk.bf16.vlgmr.msra.gmra.mrb[160].mxu0 %vm16498_vm11, %v13074_v57  ;;  %13081 = vmatmul.mubr.msk.bf16.vlgmr.msra.gmra.mrb[160].mxu1 %vm16513_vm13, %v13080_v62  ;;  %v12584_v57 = vcombine.high %v16568_v38, %v16568_v38  ;;  %vm6375_vm9 = vcmp.lt.s32.totalorder %v6196_v50, 91200  ;;  %vm6378_vm10 = vcmp.lt.s32.totalorder %v6199_v58, 91200  ;;  %vm16623_vm11 = vmpackc.low %vm6373_vm8, %vm6373_vm8  ;;  %v12588_v25 = vcombine.high %v7864_v11, %v7864_v11 }
 0x444   : > { %11774 = vmatpush1.bf16.xpose.msra.mxu0 %v12575_v55  ;;  %11814 = vmatpush1.bf16.xpose.msra.mxu1 %v12577_v7  ;;  %v16594_v55 = vrot.slane %v7205_v21, %v14526_v0  ;;  %vm13103_vm13 = vmpackc.low %vm6375_vm9, %vm6375_vm9  ;;  %v6203_v14 = vadd.s32 %v14502_v40, %v6023_v3  ;;  %v6022_v21 = vadd.s32 22528, %v14508_v47 }
 0x445   : > { %13084 = vmatprep.mubr.msk.bf16.mxu0 %vm16525_vm14, %v13083_v2  ;;  %13090 = vmatprep.mubr.msk.bf16.mxu1 %vm13088_vm15, %v13089_v15  ;;  %v12583_v15 = vcombine.low %v16568_v38, %v16568_v38  ;;  %vm13106_vm14 = vmpackc.low %vm6378_vm10, %vm6378_vm10  ;;  %v7222_v38 = vcombine.high %v16619_v63, %v16619_v63 }
 0x446   : > { %v9647_v28 = vpop.f32.mrb[56].mxu0  ;;  %v9687_v24 = vpop.f32.mrb[56].mxu1  ;;  %11853 = vmatprep.subr.bf16.mxu0 %v12580_v18  ;;  %11893 = vmatprep.subr.bf16.mxu1 %v12582_v13  ;;  %v7221_v62 = vcombine.high %v16594_v55, %v16594_v55  ;;  %v13107_v18 = vpack.c.bf16 %v7220_v61, %v7220_v61  ;;  %v6198_v13 = vadd.s32 %v14502_v40, %v6018_v56  ;;  %vm13112_vm15 = vmpackc.low %vm6380_vm12, %vm6380_vm12 }
 0x447   : > { %v9648_v32 = vadd.f32 %v9647_v28, %v9608_v9  ;;  %v9649_v33 = vpop.f32.mrb[57].mxu0  ;;  %v9689_v35 = vpop.f32.mrb[57].mxu1  ;;  %v13104_v9 = vpack.c.bf16 %v16531_v16, %v16531_v16  ;;  %v7237_v28 = vcombine.high %v16643_v23, %v16643_v23  ;;  %v6202_v43 = vadd.s32 %v14502_v40, %v6022_v21 }
 0x448   : > { %v9650_v42 = vpop.f32.mrb[58].mxu0  ;;  %v9690_v37 = vpop.f32.mrb[58].mxu1  ;;  %v13113_v22 = vpack.c.bf16 %v7221_v62, %v7221_v62  ;;  %vm6377_vm0 = vcmp.lt.s32.totalorder %v6198_v13, 91200 }
 0x449   : > { %v9688_v49 = vadd.f32 %v9687_v24, %v9648_v32  ;;  %v9651_v51 = vpop.f32.mrb[59].mxu0  ;;  %v9691_v44 = vpop.f32.mrb[59].mxu1  ;;  %v6024_v24 = vadd.s32 22784, %v14508_v47  ;;  %v13852_v32 = vmov 0.0   ;;  %vm16658_vm2 = vmpackc.low %vm6377_vm0, %vm6377_vm0  ;;  %v13116_v47 = vpack.c.bf16 %v16594_v55, %v16594_v55  ;;  %v13682_v37 = vld [vmem:[%s14056_s5 + $0x2c8] ss:$0 sps:$4 sm:$0xff]  }
 0x44a   : > { %v12587_v42 = vcombine.low %v7864_v11, %v7864_v11  ;;  %v13119_v41 = vpack.c.bf16 %v7237_v28, %v7237_v28  ;;  %v7236_v51 = vrot.slane %v7222_v38, %v14526_v0 }
 0x44b   : > { %13087 = vmatmul.mubr.msk.bf16.vlgmr.msra.gmra.mrb[164].mxu0 %vm16561_vm3, %v13086_v31  ;;  %13093 = vmatmul.mubr.msk.bf16.vlgmr.msra.gmra.mrb[164].mxu1 %vm16576_vm5, %v13092_v36  ;;  %vm6382_vm3 = vcmp.lt.s32.totalorder %v6203_v14, 91200 }
 0x44c   : > { %11854 = vmatpush1.bf16.xpose.msra.mxu0 %v12579_v29  ;;  %11894 = vmatpush1.bf16.xpose.msra.mxu1 %v12581_v45  ;;  %vm13118_vm5 = vmpackc.low %vm6382_vm3, %vm6382_vm3 }
 0x44d   : > { %13096 = vmatprep.mubr.msk.bf16.mxu0 %vm16588_vm6, %v13095_v46  ;;  %13102 = vmatprep.mubr.msk.bf16.mxu1 %vm13100_vm7, %v13101_v54  ;;  %vm6381_vm6 = vcmp.lt.s32.totalorder %v6202_v43, 91200  ;;  %vm13853_vm7 = vmmov 0  }
 0x44e   : > { %v9727_v53 = vpop.f32.mrb[60].mxu0  ;;  %v9767_v60 = vpop.f32.mrb[60].mxu1  ;;  %11933 = vmatprep.subr.bf16.mxu0 %v12584_v57  ;;  %11973 = vmatprep.subr.bf16.mxu1 %v12586_v52  ;;  %vm13121_vm9 = vmpackc.low %vm6381_vm6, %vm6381_vm6  ;;  %v13125_v57 = vpack.c.bf16 %v7236_v51, %v7236_v51 }
 0x44f   : > { %v9728_v5 = vadd.f32 %v9727_v53, %v9688_v49  ;;  %v9729_v7 = vpop.f32.mrb[61].mxu0  ;;  %v9769_v2 = vpop.f32.mrb[61].mxu1  ;;  %v6204_v49 = vadd.s32 %v14502_v40, %v6024_v24  ;;  %v13122_v40 = vpack.c.bf16 %v16643_v23, %v16643_v23 }
 0x450   : > { %v9730_v6 = vpop.f32.mrb[62].mxu0  ;;  %v9770_v12 = vpop.f32.mrb[62].mxu1 }
 0x451   : > { %v9768_v19 = vadd.f32 %v9767_v60, %v9728_v5  ;;  %v9731_v16 = vpop.f32.mrb[63].mxu0  ;;  %v9771_v20 = vpop.f32.mrb[63].mxu1  ;;  %vm6383_vm8 = vcmp.lt.s32.totalorder %v6204_v49, 91200 }
 0x452   : > { %vm13124_vm10 = vmpackc.low %vm6383_vm8, %vm6383_vm8 }
 0x453   : > { %13099 = vmatmul.mubr.msk.bf16.vlgmr.msra.gmra.mrb[168].mxu0 %vm16623_vm11, %v13098_v4  ;;  %13105 = vmatmul.mubr.msk.bf16.vlgmr.msra.gmra.mrb[168].mxu1 %vm13103_vm13, %v13104_v9  ;;  %vm12094_vm11 = vcmask 58368  }
 0x454   : > { %11934 = vmatpush1.bf16.xpose.msra.mxu0 %v12583_v15  ;;  %11974 = vmatpush1.bf16.xpose.msra.mxu1 %v12585_v10 }
 0x455   : > { %13108 = vmatprep.mubr.msk.bf16.mxu0 %vm13106_vm14, %v13107_v18  ;;  %13114 = vmatprep.mubr.msk.bf16.mxu1 %vm13112_vm15, %v13113_v22 }
 0x456   : > { %v9807_v29 = vpop.f32.mrb[64].mxu0  ;;  %v9847_v31 = vpop.f32.mrb[64].mxu1  ;;  %12013 = vmatprep.subr.bf16.mxu0 %v12588_v25  ;;  %13141 = vmatprep.subr.bf16.mxu1 %v13852_v32 }
 0x457   : > { %v9808_v33 = vadd.f32 %v9807_v29, %v9768_v19  ;;  %v9809_v35 = vpop.f32.mrb[65].mxu0  ;;  %v9849_v30 = vpop.f32.mrb[65].mxu1 }
 0x458   : > { %v9810_v27 = vpop.f32.mrb[66].mxu0  ;;  %v9850_v34 = vpop.f32.mrb[66].mxu1 }
 0x459   : > { %v9848_v45 = vadd.f32 %v9847_v31, %v9808_v33  ;;  %v9811_v46 = vpop.f32.mrb[67].mxu0  ;;  %v9851_v39 = vpop.f32.mrb[67].mxu1 }
 0x45b   : > { %13111 = vmatmul.mubr.msk.bf16.vlgmr.msra.gmra.mrb[172].mxu0 %vm16658_vm2, %v13110_v26  ;;  %13117 = vmatmul.mubr.msk.bf16.vlgmr.msra.gmra.mrb[172].mxu1 %vm13115_vm4, %v13116_v47 }
 0x45c   : > { %12014 = vmatpush1.bf16.xpose.msra.mxu0 %v12587_v42  ;;  %13142 = vmatpush3.bf16.xpose.msra.mxu1 %v13682_v37 }
 0x45d   : > { %13120 = vmatprep.mubr.msk.bf16.mxu0 %vm13118_vm5, %v13119_v41  ;;  %13143 = vmatprep.mubr.msk.bf16.mxu1 %vm13853_vm7, %v13852_v32 }
 0x45e   : > { %v9887_v44 = vpop.f32.mrb[68].mxu0  ;;  %v9927_v48 = vpop.f32.mrb[68].mxu1 }
 0x45f   : > { %v9888_v54 = vadd.f32 %v9887_v44, %v9848_v45  ;;  %v9889_v50 = vpop.f32.mrb[69].mxu0  ;;  %v9929_v55 = vpop.f32.mrb[69].mxu1 }
 0x460   : > { %v9890_v52 = vpop.f32.mrb[70].mxu0  ;;  %v9930_v58 = vpop.f32.mrb[70].mxu1 }
 0x461   : > { %v9928_v0 = vadd.f32 %v9927_v48, %v9888_v54  ;;  %v9891_v59 = vpop.f32.mrb[71].mxu0  ;;  %v9931_v61 = vpop.f32.mrb[71].mxu1 }
 0x463   : > { %13123 = vmatmul.mubr.msk.bf16.vlgmr.msra.gmra.mrb[176].mxu0 %vm13121_vm9, %v13122_v40  ;;  %13144 = vmatmul.mubr.msk.bf16.vlgmr.msra.gmra.mrb[176].mxu1 %vm13124_vm10, %v13125_v57 }
 0x466   : > { %v9967_v56 = vpop.f32.mrb[72].mxu0  ;;  %v10007_v62 = vpop.f32.mrb[72].mxu1 }
 0x467   : > { %v9968_v1 = vadd.f32 %v9967_v56, %v9928_v0  ;;  %v9969_v53 = vpop.f32.mrb[73].mxu0  ;;  %v10009_v60 = vpop.f32.mrb[73].mxu1 }
 0x468   : > { %v9970_v4 = vpop.f32.mrb[74].mxu0  ;;  %v10010_v63 = vpop.f32.mrb[74].mxu1 }
 0x469   : > { %v10008_v5 = vadd.f32 %v10007_v62, %v9968_v1  ;;  %v9971_v7 = vpop.f32.mrb[75].mxu0  ;;  %v10011_v2 = vpop.f32.mrb[75].mxu1 }
 0x46e   : > { %v10047_v8 = vpop.f32.mrb[76].mxu0  ;;  %v10087_v9 = vpop.f32.mrb[76].mxu1 }
 0x46f   : > { %v10048_v11 = vadd.f32 %v10047_v8, %v10008_v5  ;;  %v10049_v3 = vpop.f32.mrb[77].mxu0  ;;  %v10089_v6 = vpop.f32.mrb[77].mxu1 }
 0x470   : > { %v10050_v12 = vpop.f32.mrb[78].mxu0  ;;  %v10090_v15 = vpop.f32.mrb[78].mxu1 }
 0x471   : > { %v10088_v10 = vadd.f32 %v10087_v9, %v10048_v11  ;;  %v10051_v18 = vpop.f32.mrb[79].mxu0  ;;  %v10091_v13 = vpop.f32.mrb[79].mxu1 }
 0x476   : > { %v10127_v19 = vpop.f32.mrb[80].mxu0  ;;  %v10167_v16 = vpop.f32.mrb[80].mxu1 }
 0x477   : > { %v10128_v20 = vadd.f32 %v10127_v19, %v10088_v10  ;;  %v10129_v22 = vpop.f32.mrb[81].mxu0  ;;  %v10169_v17 = vpop.f32.mrb[81].mxu1 }
 0x478   : > { %v10130_v23 = vpop.f32.mrb[82].mxu0  ;;  %v10170_v25 = vpop.f32.mrb[82].mxu1 }
 0x479   : > { %v10168_v14 = vadd.f32 %v10167_v16, %v10128_v20  ;;  %v10131_v21 = vpop.f32.mrb[83].mxu0  ;;  %v10171_v28 = vpop.f32.mrb[83].mxu1 }
 0x47e   : > { %v10207_v24 = vpop.f32.mrb[84].mxu0  ;;  %v10247_v29 = vpop.f32.mrb[84].mxu1 }
 0x47f   : > { %v10208_v31 = vadd.f32 %v10207_v24, %v10168_v14  ;;  %v10209_v26 = vpop.f32.mrb[85].mxu0  ;;  %v10249_v32 = vpop.f32.mrb[85].mxu1 }
 0x480   : > { %v10210_v33 = vpop.f32.mrb[86].mxu0  ;;  %v10250_v35 = vpop.f32.mrb[86].mxu1 }
 0x481   : > { %v10248_v30 = vadd.f32 %v10247_v29, %v10208_v31  ;;  %v10211_v36 = vpop.f32.mrb[87].mxu0  ;;  %v10251_v47 = vpop.f32.mrb[87].mxu1 }
 0x486   : > { %v10287_v38 = vpop.f32.mrb[88].mxu0  ;;  %v10327_v27 = vpop.f32.mrb[88].mxu1 }
 0x487   : > { %v10288_v34 = vadd.f32 %v10287_v38, %v10248_v30  ;;  %v10289_v42 = vpop.f32.mrb[89].mxu0  ;;  %v10329_v37 = vpop.f32.mrb[89].mxu1 }
 0x488   : > { %v10290_v43 = vpop.f32.mrb[90].mxu0  ;;  %v10330_v45 = vpop.f32.mrb[90].mxu1 }
 0x489   : > { %v10328_v46 = vadd.f32 %v10327_v27, %v10288_v34  ;;  %v10291_v39 = vpop.f32.mrb[91].mxu0  ;;  %v10331_v41 = vpop.f32.mrb[91].mxu1 }
 0x48e   : > { %v10367_v49 = vpop.f32.mrb[92].mxu0  ;;  %v10407_v51 = vpop.f32.mrb[92].mxu1 }
 0x48f   : > { %v10368_v44 = vadd.f32 %v10367_v49, %v10328_v46  ;;  %v10369_v48 = vpop.f32.mrb[93].mxu0  ;;  %v10409_v54 = vpop.f32.mrb[93].mxu1 }
 0x490   : > { %v10370_v50 = vpop.f32.mrb[94].mxu0  ;;  %v10410_v55 = vpop.f32.mrb[94].mxu1 }
 0x491   : > { %v10408_v40 = vadd.f32 %v10407_v51, %v10368_v44  ;;  %v10371_v57 = vpop.f32.mrb[95].mxu0  ;;  %v10411_v52 = vpop.f32.mrb[95].mxu1 }
 0x496   : > { %v10447_v58 = vpop.f32.mrb[96].mxu0  ;;  %v10487_v0 = vpop.f32.mrb[96].mxu1 }
 0x497   : > { %v10448_v59 = vadd.f32 %v10447_v58, %v10408_v40  ;;  %v10449_v61 = vpop.f32.mrb[97].mxu0  ;;  %v10489_v56 = vpop.f32.mrb[97].mxu1 }
 0x498   : > { %v10450_v62 = vpop.f32.mrb[98].mxu0  ;;  %v10490_v1 = vpop.f32.mrb[98].mxu1 }
 0x499   : > { %v10488_v53 = vadd.f32 %v10487_v0, %v10448_v59  ;;  %v10451_v60 = vpop.f32.mrb[99].mxu0  ;;  %v10491_v4 = vpop.f32.mrb[99].mxu1 }
 0x49e   : > { %v10527_v63 = vpop.f32.mrb[100].mxu0  ;;  %v10567_v5 = vpop.f32.mrb[100].mxu1 }
 0x49f   : > { %v10528_v7 = vadd.f32 %v10527_v63, %v10488_v53  ;;  %v10529_v2 = vpop.f32.mrb[101].mxu0  ;;  %v10569_v8 = vpop.f32.mrb[101].mxu1 }
 0x4a0   : > { %v10530_v9 = vpop.f32.mrb[102].mxu0  ;;  %v10570_v11 = vpop.f32.mrb[102].mxu1 }
 0x4a1   : > { %v10568_v3 = vadd.f32 %v10567_v5, %v10528_v7  ;;  %v10531_v6 = vpop.f32.mrb[103].mxu0  ;;  %v10571_v12 = vpop.f32.mrb[103].mxu1 }
 0x4a6   : > { %v10607_v15 = vpop.f32.mrb[104].mxu0  ;;  %v10647_v10 = vpop.f32.mrb[104].mxu1 }
 0x4a7   : > { %v10608_v18 = vadd.f32 %v10607_v15, %v10568_v3  ;;  %v10609_v13 = vpop.f32.mrb[105].mxu0  ;;  %v10649_v19 = vpop.f32.mrb[105].mxu1 }
 0x4a8   : > { %v10610_v16 = vpop.f32.mrb[106].mxu0  ;;  %v10650_v20 = vpop.f32.mrb[106].mxu1 }
 0x4a9   : > { %v10648_v22 = vadd.f32 %v10647_v10, %v10608_v18  ;;  %v10611_v17 = vpop.f32.mrb[107].mxu0  ;;  %v10651_v23 = vpop.f32.mrb[107].mxu1 }
 0x4ae   : > { %v10687_v25 = vpop.f32.mrb[108].mxu0  ;;  %v10727_v14 = vpop.f32.mrb[108].mxu1 }
 0x4af   : > { %v10688_v21 = vadd.f32 %v10687_v25, %v10648_v22  ;;  %v10689_v28 = vpop.f32.mrb[109].mxu0  ;;  %v10729_v24 = vpop.f32.mrb[109].mxu1 }
 0x4b0   : > { %v10690_v29 = vpop.f32.mrb[110].mxu0  ;;  %v10730_v31 = vpop.f32.mrb[110].mxu1 }
 0x4b1   : > { %v10728_v26 = vadd.f32 %v10727_v14, %v10688_v21  ;;  %v10691_v32 = vpop.f32.mrb[111].mxu0  ;;  %v10731_v33 = vpop.f32.mrb[111].mxu1 }
 0x4b6   : > { %v10767_v35 = vpop.f32.mrb[112].mxu0  ;;  %v10807_v30 = vpop.f32.mrb[112].mxu1 }
 0x4b7   : > { %v10768_v36 = vadd.f32 %v10767_v35, %v10728_v26  ;;  %v10769_v47 = vpop.f32.mrb[113].mxu0  ;;  %v10809_v38 = vpop.f32.mrb[113].mxu1 }
 0x4b8   : > { %v10770_v27 = vpop.f32.mrb[114].mxu0  ;;  %v10810_v34 = vpop.f32.mrb[114].mxu1 }
 0x4b9   : > { %v10808_v42 = vadd.f32 %v10807_v30, %v10768_v36  ;;  %v10771_v37 = vpop.f32.mrb[115].mxu0  ;;  %v10811_v43 = vpop.f32.mrb[115].mxu1 }
 0x4be   : > { %v10847_v45 = vpop.f32.mrb[116].mxu0  ;;  %v10887_v46 = vpop.f32.mrb[116].mxu1 }
 0x4bf   : > { %v10848_v39 = vadd.f32 %v10847_v45, %v10808_v42  ;;  %v10849_v41 = vpop.f32.mrb[117].mxu0  ;;  %v10889_v49 = vpop.f32.mrb[117].mxu1 }
 0x4c0   : > { %v10850_v51 = vpop.f32.mrb[118].mxu0  ;;  %v10890_v44 = vpop.f32.mrb[118].mxu1 }
 0x4c1   : > { %v10888_v48 = vadd.f32 %v10887_v46, %v10848_v39  ;;  %v10851_v54 = vpop.f32.mrb[119].mxu0  ;;  %v10891_v50 = vpop.f32.mrb[119].mxu1 }
 0x4c6   : > { %v10927_v55 = vpop.f32.mrb[120].mxu0  ;;  %v10967_v40 = vpop.f32.mrb[120].mxu1 }
 0x4c7   : > { %v10928_v57 = vadd.f32 %v10927_v55, %v10888_v48  ;;  %v10929_v52 = vpop.f32.mrb[121].mxu0  ;;  %v10969_v58 = vpop.f32.mrb[121].mxu1 }
 0x4c8   : > { %v10930_v0 = vpop.f32.mrb[122].mxu0  ;;  %v10970_v59 = vpop.f32.mrb[122].mxu1 }
 0x4c9   : > { %v10968_v61 = vadd.f32 %v10967_v40, %v10928_v57  ;;  %v10931_v56 = vpop.f32.mrb[123].mxu0  ;;  %v10971_v62 = vpop.f32.mrb[123].mxu1 }
 0x4ce   : > { %v11007_v1 = vpop.f32.mrb[124].mxu0  ;;  %v11047_v53 = vpop.f32.mrb[124].mxu1 }
 0x4cf   : > { %v11008_v60 = vadd.f32 %v11007_v1, %v10968_v61  ;;  %v11009_v4 = vpop.f32.mrb[125].mxu0  ;;  %v11049_v63 = vpop.f32.mrb[125].mxu1 }
 0x4d0   : > { %v11010_v5 = vpop.f32.mrb[126].mxu0  ;;  %v11050_v7 = vpop.f32.mrb[126].mxu1 }
 0x4d1   : > { %v11048_v2 = vadd.f32 %v11047_v53, %v11008_v60  ;;  %v11011_v8 = vpop.f32.mrb[127].mxu0  ;;  %v11051_v9 = vpop.f32.mrb[127].mxu1 }
 0x4d6   : > { %v11087_v11 = vpop.f32.mrb[128].mxu0  ;;  %v11127_v3 = vpop.f32.mrb[128].mxu1 }
 0x4d7   : > { %v11088_v6 = vadd.f32 %v11087_v11, %v11048_v2  ;;  %v11089_v12 = vpop.f32.mrb[129].mxu0  ;;  %v11129_v15 = vpop.f32.mrb[129].mxu1 }
 0x4d8   : > { %v11090_v10 = vpop.f32.mrb[130].mxu0  ;;  %v11130_v18 = vpop.f32.mrb[130].mxu1 }
 0x4d9   : > { %v11128_v13 = vadd.f32 %v11127_v3, %v11088_v6  ;;  %v11091_v19 = vpop.f32.mrb[131].mxu0  ;;  %v11131_v16 = vpop.f32.mrb[131].mxu1 }
 0x4de   : > { %v11167_v20 = vpop.f32.mrb[132].mxu0  ;;  %v11207_v22 = vpop.f32.mrb[132].mxu1 }
 0x4df   : > { %v11168_v17 = vadd.f32 %v11167_v20, %v11128_v13  ;;  %v11169_v23 = vpop.f32.mrb[133].mxu0  ;;  %v11209_v25 = vpop.f32.mrb[133].mxu1 }
 0x4e0   : > { %v11170_v14 = vpop.f32.mrb[134].mxu0  ;;  %v11210_v21 = vpop.f32.mrb[134].mxu1 }
 0x4e1   : > { %v11208_v28 = vadd.f32 %v11207_v22, %v11168_v17  ;;  %v11171_v24 = vpop.f32.mrb[135].mxu0  ;;  %v11211_v29 = vpop.f32.mrb[135].mxu1 }
 0x4e6   : > { %v11247_v31 = vpop.f32.mrb[136].mxu0  ;;  %v11287_v26 = vpop.f32.mrb[136].mxu1 }
 0x4e7   : > { %v11248_v32 = vadd.f32 %v11247_v31, %v11208_v28  ;;  %v11249_v33 = vpop.f32.mrb[137].mxu0  ;;  %v11289_v35 = vpop.f32.mrb[137].mxu1 }
 0x4e8   : > { %v11250_v30 = vpop.f32.mrb[138].mxu0  ;;  %v11290_v36 = vpop.f32.mrb[138].mxu1 }
 0x4e9   : > { %v11288_v47 = vadd.f32 %v11287_v26, %v11248_v32  ;;  %v11251_v38 = vpop.f32.mrb[139].mxu0  ;;  %v11291_v27 = vpop.f32.mrb[139].mxu1 }
 0x4ee   : > { %v11327_v34 = vpop.f32.mrb[140].mxu0  ;;  %v11367_v42 = vpop.f32.mrb[140].mxu1 }
 0x4ef   : > { %v11328_v37 = vadd.f32 %v11327_v34, %v11288_v47  ;;  %v11329_v43 = vpop.f32.mrb[141].mxu0  ;;  %v11369_v45 = vpop.f32.mrb[141].mxu1 }
 0x4f0   : > { %v11330_v46 = vpop.f32.mrb[142].mxu0  ;;  %v11370_v39 = vpop.f32.mrb[142].mxu1 }
 0x4f1   : > { %v11368_v41 = vadd.f32 %v11367_v42, %v11328_v37  ;;  %v11331_v49 = vpop.f32.mrb[143].mxu0  ;;  %v11371_v51 = vpop.f32.mrb[143].mxu1 }
 0x4f6   : > { %v11407_v44 = vpop.f32.mrb[144].mxu0  ;;  %v11447_v48 = vpop.f32.mrb[144].mxu1 }
 0x4f7   : > { %v11408_v54 = vadd.f32 %v11407_v44, %v11368_v41  ;;  %v11409_v50 = vpop.f32.mrb[145].mxu0  ;;  %v11449_v55 = vpop.f32.mrb[145].mxu1 }
 0x4f8   : > { %v11410_v40 = vpop.f32.mrb[146].mxu0  ;;  %v11450_v57 = vpop.f32.mrb[146].mxu1 }
 0x4f9   : > { %v11448_v52 = vadd.f32 %v11447_v48, %v11408_v54  ;;  %v11411_v58 = vpop.f32.mrb[147].mxu0  ;;  %v11451_v0 = vpop.f32.mrb[147].mxu1 }
 0x4fe   : > { %v11487_v59 = vpop.f32.mrb[148].mxu0  ;;  %v11527_v61 = vpop.f32.mrb[148].mxu1 }
 0x4ff   : > { %v11488_v56 = vadd.f32 %v11487_v59, %v11448_v52  ;;  %v11489_v62 = vpop.f32.mrb[149].mxu0  ;;  %v11529_v1 = vpop.f32.mrb[149].mxu1 }
 0x500   : > { %v11490_v53 = vpop.f32.mrb[150].mxu0  ;;  %v11530_v60 = vpop.f32.mrb[150].mxu1 }
 0x501   : > { %v11528_v4 = vadd.f32 %v11527_v61, %v11488_v56  ;;  %v11491_v63 = vpop.f32.mrb[151].mxu0  ;;  %v11531_v5 = vpop.f32.mrb[151].mxu1 }
 0x506   : > { %v11567_v7 = vpop.f32.mrb[152].mxu0  ;;  %v11607_v2 = vpop.f32.mrb[152].mxu1 }
 0x507   : > { %v11568_v8 = vadd.f32 %v11567_v7, %v11528_v4  ;;  %v11569_v9 = vpop.f32.mrb[153].mxu0  ;;  %v11609_v11 = vpop.f32.mrb[153].mxu1 }
 0x508   : > { %v11570_v3 = vpop.f32.mrb[154].mxu0  ;;  %v11610_v6 = vpop.f32.mrb[154].mxu1 }
 0x509   : > { %v11608_v12 = vadd.f32 %v11607_v2, %v11568_v8  ;;  %v11571_v15 = vpop.f32.mrb[155].mxu0  ;;  %v11611_v10 = vpop.f32.mrb[155].mxu1  ;;  %v7596_v2 = vld [vmem:[%s14073_s28] sm:$0x3] }
 0x50e   : > { %v11647_v18 = vpop.f32.mrb[156].mxu0  ;;  %v11687_v13 = vpop.f32.mrb[156].mxu1 }
 0x50f   : > { %v11648_v19 = vadd.f32 %v11647_v18, %v11608_v12  ;;  %v11649_v16 = vpop.f32.mrb[157].mxu0  ;;  %v11689_v20 = vpop.f32.mrb[157].mxu1 }
 0x510   : > { %v11650_v22 = vpop.f32.mrb[158].mxu0  ;;  %v11690_v17 = vpop.f32.mrb[158].mxu1 }
 0x511   : > { %v11688_v23 = vadd.f32 %v11687_v13, %v11648_v19  ;;  %v11651_v25 = vpop.f32.mrb[159].mxu0  ;;  %v11691_v14 = vpop.f32.mrb[159].mxu1 }
 0x516   : > { %v11727_v21 = vpop.f32.mrb[160].mxu0  ;;  %v11767_v28 = vpop.f32.mrb[160].mxu1 }
 0x517   : > { %v11728_v24 = vadd.f32 %v11727_v21, %v11688_v23  ;;  %v11729_v29 = vpop.f32.mrb[161].mxu0  ;;  %v11769_v31 = vpop.f32.mrb[161].mxu1 }
 0x518   : > { %v11730_v26 = vpop.f32.mrb[162].mxu0  ;;  %v11770_v32 = vpop.f32.mrb[162].mxu1 }
 0x519   : > { %v11768_v33 = vadd.f32 %v11767_v28, %v11728_v24  ;;  %v11731_v35 = vpop.f32.mrb[163].mxu0  ;;  %v11771_v30 = vpop.f32.mrb[163].mxu1 }
 0x51e   : > { %v11807_v36 = vpop.f32.mrb[164].mxu0  ;;  %v11847_v47 = vpop.f32.mrb[164].mxu1 }
 0x51f   : > { %v11808_v38 = vadd.f32 %v11807_v36, %v11768_v33  ;;  %v11809_v27 = vpop.f32.mrb[165].mxu0  ;;  %v11849_v34 = vpop.f32.mrb[165].mxu1 }
 0x520   : > { %v11810_v42 = vpop.f32.mrb[166].mxu0  ;;  %v11850_v37 = vpop.f32.mrb[166].mxu1 }
 0x521   : > { %v11848_v43 = vadd.f32 %v11847_v47, %v11808_v38  ;;  %v11811_v45 = vpop.f32.mrb[167].mxu0  ;;  %v11851_v46 = vpop.f32.mrb[167].mxu1 }
 0x526   : > { %v11887_v39 = vpop.f32.mrb[168].mxu0  ;;  %v11927_v41 = vpop.f32.mrb[168].mxu1 }
 0x527   : > { %v11888_v49 = vadd.f32 %v11887_v39, %v11848_v43  ;;  %v11889_v51 = vpop.f32.mrb[169].mxu0  ;;  %v11929_v44 = vpop.f32.mrb[169].mxu1 }
 0x528   : > { %v11890_v48 = vpop.f32.mrb[170].mxu0  ;;  %v11930_v54 = vpop.f32.mrb[170].mxu1 }
 0x529   : > { %v11928_v50 = vadd.f32 %v11927_v41, %v11888_v49  ;;  %v11891_v55 = vpop.f32.mrb[171].mxu0  ;;  %v11931_v40 = vpop.f32.mrb[171].mxu1 }
 0x52e   : > { %v11967_v57 = vpop.f32.mrb[172].mxu0  ;;  %v12007_v52 = vpop.f32.mrb[172].mxu1 }
 0x52f   : > { %v11968_v58 = vadd.f32 %v11967_v57, %v11928_v50  ;;  %v11969_v0 = vpop.f32.mrb[173].mxu0  ;;  %v12009_v59 = vpop.f32.mrb[173].mxu1 }
 0x530   : > { %v11970_v61 = vpop.f32.mrb[174].mxu0  ;;  %v12010_v56 = vpop.f32.mrb[174].mxu1 }
 0x531   : > { %v12008_v62 = vadd.f32 %v12007_v52, %v11968_v58  ;;  %v11971_v1 = vpop.f32.mrb[175].mxu0  ;;  %v12011_v53 = vpop.f32.mrb[175].mxu1 }
 0x536   : > { %v12047_v60 = vpop.f32.mrb[176].mxu0  ;;  %v12087_v4 = vpop.f32.mrb[176].mxu1 }
 0x537   : > { %v12048_v63 = vadd.f32 %v12047_v60, %v12008_v62  ;;  %v12049_v5 = vpop.f32.mrb[177].mxu0  ;;  %v13145_v7 = vpop.f32.mrb[177].mxu1 }
 0x538   : > { %v12050_v8 = vpop.f32.mrb[178].mxu0  ;;  %v12090_v9 = vpop.f32.mrb[178].mxu1 }
 0x539   : > { %v12088_v11 = vadd.f32 %v12087_v4, %v12048_v63  ;;  %v12051_v3 = vpop.f32.mrb[179].mxu0  ;;  %v13146_v6 = vpop.f32.mrb[179].mxu1 }
 0x53b   : > { %v12093_v12 = vadd.f32 %v12088_v11, %v7596_v2 }
 0x53d   : > { %12095 = vst.msk [vmem:[%s14073_s28] sm:$0x3] %vm12094_vm11, %v12093_v12 }
 0x53e PF: > { %s19_s19 = sadd.s32 1, %s13842_s19   ;;  %s16939_s12 = smov %s13818_s13 }
 0x53f   : > { %p16_p6 = scmp.ge.s32.totalorder %s19_s19, 6   ;;  %s16940_s13 = smov %s13822_s14 }
 0x540   : > { %s16941_s14 = smov %s13955_s6  ;;  %s16942_s15 = smov %s13834_s17 }
 0x541   : > { %s16943_s16 = smov %s13838_s18  ;;  %s16944_s17 = smov %s16947_s21 }
 0x542   : > { %s16945_s18 = smov %s16951_s22  ;;  %18 = sbr.rel (!%p16_p6) target bundleno = 9 (0x9), region = 105 }
 0x549   :  { %12115 = vsyncpa [#allocation3], 1 }
 0x54a   :  { %12117 = vsyncpa [#allocation3 + $0x1], 1 }
 0x54b   :  { %12118 = vsyncpa [#allocation5], 1 }
 0x54c   :  { %12120 = vsyncpa [#allocation5 + $0x1], 1 }

</bundles_post_ra>
